<compile_context>
chip_gen: v7x
topology: tpu7x:2x2x1
jax: 0.10.0
libtpu: 0.0.40
codegen_flags: <defaults>
</compile_context>

<pallas_src>
import jax
import jax.numpy as jnp
from jax.experimental import pallas as pl
from jax.experimental.pallas import tpu as pltpu

_EPS = 1e-5
_LANE = 128
_VMEM_LIMIT = 32 * 1024 * 1024


# ---------------- small helpers ----------------

def _round_up(n, m):
    return ((n + m - 1) // m) * m


def _pad_last(a, target):
    pad = target - a.shape[-1]
    if pad == 0:
        return a
    widths = [(0, 0)] * (a.ndim - 1) + [(0, pad)]
    return jnp.pad(a, widths)


def _pad2(a, shape):
    return jnp.pad(a, ((0, shape[0] - a.shape[0]), (0, shape[1] - a.shape[1])))


def _cparams(parallel):
    return pltpu.CompilerParams(
        dimension_semantics=(("parallel",) if parallel else ("arbitrary",)),
        vmem_limit_bytes=_VMEM_LIMIT)


def _tap(offset, size, stride):
    # static slice for stride 1, strided pl.ds otherwise
    if stride == 1:
        return slice(offset, offset + size)
    return pl.ds(offset, size, stride=stride)


def _sumsq(y):
    # per-channel (sum, sum of squares) of a (rows, C) f32 tile -> (2, C)
    return jnp.concatenate([jnp.sum(y, axis=0, keepdims=True),
                            jnp.sum(y * y, axis=0, keepdims=True)], axis=0)


def _affine_from_stats(stats, gamma, beta, count, c_pad):
    # stats: (2, c_pad) accumulated (sum, sum_sq); biased batch var (BN default).
    mean = stats[0] / count
    var = jnp.maximum(stats[1] / count - mean * mean, 0.0)
    g = jnp.pad(gamma.astype(jnp.float32), (0, c_pad - gamma.shape[0]))
    b = jnp.pad(beta.astype(jnp.float32), (0, c_pad - beta.shape[0]))
    scale = g * jax.lax.rsqrt(var + _EPS)
    shift = b - mean * scale
    return jnp.stack([scale, shift], axis=0)          # (2, c_pad) f32


# ---------------- Pallas kernels ----------------

def _conv1x1_stats_kernel(x_ref, w_ref, y_ref, s_ref):
    @pl.when(pl.program_id(0) == 0)
    def _init():
        s_ref[...] = jnp.zeros_like(s_ref)
    y = jnp.dot(x_ref[...], w_ref[...], preferred_element_type=jnp.float32)
    y_ref[...] = y.astype(y_ref.dtype)
    s_ref[...] += _sumsq(y)


def _conv1x1_dual_stats_kernel(x_ref, w1_ref, wd_ref,
                               y1_ref, yd_ref, s1_ref, sd_ref):
    # conv1 and the downsample 1x1 conv share the same resident input block.
    @pl.when(pl.program_id(0) == 0)
    def _init():
        s1_ref[...] = jnp.zeros_like(s1_ref)
        sd_ref[...] = jnp.zeros_like(sd_ref)
    x = x_ref[...]
    y1 = jnp.dot(x, w1_ref[...], preferred_element_type=jnp.float32)
    yd = jnp.dot(x, wd_ref[...], preferred_element_type=jnp.float32)
    y1_ref[...] = y1.astype(y1_ref.dtype)
    yd_ref[...] = yd.astype(yd_ref.dtype)
    s1_ref[...] += _sumsq(y1)
    sd_ref[...] += _sumsq(yd)


def _make_conv3x3_stats_kernel(H, W, Ho, Wo, pad, stride, dilation):
    def kernel(y1_ref, sc1_ref, w2_ref, z2_ref, s2_ref, hp_ref):
        @pl.when(pl.program_id(0) == 0)
        def _init():
            s2_ref[...] = jnp.zeros_like(s2_ref)
            hp_ref[...] = jnp.zeros_like(hp_ref)   # zero padding ring persists
        cp = y1_ref.shape[-1]
        # BN1 (single FMA) + ReLU in f32, then spatial zero-pad via VMEM scratch.
        y1 = y1_ref[...].astype(jnp.float32)                       # (H, W, Cp)
        h = jnp.maximum(y1 * sc1_ref[0:1, :] + sc1_ref[1:2, :], 0.0)
        hp_ref[pad:pad + H, pad:pad + W, :] = h.astype(hp_ref.dtype)
        # 3x3 conv: tap-grouped per ky -> 3 matmuls with K = 3*Cp (no HBM im2col).
        acc = jnp.zeros((Ho * Wo, cp), jnp.float32)
        for ky in range(3):
            taps = [hp_ref[_tap(ky * dilation, Ho, stride),
                           _tap(kx * dilation, Wo, stride), :]
                    for kx in range(3)]
            patch = jnp.concatenate(taps, axis=-1).reshape(Ho * Wo, 3 * cp)
            acc = acc + jnp.dot(patch, w2_ref[ky],
                                preferred_element_type=jnp.float32)
        z2_ref[...] = acc.astype(z2_ref.dtype)
        s2_ref[...] += _sumsq(acc)
    return kernel


def _bn_relu_conv1x1_stats_kernel(z_ref, sc_ref, w_ref, o_ref, s_ref):
    @pl.when(pl.program_id(0) == 0)
    def _init():
        s_ref[...] = jnp.zeros_like(s_ref)
    z = z_ref[...].astype(jnp.float32)
    h = jnp.maximum(z * sc_ref[0:1, :] + sc_ref[1:2, :], 0.0)
    y = jnp.dot(h.astype(w_ref.dtype), w_ref[...],
                preferred_element_type=jnp.float32)
    o_ref[...] = y.astype(o_ref.dtype)
    s_ref[...] += _sumsq(y)


def _residual_bn_relu_kernel(z3_ref, id_ref, sc3_ref, scd_ref, o_ref):
    main = z3_ref[...].astype(jnp.float32) * sc3_ref[0:1, :] + sc3_ref[1:2, :]
    ident = id_ref[...].astype(jnp.float32) * scd_ref[0:1, :] + scd_ref[1:2, :]
    o_ref[...] = jnp.maximum(main + ident, 0.0)


# ---------------- pallas_call wrappers ----------------

def _conv1x1_stats(x3, w):
    N, S, ci = x3.shape
    co = w.shape[1]
    return pl.pallas_call(
        _conv1x1_stats_kernel,
        grid=(N,),
        in_specs=[pl.BlockSpec((None, S, ci), lambda n: (n, 0, 0)),
                  pl.BlockSpec((ci, co), lambda n: (0, 0))],
        out_specs=[pl.BlockSpec((None, S, co), lambda n: (n, 0, 0)),
                   pl.BlockSpec((2, co), lambda n: (0, 0))],
        out_shape=[jax.ShapeDtypeStruct((N, S, co), x3.dtype),
                   jax.ShapeDtypeStruct((2, co), jnp.float32)],
        compiler_params=_cparams(parallel=False),
    )(x3, w)


def _conv1x1_dual_stats(x3, w1, wd):
    N, S, ci = x3.shape
    c1, cd = w1.shape[1], wd.shape[1]
    return pl.pallas_call(
        _conv1x1_dual_stats_kernel,
        grid=(N,),
        in_specs=[pl.BlockSpec((None, S, ci), lambda n: (n, 0, 0)),
                  pl.BlockSpec((ci, c1), lambda n: (0, 0)),
                  pl.BlockSpec((ci, cd), lambda n: (0, 0))],
        out_specs=[pl.BlockSpec((None, S, c1), lambda n: (n, 0, 0)),
                   pl.BlockSpec((None, S, cd), lambda n: (n, 0, 0)),
                   pl.BlockSpec((2, c1), lambda n: (0, 0)),
                   pl.BlockSpec((2, cd), lambda n: (0, 0))],
        out_shape=[jax.ShapeDtypeStruct((N, S, c1), x3.dtype),
                   jax.ShapeDtypeStruct((N, S, cd), x3.dtype),
                   jax.ShapeDtypeStruct((2, c1), jnp.float32),
                   jax.ShapeDtypeStruct((2, cd), jnp.float32)],
        compiler_params=_cparams(parallel=False),
    )(x3, w1, wd)


def _conv3x3_stats(y1_img, sc1, w2, Ho, Wo, pad, stride, dilation):
    N, H, W, cp = y1_img.shape
    Hp, Wp = H + 2 * pad, W + 2 * pad
    S2 = Ho * Wo
    kernel = _make_conv3x3_stats_kernel(H, W, Ho, Wo, pad, stride, dilation)
    return pl.pallas_call(
        kernel,
        grid=(N,),
        in_specs=[pl.BlockSpec((None, H, W, cp), lambda n: (n, 0, 0, 0)),
                  pl.BlockSpec((2, cp), lambda n: (0, 0)),
                  pl.BlockSpec((3, 3 * cp, cp), lambda n: (0, 0, 0))],
        out_specs=[pl.BlockSpec((None, S2, cp), lambda n: (n, 0, 0)),
                   pl.BlockSpec((2, cp), lambda n: (0, 0))],
        out_shape=[jax.ShapeDtypeStruct((N, S2, cp), y1_img.dtype),
                   jax.ShapeDtypeStruct((2, cp), jnp.float32)],
        scratch_shapes=[pltpu.VMEM((Hp, Wp, cp), y1_img.dtype)],
        compiler_params=_cparams(parallel=False),
    )(y1_img, sc1, w2)


def _bn_relu_conv1x1_stats(z, sc, w):
    N, S, ci = z.shape
    co = w.shape[1]
    return pl.pallas_call(
        _bn_relu_conv1x1_stats_kernel,
        grid=(N,),
        in_specs=[pl.BlockSpec((None, S, ci), lambda n: (n, 0, 0)),
                  pl.BlockSpec((2, ci), lambda n: (0, 0)),
                  pl.BlockSpec((ci, co), lambda n: (0, 0))],
        out_specs=[pl.BlockSpec((None, S, co), lambda n: (n, 0, 0)),
                   pl.BlockSpec((2, co), lambda n: (0, 0))],
        out_shape=[jax.ShapeDtypeStruct((N, S, co), z.dtype),
                   jax.ShapeDtypeStruct((2, co), jnp.float32)],
        compiler_params=_cparams(parallel=False),
    )(z, sc, w)


def _residual_bn_relu(z3, ident, sc3, scd):
    N, S, ce = z3.shape
    return pl.pallas_call(
        _residual_bn_relu_kernel,
        grid=(N,),
        in_specs=[pl.BlockSpec((None, S, ce), lambda n: (n, 0, 0)),
                  pl.BlockSpec((None, S, ce), lambda n: (n, 0, 0)),
                  pl.BlockSpec((2, ce), lambda n: (0, 0)),
                  pl.BlockSpec((2, ce), lambda n: (0, 0))],
        out_specs=pl.BlockSpec((None, S, ce), lambda n: (n, 0, 0)),
        out_shape=jax.ShapeDtypeStruct((N, S, ce), jnp.float32),
        compiler_params=_cparams(parallel=True),
    )(z3, ident, sc3, scd)


# ---------------- wrapper (glue: transposes / pads / per-channel math) ----------------

def bottleneck_forward(x_nchw, params, *, stride=1, padding=1, dilation=1,
                       expansion=2, need_downsample=False,
                       compute_dtype=jnp.bfloat16):
    del expansion  # implied by the conv3 weight shape
    N, Cin, H, W = x_nchw.shape
    planes = params["conv1_w"].shape[0]
    pe = params["conv3_w"].shape[0]
    cdt = compute_dtype

    cp_in = _round_up(Cin, _LANE)
    cp_mid = _round_up(planes, _LANE)
    cp_out = _round_up(pe, _LANE)

    # NCHW -> NHWC once; channel-pad + dtype cast fused into the same glue pass.
    x_nhwc = jnp.transpose(x_nchw, (0, 2, 3, 1)).astype(jnp.float32)
    x3 = _pad_last(x_nhwc, cp_in).reshape(N, H * W, cp_in).astype(cdt)

    # Weight prep (tiny).
    w1 = _pad2(params["conv1_w"][:, :, 0, 0].T, (cp_in, cp_mid)).astype(cdt)
    w3 = _pad2(params["conv3_w"][:, :, 0, 0].T, (cp_mid, cp_out)).astype(cdt)
    w2 = jnp.transpose(params["conv2_w"], (2, 3, 1, 0))       # (ky, kx, cin, cout)
    w2 = jnp.pad(w2, ((0, 0), (0, 0), (0, cp_mid - planes), (0, cp_mid - planes)))
    w2 = w2.reshape(3, 3 * cp_mid, cp_mid).astype(cdt)        # per-ky (kx,cin) grouped

    ext = 2 * dilation + 1
    Ho = (H + 2 * padding - ext) // stride + 1
    Wo = (W + 2 * padding - ext) // stride + 1
    n1 = float(N * H * W)
    n2 = float(N * Ho * Wo)

    # ---- stage 1: conv1 (+ fused downsample conv where geometry matches) ----
    yd = sd = None
    fuse_ds = need_downsample and stride == 1 and padding == 1
    if fuse_ds:
        wd = _pad2(params["convd_w"][:, :, 0, 0].T, (cp_in, cp_out)).astype(cdt)
        y1, yd, s1, sd = _conv1x1_dual_stats(x3, w1, wd)
    else:
        y1, s1 = _conv1x1_stats(x3, w1)
        if need_downsample:
            pdd = padding - 1
            xdp = jnp.pad(x_nhwc, ((0, 0), (pdd, pdd), (pdd, pdd), (0, 0)))
            Hd = (H + 2 * pdd - 1) // stride + 1
            Wd = (W + 2 * pdd - 1) // stride + 1
            assert (Hd, Wd) == (Ho, Wo), "downsample spatial mismatch"
            xs = xdp[:, :(Hd - 1) * stride + 1:stride,
                        :(Wd - 1) * stride + 1:stride, :]
            xd3 = _pad_last(xs, cp_in).reshape(N, Hd * Wd, cp_in).astype(cdt)
            wd = _pad2(params["convd_w"][:, :, 0, 0].T, (cp_in, cp_out)).astype(cdt)
            yd, sd = _conv1x1_stats(xd3, wd)
    sc1 = _affine_from_stats(s1, params["bn1_g"], params["bn1_b"], n1, cp_mid)

    # ---- stage 2: BN1+ReLU (fused at load) + 3x3 conv (no HBM im2col) ----
    z2, s2 = _conv3x3_stats(y1.reshape(N, H, W, cp_mid), sc1, w2,
                            Ho, Wo, padding, stride, dilation)
    sc2 = _affine_from_stats(s2, params["bn2_g"], params["bn2_b"], n2, cp_mid)

    # ---- stage 3: BN2+ReLU (fused at load) + conv3 (1x1) ----
    z3, s3 = _bn_relu_conv1x1_stats(z2, sc2, w3)
    sc3 = _affine_from_stats(s3, params["bn3_g"], params["bn3_b"], n2, cp_out)

    # ---- stage 4: BN3 + (BNd | identity) + residual add + ReLU ----
    if need_downsample:
        scd = _affine_from_stats(sd, params["bnd_g"], params["bnd_b"], n2, cp_out)
        ident = yd
    else:
        assert pe == Cin and (Ho, Wo) == (H, W), "identity add requires matching shapes"
        scd = jnp.concatenate([jnp.ones((1, cp_out), jnp.float32),
                               jnp.zeros((1, cp_out), jnp.float32)], axis=0)
        ident = x3
    out = _residual_bn_relu(z3, ident, sc3, scd)              # (N, Ho*Wo, cp_out) f32

    out = out.reshape(N, Ho, Wo, cp_out)[..., :pe]
    return jnp.transpose(out, (0, 3, 1, 2))                   # back to NCHW


# ---------------- params / pure-JAX reference ----------------

def init_params(key, inplanes, planes, expansion, need_downsample):
    pe = planes * expansion
    ks = jax.random.split(key, 14)
    p = {
        "conv1_w": 0.3 * jax.random.normal(ks[0], (planes, inplanes, 1, 1), jnp.float32),
        "bn1_g": 0.5 + jax.random.uniform(ks[1], (planes,), jnp.float32),
        "bn1_b": 0.1 * jax.random.normal(ks[2], (planes,), jnp.float32),
        "conv2_w": 0.15 * jax.random.normal(ks[3], (planes, planes, 3, 3), jnp.float32),
        "bn2_g": 0.5 + jax.random.uniform(ks[4], (planes,), jnp.float32),
        "bn2_b": 0.1 * jax.random.normal(ks[5], (planes,), jnp.float32),
        "conv3_w": 0.3 * jax.random.normal(ks[6], (pe, planes, 1, 1), jnp.float32),
        "bn3_g": 0.5 + jax.random.uniform(ks[7], (pe,), jnp.float32),
        "bn3_b": 0.1 * jax.random.normal(ks[8], (pe,), jnp.float32),
    }
    if need_downsample:
        p["convd_w"] = 0.3 * jax.random.normal(ks[9], (pe, inplanes, 1, 1), jnp.float32)
        p["bnd_g"] = 0.5 + jax.random.uniform(ks[10], (pe,), jnp.float32)
        p["bnd_b"] = 0.1 * jax.random.normal(ks[11], (pe,), jnp.float32)
    return p


def bottleneck_ref(x, params, *, stride, padding, dilation, need_downsample):
    def conv(a, w, s=1, p=0, d=1):
        return jax.lax.conv_general_dilated(
            a, w, (s, s), ((p, p), (p, p)), rhs_dilation=(d, d),
            dimension_numbers=("NCHW", "OIHW", "NCHW"))

    def bn(a, g, b):
        mu = jnp.mean(a, axis=(0, 2, 3), keepdims=True)
        var = jnp.mean(jnp.square(a - mu), axis=(0, 2, 3), keepdims=True)
        return (a - mu) / jnp.sqrt(var + _EPS) * g.reshape(1, -1, 1, 1) + b.reshape(1, -1, 1, 1)

    relu = lambda t: jnp.maximum(t, 0.0)
    out = relu(bn(conv(x, params["conv1_w"]), params["bn1_g"], params["bn1_b"]))
    out = relu(bn(conv(out, params["conv2_w"], stride, padding, dilation),
                  params["bn2_g"], params["bn2_b"]))
    out = bn(conv(out, params["conv3_w"]), params["bn3_g"], params["bn3_b"])
    if need_downsample:
        ident = bn(conv(x, params["convd_w"], stride, padding - 1),
                   params["bnd_g"], params["bnd_b"])
    else:
        ident = x
    return relu(out + ident)


if __name__ == "__main__":
    N, Cin, H, W = 2, 4, 16, 16
    planes, expansion = 4, 2
    stride, padding, dilation = 1, 1, 1
    need_downsample = True   # planes * expansion != inplanes

    key = jax.random.PRNGKey(0)
    kx, kp, kx2, kp2 = jax.random.split(key, 4)
    x = jax.random.normal(kx, (N, Cin, H, W), jnp.float32)
    params = init_params(kp, Cin, planes, expansion, need_downsample)

    fwd = jax.jit(bottleneck_forward,
                  static_argnames=("stride", "padding", "dilation", "expansion",
                                   "need_downsample", "compute_dtype"))

    ref = bottleneck_ref(x, params, stride=stride, padding=padding,
                         dilation=dilation, need_downsample=need_downsample)

    # f32 compute path: tight check against the pure-JAX reference.
    out_f32 = jax.block_until_ready(
        fwd(x, params, stride=stride, padding=padding, dilation=dilation,
            expansion=expansion, need_downsample=need_downsample,
            compute_dtype=jnp.float32))
    assert out_f32.shape == (N, planes * expansion, H, W), out_f32.shape
    err = float(jnp.max(jnp.abs(out_f32 - ref)))
    assert err < 1e-3, f"f32 path: max abs error too large: {err}"

    # bf16 MXU path: same structure, looser tolerance (bf16 operand rounding).
    out_bf16 = jax.block_until_ready(
        fwd(x, params, stride=stride, padding=padding, dilation=dilation,
            expansion=expansion, need_downsample=need_downsample,
            compute_dtype=jnp.bfloat16))
    err_max = float(jnp.max(jnp.abs(out_bf16 - ref)))
    err_mean = float(jnp.mean(jnp.abs(out_bf16 - ref)))
    assert err_max < 0.25 and err_mean < 0.03, (err_max, err_mean)

    # identity (no-downsample) residual path.
    Cin2, planes2 = 8, 4     # planes2 * expansion == Cin2 -> identity shortcut
    x2 = jax.random.normal(kx2, (N, Cin2, H, W), jnp.float32)
    params2 = init_params(kp2, Cin2, planes2, expansion, False)
    out2 = jax.block_until_ready(
        fwd(x2, params2, stride=1, padding=1, dilation=1, expansion=expansion,
            need_downsample=False, compute_dtype=jnp.float32))
    ref2 = bottleneck_ref(x2, params2, stride=1, padding=1, dilation=1,
                          need_downsample=False)
    err2 = float(jnp.max(jnp.abs(out2 - ref2)))
    assert err2 < 1e-3, f"identity path: max abs error too large: {err2}"

    print("KERNEL_OK")
</pallas_src>

<mosaic_0001>
module attributes {stable_mosaic.version = 11 : i64} {
  func.func @_conv1x1_dual_stats_kernel(%arg0: i32, %arg1: memref<1x256x128xf32, #tpu.memory_space<vmem>>, %arg2: memref<128x128xf32, #tpu.memory_space<vmem>>, %arg3: memref<128x128xf32, #tpu.memory_space<vmem>>, %arg4: memref<1x256x128xf32, #tpu.memory_space<vmem>>, %arg5: memref<1x256x128xf32, #tpu.memory_space<vmem>>, %arg6: memref<2x128xf32, #tpu.memory_space<vmem>>, %arg7: memref<2x128xf32, #tpu.memory_space<vmem>>) attributes {dimension_semantics = [#tpu.dimension_semantics<arbitrary>], iteration_bounds = array<i64: 2>, scalar_prefetch = 0 : i64, scratch_operands = 0 : i64, tpu.core_type = #tpu.core_type<tc>, window_params = [{transform_indices = @transform_0, window_bounds = array<i64: 1, 256, 128>}, {pipeline_mode = #tpu.pipeline_mode<synchronous>, transform_indices = @transform_1, window_bounds = array<i64: 128, 128>}, {pipeline_mode = #tpu.pipeline_mode<synchronous>, transform_indices = @transform_2, window_bounds = array<i64: 128, 128>}, {transform_indices = @transform_3, window_bounds = array<i64: 1, 256, 128>}, {transform_indices = @transform_4, window_bounds = array<i64: 1, 256, 128>}, {pipeline_mode = #tpu.pipeline_mode<synchronous>, transform_indices = @transform_5, window_bounds = array<i64: 2, 128>}, {pipeline_mode = #tpu.pipeline_mode<synchronous>, transform_indices = @transform_6, window_bounds = array<i64: 2, 128>}]} {
    %c0_i32 = arith.constant 0 : i32
    %0 = arith.cmpi eq, %arg0, %c0_i32 : i32
    %1 = arith.extui %0 : i1 to i32
    %c0_i32_0 = arith.constant 0 : i32
    %2 = arith.cmpi ne, %1, %c0_i32_0 : i32
    scf.if %2 {
      %cst_26 = arith.constant 0.000000e+00 : f32
      %33 = vector.broadcast %cst_26 : f32 to vector<2x128xf32>
      %c0_27 = arith.constant 0 : index
      %c0_28 = arith.constant 0 : index
      %34 = vector.load %arg6[%c0_27, %c0_28] : memref<2x128xf32, #tpu.memory_space<vmem>>, vector<2x128xf32>
      tpu.vector_store %arg6[%c0_27, %c0_28], %33 {strides = array<i32>} : memref<2x128xf32, #tpu.memory_space<vmem>>, vector<2x128xf32>,
      %cst_29 = arith.constant 0.000000e+00 : f32
      %35 = vector.broadcast %cst_29 : f32 to vector<2x128xf32>
      %c0_30 = arith.constant 0 : index
      %c0_31 = arith.constant 0 : index
      %36 = vector.load %arg7[%c0_30, %c0_31] : memref<2x128xf32, #tpu.memory_space<vmem>>, vector<2x128xf32>
      tpu.vector_store %arg7[%c0_30, %c0_31], %35 {strides = array<i32>} : memref<2x128xf32, #tpu.memory_space<vmem>>, vector<2x128xf32>,
    } else {
    }
    %c0 = arith.constant 0 : index
    %c0_1 = arith.constant 0 : index
    %c0_2 = arith.constant 0 : index
    %3 = vector.load %arg1[%c0, %c0_1, %c0_2] : memref<1x256x128xf32, #tpu.memory_space<vmem>>, vector<1x256x128xf32>
    %4 = vector.shape_cast %3 : vector<1x256x128xf32> to vector<256x128xf32>
    %c0_3 = arith.constant 0 : index
    %c0_4 = arith.constant 0 : index
    %5 = vector.load %arg2[%c0_3, %c0_4] : memref<128x128xf32, #tpu.memory_space<vmem>>, vector<128x128xf32>
    %cst = arith.constant dense<0.000000e+00> : vector<256x128xf32>
    %6 = tpu.matmul %4, %5, %cst {dimension_numbers = #tpu.dot_dimension_numbers<[1], [0], [0], [1], [0, 0, 1, 1], [], []>} : vector<256x128xf32>, vector<128x128xf32>, vector<256x128xf32> -> vector<256x128xf32>
    %c0_5 = arith.constant 0 : index
    %c0_6 = arith.constant 0 : index
    %7 = vector.load %arg3[%c0_5, %c0_6] : memref<128x128xf32, #tpu.memory_space<vmem>>, vector<128x128xf32>
    %cst_7 = arith.constant dense<0.000000e+00> : vector<256x128xf32>
    %8 = tpu.matmul %4, %7, %cst_7 {dimension_numbers = #tpu.dot_dimension_numbers<[1], [0], [0], [1], [0, 0, 1, 1], [], []>} : vector<256x128xf32>, vector<128x128xf32>, vector<256x128xf32> -> vector<256x128xf32>
    %c0_8 = arith.constant 0 : index
    %c0_9 = arith.constant 0 : index
    %c0_10 = arith.constant 0 : index
    %9 = vector.load %arg4[%c0_8, %c0_9, %c0_10] : memref<1x256x128xf32, #tpu.memory_space<vmem>>, vector<1x256x128xf32>
    %10 = vector.shape_cast %9 : vector<1x256x128xf32> to vector<256x128xf32>
    %11 = vector.shape_cast %6 : vector<256x128xf32> to vector<1x256x128xf32>
    tpu.vector_store %arg4[%c0_8, %c0_9, %c0_10], %11 {strides = array<i32>} : memref<1x256x128xf32, #tpu.memory_space<vmem>>, vector<1x256x128xf32>,
    %c0_11 = arith.constant 0 : index
    %c0_12 = arith.constant 0 : index
    %c0_13 = arith.constant 0 : index
    %12 = vector.load %arg5[%c0_11, %c0_12, %c0_13] : memref<1x256x128xf32, #tpu.memory_space<vmem>>, vector<1x256x128xf32>
    %13 = vector.shape_cast %12 : vector<1x256x128xf32> to vector<256x128xf32>
    %14 = vector.shape_cast %8 : vector<256x128xf32> to vector<1x256x128xf32>
    tpu.vector_store %arg5[%c0_11, %c0_12, %c0_13], %14 {strides = array<i32>} : memref<1x256x128xf32, #tpu.memory_space<vmem>>, vector<1x256x128xf32>,
    %c0_14 = arith.constant 0 : index
    %c0_15 = arith.constant 0 : index
    %15 = vector.load %arg6[%c0_14, %c0_15] : memref<2x128xf32, #tpu.memory_space<vmem>>, vector<2x128xf32>
    %cst_16 = arith.constant dense<0.000000e+00> : vector<128xf32>
    %16 = vector.multi_reduction <add>, %6, %cst_16 [0] : vector<256x128xf32> to vector<128xf32>
    %17 = vector.shape_cast %16 : vector<128xf32> to vector<1x128xf32>
    %18 = arith.mulf %6, %6 : vector<256x128xf32>
    %cst_17 = arith.constant dense<0.000000e+00> : vector<128xf32>
    %19 = vector.multi_reduction <add>, %18, %cst_17 [0] : vector<256x128xf32> to vector<128xf32>
    %20 = vector.shape_cast %19 : vector<128xf32> to vector<1x128xf32>
    %21 = tpu.concatenate %17, %20 in 0 : vector<1x128xf32>, vector<1x128xf32> -> vector<2x128xf32>
    %22 = arith.addf %15, %21 : vector<2x128xf32>
    %c0_18 = arith.constant 0 : index
    %c0_19 = arith.constant 0 : index
    %23 = vector.load %arg6[%c0_18, %c0_19] : memref<2x128xf32, #tpu.memory_space<vmem>>, vector<2x128xf32>
    tpu.vector_store %arg6[%c0_18, %c0_19], %22 {strides = array<i32>} : memref<2x128xf32, #tpu.memory_space<vmem>>, vector<2x128xf32>,
    %c0_20 = arith.constant 0 : index
    %c0_21 = arith.constant 0 : index
    %24 = vector.load %arg7[%c0_20, %c0_21] : memref<2x128xf32, #tpu.memory_space<vmem>>, vector<2x128xf32>
    %cst_22 = arith.constant dense<0.000000e+00> : vector<128xf32>
    %25 = vector.multi_reduction <add>, %8, %cst_22 [0] : vector<256x128xf32> to vector<128xf32>
    %26 = vector.shape_cast %25 : vector<128xf32> to vector<1x128xf32>
    %27 = arith.mulf %8, %8 : vector<256x128xf32>
    %cst_23 = arith.constant dense<0.000000e+00> : vector<128xf32>
    %28 = vector.multi_reduction <add>, %27, %cst_23 [0] : vector<256x128xf32> to vector<128xf32>
    %29 = vector.shape_cast %28 : vector<128xf32> to vector<1x128xf32>
    %30 = tpu.concatenate %26, %29 in 0 : vector<1x128xf32>, vector<1x128xf32> -> vector<2x128xf32>
    %31 = arith.addf %24, %30 : vector<2x128xf32>
    %c0_24 = arith.constant 0 : index
    %c0_25 = arith.constant 0 : index
    %32 = vector.load %arg7[%c0_24, %c0_25] : memref<2x128xf32, #tpu.memory_space<vmem>>, vector<2x128xf32>
    tpu.vector_store %arg7[%c0_24, %c0_25], %31 {strides = array<i32>} : memref<2x128xf32, #tpu.memory_space<vmem>>, vector<2x128xf32>,
    return
  }
  func.func @transform_0(%arg0: i32) -> (i32, i32, i32) {
    %c0_i32 = arith.constant 0 : i32
    %c0_i32_0 = arith.constant 0 : i32
    %c0_i32_1 = arith.constant 0 : i32
    return %arg0, %c0_i32, %c0_i32_0 : i32, i32, i32
  }
  func.func @transform_1(%arg0: i32) -> (i32, i32) {
    %c0_i32 = arith.constant 0 : i32
    %c0_i32_0 = arith.constant 0 : i32
    %c0_i32_1 = arith.constant 0 : i32
    return %c0_i32, %c0_i32_0 : i32, i32
  }
  func.func @transform_2(%arg0: i32) -> (i32, i32) {
    %c0_i32 = arith.constant 0 : i32
    %c0_i32_0 = arith.constant 0 : i32
    %c0_i32_1 = arith.constant 0 : i32
    return %c0_i32, %c0_i32_0 : i32, i32
  }
  func.func @transform_3(%arg0: i32) -> (i32, i32, i32) {
    %c0_i32 = arith.constant 0 : i32
    %c0_i32_0 = arith.constant 0 : i32
    %c0_i32_1 = arith.constant 0 : i32
    return %arg0, %c0_i32, %c0_i32_0 : i32, i32, i32
  }
  func.func @transform_4(%arg0: i32) -> (i32, i32, i32) {
    %c0_i32 = arith.constant 0 : i32
    %c0_i32_0 = arith.constant 0 : i32
    %c0_i32_1 = arith.constant 0 : i32
    return %arg0, %c0_i32, %c0_i32_0 : i32, i32, i32
  }
  func.func @transform_5(%arg0: i32) -> (i32, i32) {
    %c0_i32 = arith.constant 0 : i32
    %c0_i32_0 = arith.constant 0 : i32
    %c0_i32_1 = arith.constant 0 : i32
    return %c0_i32, %c0_i32_0 : i32, i32
  }
  func.func @transform_6(%arg0: i32) -> (i32, i32) {
    %c0_i32 = arith.constant 0 : i32
    %c0_i32_0 = arith.constant 0 : i32
    %c0_i32_1 = arith.constant 0 : i32
    return %c0_i32, %c0_i32_0 : i32, i32
  }
}

module attributes {stable_mosaic.version = 11 : i64} {
  func.func @_bn_relu_conv1x1_stats_kernel(%arg0: i32, %arg1: memref<1x256x128xf32, #tpu.memory_space<vmem>>, %arg2: memref<2x128xf32, #tpu.memory_space<vmem>>, %arg3: memref<128x128xf32, #tpu.memory_space<vmem>>, %arg4: memref<1x256x128xf32, #tpu.memory_space<vmem>>, %arg5: memref<2x128xf32, #tpu.memory_space<vmem>>) attributes {dimension_semantics = [#tpu.dimension_semantics<arbitrary>], iteration_bounds = array<i64: 2>, scalar_prefetch = 0 : i64, scratch_operands = 0 : i64, tpu.core_type = #tpu.core_type<tc>, window_params = [{transform_indices = @transform_0, window_bounds = array<i64: 1, 256, 128>}, {pipeline_mode = #tpu.pipeline_mode<synchronous>, transform_indices = @transform_1, window_bounds = array<i64: 2, 128>}, {pipeline_mode = #tpu.pipeline_mode<synchronous>, transform_indices = @transform_2, window_bounds = array<i64: 128, 128>}, {transform_indices = @transform_3, window_bounds = array<i64: 1, 256, 128>}, {pipeline_mode = #tpu.pipeline_mode<synchronous>, transform_indices = @transform_4, window_bounds = array<i64: 2, 128>}]} {
    %c0_i32 = arith.constant 0 : i32
    %0 = arith.cmpi eq, %arg0, %c0_i32 : i32
    %1 = arith.extui %0 : i1 to i32
    %c0_i32_0 = arith.constant 0 : i32
    %2 = arith.cmpi ne, %1, %c0_i32_0 : i32
    scf.if %2 {
      %cst_18 = arith.constant 0.000000e+00 : f32
      %27 = vector.broadcast %cst_18 : f32 to vector<2x128xf32>
      %c0_19 = arith.constant 0 : index
      %c0_20 = arith.constant 0 : index
      %28 = vector.load %arg5[%c0_19, %c0_20] : memref<2x128xf32, #tpu.memory_space<vmem>>, vector<2x128xf32>
      tpu.vector_store %arg5[%c0_19, %c0_20], %27 {strides = array<i32>} : memref<2x128xf32, #tpu.memory_space<vmem>>, vector<2x128xf32>,
    } else {
    }
    %c0 = arith.constant 0 : index
    %c0_1 = arith.constant 0 : index
    %c0_2 = arith.constant 0 : index
    %3 = vector.load %arg1[%c0, %c0_1, %c0_2] : memref<1x256x128xf32, #tpu.memory_space<vmem>>, vector<1x256x128xf32>
    %4 = vector.shape_cast %3 : vector<1x256x128xf32> to vector<256x128xf32>
    %c0_3 = arith.constant 0 : index
    %c0_4 = arith.constant 0 : index
    %5 = vector.load %arg2[%c0_3, %c0_4] : memref<2x128xf32, #tpu.memory_space<vmem>>, vector<1x128xf32>
    %6 = vector.broadcast %5 : vector<1x128xf32> to vector<256x128xf32>
    %7 = arith.mulf %4, %6 : vector<256x128xf32>
    %c1 = arith.constant 1 : index
    %c0_5 = arith.constant 0 : index
    %8 = vector.load %arg2[%c1, %c0_5] : memref<2x128xf32, #tpu.memory_space<vmem>>, vector<1x128xf32>
    %9 = vector.broadcast %8 : vector<1x128xf32> to vector<256x128xf32>
    %10 = arith.addf %7, %9 : vector<256x128xf32>
    %cst = arith.constant 0.000000e+00 : f32
    %11 = vector.broadcast %cst : f32 to vector<256x128xf32>
    %12 = arith.maximumf %10, %11 : vector<256x128xf32>
    %c0_6 = arith.constant 0 : index
    %c0_7 = arith.constant 0 : index
    %13 = vector.load %arg3[%c0_6, %c0_7] : memref<128x128xf32, #tpu.memory_space<vmem>>, vector<128x128xf32>
    %cst_8 = arith.constant dense<0.000000e+00> : vector<256x128xf32>
    %14 = tpu.matmul %12, %13, %cst_8 {dimension_numbers = #tpu.dot_dimension_numbers<[1], [0], [0], [1], [0, 0, 1, 1], [], []>} : vector<256x128xf32>, vector<128x128xf32>, vector<256x128xf32> -> vector<256x128xf32>
    %c0_9 = arith.constant 0 : index
    %c0_10 = arith.constant 0 : index
    %c0_11 = arith.constant 0 : index
    %15 = vector.load %arg4[%c0_9, %c0_10, %c0_11] : memref<1x256x128xf32, #tpu.memory_space<vmem>>, vector<1x256x128xf32>
    %16 = vector.shape_cast %15 : vector<1x256x128xf32> to vector<256x128xf32>
    %17 = vector.shape_cast %14 : vector<256x128xf32> to vector<1x256x128xf32>
    tpu.vector_store %arg4[%c0_9, %c0_10, %c0_11], %17 {strides = array<i32>} : memref<1x256x128xf32, #tpu.memory_space<vmem>>, vector<1x256x128xf32>,
    %c0_12 = arith.constant 0 : index
    %c0_13 = arith.constant 0 : index
    %18 = vector.load %arg5[%c0_12, %c0_13] : memref<2x128xf32, #tpu.memory_space<vmem>>, vector<2x128xf32>
    %cst_14 = arith.constant dense<0.000000e+00> : vector<128xf32>
    %19 = vector.multi_reduction <add>, %14, %cst_14 [0] : vector<256x128xf32> to vector<128xf32>
    %20 = vector.shape_cast %19 : vector<128xf32> to vector<1x128xf32>
    %21 = arith.mulf %14, %14 : vector<256x128xf32>
    %cst_15 = arith.constant dense<0.000000e+00> : vector<128xf32>
    %22 = vector.multi_reduction <add>, %21, %cst_15 [0] : vector<256x128xf32> to vector<128xf32>
    %23 = vector.shape_cast %22 : vector<128xf32> to vector<1x128xf32>
    %24 = tpu.concatenate %20, %23 in 0 : vector<1x128xf32>, vector<1x128xf32> -> vector<2x128xf32>
    %25 = arith.addf %18, %24 : vector<2x128xf32>
    %c0_16 = arith.constant 0 : index
    %c0_17 = arith.constant 0 : index
    %26 = vector.load %arg5[%c0_16, %c0_17] : memref<2x128xf32, #tpu.memory_space<vmem>>, vector<2x128xf32>
    tpu.vector_store %arg5[%c0_16, %c0_17], %25 {strides = array<i32>} : memref<2x128xf32, #tpu.memory_space<vmem>>, vector<2x128xf32>,
    return
  }
  func.func @transform_0(%arg0: i32) -> (i32, i32, i32) {
    %c0_i32 = arith.constant 0 : i32
    %c0_i32_0 = arith.constant 0 : i32
    %c0_i32_1 = arith.constant 0 : i32
    return %arg0, %c0_i32, %c0_i32_0 : i32, i32, i32
  }
  func.func @transform_1(%arg0: i32) -> (i32, i32) {
    %c0_i32 = arith.constant 0 : i32
    %c0_i32_0 = arith.constant 0 : i32
    %c0_i32_1 = arith.constant 0 : i32
    return %c0_i32, %c0_i32_0 : i32, i32
  }
  func.func @transform_2(%arg0: i32) -> (i32, i32) {
    %c0_i32 = arith.constant 0 : i32
    %c0_i32_0 = arith.constant 0 : i32
    %c0_i32_1 = arith.constant 0 : i32
    return %c0_i32, %c0_i32_0 : i32, i32
  }
  func.func @transform_3(%arg0: i32) -> (i32, i32, i32) {
    %c0_i32 = arith.constant 0 : i32
    %c0_i32_0 = arith.constant 0 : i32
    %c0_i32_1 = arith.constant 0 : i32
    return %arg0, %c0_i32, %c0_i32_0 : i32, i32, i32
  }
  func.func @transform_4(%arg0: i32) -> (i32, i32) {
    %c0_i32 = arith.constant 0 : i32
    %c0_i32_0 = arith.constant 0 : i32
    %c0_i32_1 = arith.constant 0 : i32
    return %c0_i32, %c0_i32_0 : i32, i32
  }
}

module attributes {stable_mosaic.version = 11 : i64} {
  func.func @kernel(%arg0: i32, %arg1: memref<1x16x16x128xf32, #tpu.memory_space<vmem>>, %arg2: memref<2x128xf32, #tpu.memory_space<vmem>>, %arg3: memref<3x384x128xf32, #tpu.memory_space<vmem>>, %arg4: memref<1x256x128xf32, #tpu.memory_space<vmem>>, %arg5: memref<2x128xf32, #tpu.memory_space<vmem>>, %arg6: memref<18x18x128xf32, #tpu.memory_space<vmem>>) attributes {dimension_semantics = [#tpu.dimension_semantics<arbitrary>], iteration_bounds = array<i64: 2>, scalar_prefetch = 0 : i64, scratch_operands = 1 : i64, tpu.core_type = #tpu.core_type<tc>, window_params = [{transform_indices = @transform_0, window_bounds = array<i64: 1, 16, 16, 128>}, {pipeline_mode = #tpu.pipeline_mode<synchronous>, transform_indices = @transform_1, window_bounds = array<i64: 2, 128>}, {pipeline_mode = #tpu.pipeline_mode<synchronous>, transform_indices = @transform_2, window_bounds = array<i64: 3, 384, 128>}, {transform_indices = @transform_3, window_bounds = array<i64: 1, 256, 128>}, {pipeline_mode = #tpu.pipeline_mode<synchronous>, transform_indices = @transform_4, window_bounds = array<i64: 2, 128>}]} {
    %c0_i32 = arith.constant 0 : i32
    %0 = arith.cmpi eq, %arg0, %c0_i32 : i32
    %1 = arith.extui %0 : i1 to i32
    %c0_i32_0 = arith.constant 0 : i32
    %2 = arith.cmpi ne, %1, %c0_i32_0 : i32
    scf.if %2 {
      %cst_58 = arith.constant 0.000000e+00 : f32
      %56 = vector.broadcast %cst_58 : f32 to vector<2x128xf32>
      %c0_59 = arith.constant 0 : index
      %c0_60 = arith.constant 0 : index
      %57 = vector.load %arg5[%c0_59, %c0_60] : memref<2x128xf32, #tpu.memory_space<vmem>>, vector<2x128xf32>
      tpu.vector_store %arg5[%c0_59, %c0_60], %56 {strides = array<i32>} : memref<2x128xf32, #tpu.memory_space<vmem>>, vector<2x128xf32>,
      %cst_61 = arith.constant 0.000000e+00 : f32
      %58 = vector.broadcast %cst_61 : f32 to vector<18x18x128xf32>
      %c0_62 = arith.constant 0 : index
      %c0_63 = arith.constant 0 : index
      %c0_64 = arith.constant 0 : index
      %59 = vector.load %arg6[%c0_62, %c0_63, %c0_64] : memref<18x18x128xf32, #tpu.memory_space<vmem>>, vector<18x18x128xf32>
      tpu.vector_store %arg6[%c0_62, %c0_63, %c0_64], %58 {strides = array<i32>} : memref<18x18x128xf32, #tpu.memory_space<vmem>>, vector<18x18x128xf32>,
    } else {
    }
    %c0 = arith.constant 0 : index
    %c0_1 = arith.constant 0 : index
    %c0_2 = arith.constant 0 : index
    %c0_3 = arith.constant 0 : index
    %3 = vector.load %arg1[%c0, %c0_1, %c0_2, %c0_3] : memref<1x16x16x128xf32, #tpu.memory_space<vmem>>, vector<1x16x16x128xf32>
    %4 = vector.shape_cast %3 : vector<1x16x16x128xf32> to vector<16x16x128xf32>
    %c0_4 = arith.constant 0 : index
    %c0_5 = arith.constant 0 : index
    %5 = vector.load %arg2[%c0_4, %c0_5] : memref<2x128xf32, #tpu.memory_space<vmem>>, vector<1x128xf32>
    %6 = vector.shape_cast %5 : vector<1x128xf32> to vector<1x1x128xf32>
    %7 = vector.broadcast %6 : vector<1x1x128xf32> to vector<16x16x128xf32>
    %8 = arith.mulf %4, %7 : vector<16x16x128xf32>
    %c1 = arith.constant 1 : index
    %c0_6 = arith.constant 0 : index
    %9 = vector.load %arg2[%c1, %c0_6] : memref<2x128xf32, #tpu.memory_space<vmem>>, vector<1x128xf32>
    %10 = vector.shape_cast %9 : vector<1x128xf32> to vector<1x1x128xf32>
    %11 = vector.broadcast %10 : vector<1x1x128xf32> to vector<16x16x128xf32>
    %12 = arith.addf %8, %11 : vector<16x16x128xf32>
    %cst = arith.constant 0.000000e+00 : f32
    %13 = vector.broadcast %cst : f32 to vector<16x16x128xf32>
    %14 = arith.maximumf %12, %13 : vector<16x16x128xf32>
    %c1_7 = arith.constant 1 : index
    %c1_8 = arith.constant 1 : index
    %c0_9 = arith.constant 0 : index
    %15 = vector.load %arg6[%c1_7, %c1_8, %c0_9] : memref<18x18x128xf32, #tpu.memory_space<vmem>>, vector<16x16x128xf32>
    tpu.vector_store %arg6[%c1_7, %c1_8, %c0_9], %14 {strides = array<i32>} : memref<18x18x128xf32, #tpu.memory_space<vmem>>, vector<16x16x128xf32>,
    %cst_10 = arith.constant 0.000000e+00 : f32
    %16 = vector.broadcast %cst_10 : f32 to vector<256x128xf32>
    %c0_11 = arith.constant 0 : index
    %c0_12 = arith.constant 0 : index
    %c0_13 = arith.constant 0 : index
    %17 = vector.load %arg6[%c0_11, %c0_12, %c0_13] : memref<18x18x128xf32, #tpu.memory_space<vmem>>, vector<16x16x128xf32>
    %c0_14 = arith.constant 0 : index
    %c1_15 = arith.constant 1 : index
    %c0_16 = arith.constant 0 : index
    %18 = vector.load %arg6[%c0_14, %c1_15, %c0_16] : memref<18x18x128xf32, #tpu.memory_space<vmem>>, vector<16x16x128xf32>
    %c0_17 = arith.constant 0 : index
    %c2 = arith.constant 2 : index
    %c0_18 = arith.constant 0 : index
    %19 = vector.load %arg6[%c0_17, %c2, %c0_18] : memref<18x18x128xf32, #tpu.memory_space<vmem>>, vector<16x16x128xf32>
    %20 = tpu.concatenate %17, %18, %19 in 2 : vector<16x16x128xf32>, vector<16x16x128xf32>, vector<16x16x128xf32> -> vector<16x16x384xf32>
    %21 = vector.shape_cast %20 : vector<16x16x384xf32> to vector<256x384xf32>
    %c0_19 = arith.constant 0 : index
    %c0_20 = arith.constant 0 : index
    %c0_21 = arith.constant 0 : index
    %22 = vector.load %arg3[%c0_19, %c0_20, %c0_21] : memref<3x384x128xf32, #tpu.memory_space<vmem>>, vector<1x384x128xf32>
    %23 = vector.shape_cast %22 : vector<1x384x128xf32> to vector<384x128xf32>
    %cst_22 = arith.constant dense<0.000000e+00> : vector<256x128xf32>
    %24 = tpu.matmul %21, %23, %cst_22 {dimension_numbers = #tpu.dot_dimension_numbers<[1], [0], [0], [1], [0, 0, 1, 1], [], []>} : vector<256x384xf32>, vector<384x128xf32>, vector<256x128xf32> -> vector<256x128xf32>
    %25 = arith.addf %16, %24 : vector<256x128xf32>
    %c1_23 = arith.constant 1 : index
    %c0_24 = arith.constant 0 : index
    %c0_25 = arith.constant 0 : index
    %26 = vector.load %arg6[%c1_23, %c0_24, %c0_25] : memref<18x18x128xf32, #tpu.memory_space<vmem>>, vector<16x16x128xf32>
    %c1_26 = arith.constant 1 : index
    %c1_27 = arith.constant 1 : index
    %c0_28 = arith.constant 0 : index
    %27 = vector.load %arg6[%c1_26, %c1_27, %c0_28] : memref<18x18x128xf32, #tpu.memory_space<vmem>>, vector<16x16x128xf32>
    %c1_29 = arith.constant 1 : index
    %c2_30 = arith.constant 2 : index
    %c0_31 = arith.constant 0 : index
    %28 = vector.load %arg6[%c1_29, %c2_30, %c0_31] : memref<18x18x128xf32, #tpu.memory_space<vmem>>, vector<16x16x128xf32>
    %29 = tpu.concatenate %26, %27, %28 in 2 : vector<16x16x128xf32>, vector<16x16x128xf32>, vector<16x16x128xf32> -> vector<16x16x384xf32>
    %30 = vector.shape_cast %29 : vector<16x16x384xf32> to vector<256x384xf32>
    %c1_32 = arith.constant 1 : index
    %c0_33 = arith.constant 0 : index
    %c0_34 = arith.constant 0 : index
    %31 = vector.load %arg3[%c1_32, %c0_33, %c0_34] : memref<3x384x128xf32, #tpu.memory_space<vmem>>, vector<1x384x128xf32>
    %32 = vector.shape_cast %31 : vector<1x384x128xf32> to vector<384x128xf32>
    %cst_35 = arith.constant dense<0.000000e+00> : vector<256x128xf32>
    %33 = tpu.matmul %30, %32, %cst_35 {dimension_numbers = #tpu.dot_dimension_numbers<[1], [0], [0], [1], [0, 0, 1, 1], [], []>} : vector<256x384xf32>, vector<384x128xf32>, vector<256x128xf32> -> vector<256x128xf32>
    %34 = arith.addf %25, %33 : vector<256x128xf32>
    %c2_36 = arith.constant 2 : index
    %c0_37 = arith.constant 0 : index
    %c0_38 = arith.constant 0 : index
    %35 = vector.load %arg6[%c2_36, %c0_37, %c0_38] : memref<18x18x128xf32, #tpu.memory_space<vmem>>, vector<16x16x128xf32>
    %c2_39 = arith.constant 2 : index
    %c1_40 = arith.constant 1 : index
    %c0_41 = arith.constant 0 : index
    %36 = vector.load %arg6[%c2_39, %c1_40, %c0_41] : memref<18x18x128xf32, #tpu.memory_space<vmem>>, vector<16x16x128xf32>
    %c2_42 = arith.constant 2 : index
    %c2_43 = arith.constant 2 : index
    %c0_44 = arith.constant 0 : index
    %37 = vector.load %arg6[%c2_42, %c2_43, %c0_44] : memref<18x18x128xf32, #tpu.memory_space<vmem>>, vector<16x16x128xf32>
    %38 = tpu.concatenate %35, %36, %37 in 2 : vector<16x16x128xf32>, vector<16x16x128xf32>, vector<16x16x128xf32> -> vector<16x16x384xf32>
    %39 = vector.shape_cast %38 : vector<16x16x384xf32> to vector<256x384xf32>
    %c2_45 = arith.constant 2 : index
    %c0_46 = arith.constant 0 : index
    %c0_47 = arith.constant 0 : index
    %40 = vector.load %arg3[%c2_45, %c0_46, %c0_47] : memref<3x384x128xf32, #tpu.memory_space<vmem>>, vector<1x384x128xf32>
    %41 = vector.shape_cast %40 : vector<1x384x128xf32> to vector<384x128xf32>
    %cst_48 = arith.constant dense<0.000000e+00> : vector<256x128xf32>
    %42 = tpu.matmul %39, %41, %cst_48 {dimension_numbers = #tpu.dot_dimension_numbers<[1], [0], [0], [1], [0, 0, 1, 1], [], []>} : vector<256x384xf32>, vector<384x128xf32>, vector<256x128xf32> -> vector<256x128xf32>
    %43 = arith.addf %34, %42 : vector<256x128xf32>
    %c0_49 = arith.constant 0 : index
    %c0_50 = arith.constant 0 : index
    %c0_51 = arith.constant 0 : index
    %44 = vector.load %arg4[%c0_49, %c0_50, %c0_51] : memref<1x256x128xf32, #tpu.memory_space<vmem>>, vector<1x256x128xf32>
    %45 = vector.shape_cast %44 : vector<1x256x128xf32> to vector<256x128xf32>
    %46 = vector.shape_cast %43 : vector<256x128xf32> to vector<1x256x128xf32>
    tpu.vector_store %arg4[%c0_49, %c0_50, %c0_51], %46 {strides = array<i32>} : memref<1x256x128xf32, #tpu.memory_space<vmem>>, vector<1x256x128xf32>,
    %c0_52 = arith.constant 0 : index
    %c0_53 = arith.constant 0 : index
    %47 = vector.load %arg5[%c0_52, %c0_53] : memref<2x128xf32, #tpu.memory_space<vmem>>, vector<2x128xf32>
    %cst_54 = arith.constant dense<0.000000e+00> : vector<128xf32>
    %48 = vector.multi_reduction <add>, %43, %cst_54 [0] : vector<256x128xf32> to vector<128xf32>
    %49 = vector.shape_cast %48 : vector<128xf32> to vector<1x128xf32>
    %50 = arith.mulf %43, %43 : vector<256x128xf32>
    %cst_55 = arith.constant dense<0.000000e+00> : vector<128xf32>
    %51 = vector.multi_reduction <add>, %50, %cst_55 [0] : vector<256x128xf32> to vector<128xf32>
    %52 = vector.shape_cast %51 : vector<128xf32> to vector<1x128xf32>
    %53 = tpu.concatenate %49, %52 in 0 : vector<1x128xf32>, vector<1x128xf32> -> vector<2x128xf32>
    %54 = arith.addf %47, %53 : vector<2x128xf32>
    %c0_56 = arith.constant 0 : index
    %c0_57 = arith.constant 0 : index
    %55 = vector.load %arg5[%c0_56, %c0_57] : memref<2x128xf32, #tpu.memory_space<vmem>>, vector<2x128xf32>
    tpu.vector_store %arg5[%c0_56, %c0_57], %54 {strides = array<i32>} : memref<2x128xf32, #tpu.memory_space<vmem>>, vector<2x128xf32>,
    return
  }
  func.func @transform_0(%arg0: i32) -> (i32, i32, i32, i32) {
    %c0_i32 = arith.constant 0 : i32
    %c0_i32_0 = arith.constant 0 : i32
    %c0_i32_1 = arith.constant 0 : i32
    %c0_i32_2 = arith.constant 0 : i32
    return %arg0, %c0_i32, %c0_i32_0, %c0_i32_1 : i32, i32, i32, i32
  }
  func.func @transform_1(%arg0: i32) -> (i32, i32) {
    %c0_i32 = arith.constant 0 : i32
    %c0_i32_0 = arith.constant 0 : i32
    %c0_i32_1 = arith.constant 0 : i32
    return %c0_i32, %c0_i32_0 : i32, i32
  }
  func.func @transform_2(%arg0: i32) -> (i32, i32, i32) {
    %c0_i32 = arith.constant 0 : i32
    %c0_i32_0 = arith.constant 0 : i32
    %c0_i32_1 = arith.constant 0 : i32
    %c0_i32_2 = arith.constant 0 : i32
    return %c0_i32, %c0_i32_0, %c0_i32_1 : i32, i32, i32
  }
  func.func @transform_3(%arg0: i32) -> (i32, i32, i32) {
    %c0_i32 = arith.constant 0 : i32
    %c0_i32_0 = arith.constant 0 : i32
    %c0_i32_1 = arith.constant 0 : i32
    return %arg0, %c0_i32, %c0_i32_0 : i32, i32, i32
  }
  func.func @transform_4(%arg0: i32) -> (i32, i32) {
    %c0_i32 = arith.constant 0 : i32
    %c0_i32_0 = arith.constant 0 : i32
    %c0_i32_1 = arith.constant 0 : i32
    return %c0_i32, %c0_i32_0 : i32, i32
  }
}

module attributes {stable_mosaic.version = 11 : i64} {
  func.func @_residual_bn_relu_kernel(%arg0: i32, %arg1: memref<1x256x128xf32, #tpu.memory_space<vmem>>, %arg2: memref<1x256x128xf32, #tpu.memory_space<vmem>>, %arg3: memref<2x128xf32, #tpu.memory_space<vmem>>, %arg4: memref<2x128xf32, #tpu.memory_space<vmem>>, %arg5: memref<1x256x128xf32, #tpu.memory_space<vmem>>) attributes {dimension_semantics = [#tpu.dimension_semantics<parallel>], iteration_bounds = array<i64: 2>, scalar_prefetch = 0 : i64, scratch_operands = 0 : i64, tpu.core_type = #tpu.core_type<tc>, window_params = [{transform_indices = @transform_0, window_bounds = array<i64: 1, 256, 128>}, {transform_indices = @transform_1, window_bounds = array<i64: 1, 256, 128>}, {pipeline_mode = #tpu.pipeline_mode<synchronous>, transform_indices = @transform_2, window_bounds = array<i64: 2, 128>}, {pipeline_mode = #tpu.pipeline_mode<synchronous>, transform_indices = @transform_3, window_bounds = array<i64: 2, 128>}, {transform_indices = @transform_4, window_bounds = array<i64: 1, 256, 128>}]} {
    %c0 = arith.constant 0 : index
    %c0_0 = arith.constant 0 : index
    %c0_1 = arith.constant 0 : index
    %0 = vector.load %arg1[%c0, %c0_0, %c0_1] : memref<1x256x128xf32, #tpu.memory_space<vmem>>, vector<1x256x128xf32>
    %1 = vector.shape_cast %0 : vector<1x256x128xf32> to vector<256x128xf32>
    %c0_2 = arith.constant 0 : index
    %c0_3 = arith.constant 0 : index
    %2 = vector.load %arg3[%c0_2, %c0_3] : memref<2x128xf32, #tpu.memory_space<vmem>>, vector<1x128xf32>
    %3 = vector.broadcast %2 : vector<1x128xf32> to vector<256x128xf32>
    %4 = arith.mulf %1, %3 : vector<256x128xf32>
    %c1 = arith.constant 1 : index
    %c0_4 = arith.constant 0 : index
    %5 = vector.load %arg3[%c1, %c0_4] : memref<2x128xf32, #tpu.memory_space<vmem>>, vector<1x128xf32>
    %6 = vector.broadcast %5 : vector<1x128xf32> to vector<256x128xf32>
    %7 = arith.addf %4, %6 : vector<256x128xf32>
    %c0_5 = arith.constant 0 : index
    %c0_6 = arith.constant 0 : index
    %c0_7 = arith.constant 0 : index
    %8 = vector.load %arg2[%c0_5, %c0_6, %c0_7] : memref<1x256x128xf32, #tpu.memory_space<vmem>>, vector<1x256x128xf32>
    %9 = vector.shape_cast %8 : vector<1x256x128xf32> to vector<256x128xf32>
    %c0_8 = arith.constant 0 : index
    %c0_9 = arith.constant 0 : index
    %10 = vector.load %arg4[%c0_8, %c0_9] : memref<2x128xf32, #tpu.memory_space<vmem>>, vector<1x128xf32>
    %11 = vector.broadcast %10 : vector<1x128xf32> to vector<256x128xf32>
    %12 = arith.mulf %9, %11 : vector<256x128xf32>
    %c1_10 = arith.constant 1 : index
    %c0_11 = arith.constant 0 : index
    %13 = vector.load %arg4[%c1_10, %c0_11] : memref<2x128xf32, #tpu.memory_space<vmem>>, vector<1x128xf32>
    %14 = vector.broadcast %13 : vector<1x128xf32> to vector<256x128xf32>
    %15 = arith.addf %12, %14 : vector<256x128xf32>
    %16 = arith.addf %7, %15 : vector<256x128xf32>
    %cst = arith.constant 0.000000e+00 : f32
    %17 = vector.broadcast %cst : f32 to vector<256x128xf32>
    %18 = arith.maximumf %16, %17 : vector<256x128xf32>
    %c0_12 = arith.constant 0 : index
    %c0_13 = arith.constant 0 : index
    %c0_14 = arith.constant 0 : index
    %19 = vector.load %arg5[%c0_12, %c0_13, %c0_14] : memref<1x256x128xf32, #tpu.memory_space<vmem>>, vector<1x256x128xf32>
    %20 = vector.shape_cast %19 : vector<1x256x128xf32> to vector<256x128xf32>
    %21 = vector.shape_cast %18 : vector<256x128xf32> to vector<1x256x128xf32>
    tpu.vector_store %arg5[%c0_12, %c0_13, %c0_14], %21 {strides = array<i32>} : memref<1x256x128xf32, #tpu.memory_space<vmem>>, vector<1x256x128xf32>,
    return
  }
  func.func @transform_0(%arg0: i32) -> (i32, i32, i32) {
    %c0_i32 = arith.constant 0 : i32
    %c0_i32_0 = arith.constant 0 : i32
    %c0_i32_1 = arith.constant 0 : i32
    return %arg0, %c0_i32, %c0_i32_0 : i32, i32, i32
  }
  func.func @transform_1(%arg0: i32) -> (i32, i32, i32) {
    %c0_i32 = arith.constant 0 : i32
    %c0_i32_0 = arith.constant 0 : i32
    %c0_i32_1 = arith.constant 0 : i32
    return %arg0, %c0_i32, %c0_i32_0 : i32, i32, i32
  }
  func.func @transform_2(%arg0: i32) -> (i32, i32) {
    %c0_i32 = arith.constant 0 : i32
    %c0_i32_0 = arith.constant 0 : i32
    %c0_i32_1 = arith.constant 0 : i32
    return %c0_i32, %c0_i32_0 : i32, i32
  }
  func.func @transform_3(%arg0: i32) -> (i32, i32) {
    %c0_i32 = arith.constant 0 : i32
    %c0_i32_0 = arith.constant 0 : i32
    %c0_i32_1 = arith.constant 0 : i32
    return %c0_i32, %c0_i32_0 : i32, i32
  }
  func.func @transform_4(%arg0: i32) -> (i32, i32, i32) {
    %c0_i32 = arith.constant 0 : i32
    %c0_i32_0 = arith.constant 0 : i32
    %c0_i32_1 = arith.constant 0 : i32
    return %arg0, %c0_i32, %c0_i32_0 : i32, i32, i32
  }
}

</mosaic_0001>

<bundles_post_ra>
// kernel: bottleneck_forward.7
= control target key start
LH: loop header
LB: loop body
LE: loop exit
PB: predicated region body
PF: predicated region fallthrough
CT: control target
= control target key end

     0   :  { %s654_s15 = smov 0   ;;  %s929_s0 = inlined_call_operand.vmem [shape: f32[2,256,128], index: 0, kind: input, shape index: {}]   ;;  %s930_s1 = inlined_call_operand.vmem [shape: f32[2,256,128], index: 1, kind: input, shape index: {}]   ;;  %s931_s2 = inlined_call_operand.vmem [shape: f32[2,128], index: 2, kind: input, shape index: {}]   ;;  %s932_s3 = inlined_call_operand.vmem [shape: f32[2,128], index: 3, kind: input, shape index: {}]   ;;  %s933_s4 = inlined_call_operand.vmem [shape: f32[2,256,128], index: 4, kind: output, shape index: {}]  }
   0x1 LB: > { %s593_s16 = sadd.s32 4294967295, %s627_s15   ;;  %p597_p0 = scmp.ge.s32.totalorder %s627_s15, 1  ;;  %s627_s15 = sphi %s654_s15, %s14_s15  }
   0x2   : > { %p172_p1 = scmp.lt.s32.totalorder %s627_s15, 3 }
   0x4   : > { %p173_p2 = pnand %p597_p0, %p172_p1 }
   0x5   : > { %p203_p3 = scmp.lt.s32.totalorder (!%p173_p2), %s593_s16, 1  ;;  %v667_v0 = vld [vmem:[%s931_s2] ss:$0 sm:$0xff] (!%p173_p2)  ;;  %v689_v2 = vld [vmem:[%s931_s2 + $0x1] ss:$0 sm:$0xff] (!%p173_p2) }
   0x6   : > { %176 = sbr.rel (%p173_p2) target bundleno = 71 (0x47), region = 36  ;;  %v672_v1 = vld [vmem:[%s932_s3] ss:$0 sm:$0xff] (!%p173_p2)  ;;  %v694_v3 = vld [vmem:[%s932_s3 + $0x1] ss:$0 sm:$0xff] (!%p173_p2) }
   0xd   : > { %s935_s16 = smov (!%p203_p3, %s593_s16), 1 }
   0xe   : > { %s662_s17 = sshll.u32 %s935_s16, 8 }
   0xf   : > { %s678_s24 = scalar_lea.vmem %s929_s0, %s662_s17  ;;  %s684_s27 = scalar_lea.vmem %s930_s1, %s662_s17 }
  0x10   : > { %v218_v4 = vld [vmem:[%s678_s24] sm:$0xff]  ;;  %v219_v6 = vld [vmem:[%s678_s24 + $0x8] sm:$0xff]  ;;  %v220_v11 = vld [vmem:[%s678_s24 + $0x10] sm:$0xff]  ;;  %s729_s8 = scalar_lea.vmem %s933_s4, %s662_s17 }
  0x11   : > { %v324_v5 = vld [vmem:[%s684_s27] sm:$0xff]  ;;  %v255_v7 = vmul.f32 %v667_v0, %v218_v4  ;;  %v256_v9 = vmul.f32 %v667_v0, %v219_v6  ;;  %v325_v10 = vld [vmem:[%s684_s27 + $0x8] sm:$0xff]  ;;  %v326_v12 = vld [vmem:[%s684_s27 + $0x10] sm:$0xff]  ;;  %v257_v14 = vmul.f32 %v667_v0, %v220_v11 }
  0x12   : > { %v361_v8 = vmul.f32 %v672_v1, %v324_v5  ;;  %v362_v13 = vmul.f32 %v672_v1, %v325_v10  ;;  %v363_v15 = vmul.f32 %v672_v1, %v326_v12  ;;  %v221_v16 = vld [vmem:[%s678_s24 + $0x18] sm:$0xff]  ;;  %v222_v18 = vld [vmem:[%s678_s24 + $0x20] sm:$0xff]  ;;  %v223_v24 = vld [vmem:[%s678_s24 + $0x28] sm:$0xff] }
  0x13   : > { %v327_v17 = vld [vmem:[%s684_s27 + $0x18] sm:$0xff]  ;;  %v292_v19 = vadd.f32 %v689_v2, %v255_v7  ;;  %v293_v21 = vadd.f32 %v689_v2, %v256_v9  ;;  %v258_v22 = vmul.f32 %v667_v0, %v221_v16  ;;  %v328_v23 = vld [vmem:[%s684_s27 + $0x20] sm:$0xff]  ;;  %v294_v26 = vadd.f32 %v689_v2, %v257_v14  ;;  %v329_v29 = vld [vmem:[%s684_s27 + $0x28] sm:$0xff] }
  0x14   : > { %v398_v20 = vadd.f32 %v694_v3, %v361_v8  ;;  %v399_v25 = vadd.f32 %v694_v3, %v362_v13  ;;  %v400_v27 = vadd.f32 %v694_v3, %v363_v15  ;;  %v364_v28 = vmul.f32 %v672_v1, %v327_v17  ;;  %v224_v38 = vld [vmem:[%s678_s24 + $0x30] sm:$0xff]  ;;  %v225_v44 = vld [vmem:[%s678_s24 + $0x38] sm:$0xff]  ;;  %v226_v46 = vld [vmem:[%s678_s24 + $0x40] sm:$0xff] }
  0x15   : > { %v295_v31 = vadd.f32 %v689_v2, %v258_v22  ;;  %v259_v32 = vmul.f32 %v667_v0, %v222_v18  ;;  %v365_v33 = vmul.f32 %v672_v1, %v328_v23  ;;  %v260_v37 = vmul.f32 %v667_v0, %v223_v24  ;;  %v330_v39 = vld [vmem:[%s684_s27 + $0x30] sm:$0xff]  ;;  %v331_v45 = vld [vmem:[%s684_s27 + $0x38] sm:$0xff]  ;;  %v332_v55 = vld [vmem:[%s684_s27 + $0x40] sm:$0xff] }
  0x16   : > { %v430_v30 = vadd.f32 %v398_v20, %v292_v19  ;;  %v431_v34 = vadd.f32 %v399_v25, %v293_v21  ;;  %v432_v35 = vadd.f32 %v400_v27, %v294_v26  ;;  %v401_v36 = vadd.f32 %v694_v3, %v364_v28  ;;  %v227_v60 = vld [vmem:[%s678_s24 + $0x48] sm:$0xff]  ;;  %v228_v6 = vld [vmem:[%s678_s24 + $0x50] sm:$0xff]  ;;  %v229_v12 = vld [vmem:[%s678_s24 + $0x58] sm:$0xff] }
  0x17   : > { %v296_v41 = vadd.f32 %v689_v2, %v259_v32  ;;  %v402_v42 = vadd.f32 %v694_v3, %v365_v33  ;;  %v366_v43 = vmul.f32 %v672_v1, %v329_v29  ;;  %v297_v50 = vadd.f32 %v689_v2, %v260_v37  ;;  %v333_v61 = vld [vmem:[%s684_s27 + $0x48] sm:$0xff]  ;;  %v334_v7 = vld [vmem:[%s684_s27 + $0x50] sm:$0xff]  ;;  %v335_v21 = vld [vmem:[%s684_s27 + $0x58] sm:$0xff] }
  0x18   : > { %v462_v40 = vmax.f32 %v430_v30, 0.0  ;;  %v463_v47 = vmax.f32 %v431_v34, 0.0  ;;  %v464_v48 = vmax.f32 %v432_v35, 0.0  ;;  %v433_v49 = vadd.f32 %v401_v36, %v295_v31  ;;  %v230_v22 = vld [vmem:[%s678_s24 + $0x60] sm:$0xff]  ;;  %v231_v28 = vld [vmem:[%s678_s24 + $0x68] sm:$0xff] }
  0x19   : > { %v434_v51 = vadd.f32 %v402_v42, %v296_v41  ;;  %v403_v52 = vadd.f32 %v694_v3, %v366_v43  ;;  %v261_v53 = vmul.f32 %v667_v0, %v224_v38  ;;  %v367_v54 = vmul.f32 %v672_v1, %v330_v39  ;;  %v336_v27 = vld [vmem:[%s684_s27 + $0x60] sm:$0xff]  ;;  %v337_v33 = vld [vmem:[%s684_s27 + $0x68] sm:$0xff]  ;;  %v232_v38 = vld [vmem:[%s678_s24 + $0x70] sm:$0xff] }
  0x1a   : > { %494 = vst [vmem:[%s729_s8] sm:$0xff] %v462_v40  ;;  %495 = vst [vmem:[%s729_s8 + $0x8] sm:$0xff] %v463_v47  ;;  %v465_v56 = vmax.f32 %v433_v49, 0.0  ;;  %v262_v57 = vmul.f32 %v667_v0, %v225_v44  ;;  %v368_v58 = vmul.f32 %v672_v1, %v331_v45  ;;  %v263_v59 = vmul.f32 %v667_v0, %v226_v46  ;;  %v338_v43 = vld [vmem:[%s684_s27 + $0x70] sm:$0xff]  ;;  %v233_v44 = vld [vmem:[%s678_s24 + $0x78] sm:$0xff] }
  0x1b   : > { %496 = vst [vmem:[%s729_s8 + $0x10] sm:$0xff] %v464_v48  ;;  %v466_v62 = vmax.f32 %v434_v51, 0.0  ;;  %v435_v63 = vadd.f32 %v403_v52, %v297_v50  ;;  %v298_v4 = vadd.f32 %v689_v2, %v261_v53  ;;  %v404_v5 = vadd.f32 %v694_v3, %v367_v54  ;;  %v339_v49 = vld [vmem:[%s684_s27 + $0x78] sm:$0xff]  ;;  %v234_v50 = vld [vmem:[%s678_s24 + $0x80] sm:$0xff] }
  0x1c   : > { %497 = vst [vmem:[%s729_s8 + $0x18] sm:$0xff] %v465_v56  ;;  %v299_v8 = vadd.f32 %v689_v2, %v262_v57  ;;  %v405_v9 = vadd.f32 %v694_v3, %v368_v58  ;;  %v300_v10 = vadd.f32 %v689_v2, %v263_v59  ;;  %v369_v11 = vmul.f32 %v672_v1, %v332_v55  ;;  %v340_v59 = vld [vmem:[%s684_s27 + $0x80] sm:$0xff] }
  0x1d   : > { %498 = vst [vmem:[%s729_s8 + $0x20] sm:$0xff] %v466_v62  ;;  %v467_v13 = vmax.f32 %v435_v63, 0.0  ;;  %v436_v14 = vadd.f32 %v404_v5, %v298_v4  ;;  %v264_v15 = vmul.f32 %v667_v0, %v227_v60  ;;  %v370_v16 = vmul.f32 %v672_v1, %v333_v61  ;;  %v235_v4 = vld [vmem:[%s678_s24 + $0x88] sm:$0xff] }
  0x1e   : > { %v437_v17 = vadd.f32 %v405_v9, %v299_v8  ;;  %v406_v18 = vadd.f32 %v694_v3, %v369_v11  ;;  %v265_v19 = vmul.f32 %v667_v0, %v228_v6  ;;  %v371_v20 = vmul.f32 %v672_v1, %v334_v7  ;;  %v341_v5 = vld [vmem:[%s684_s27 + $0x88] sm:$0xff]  ;;  %v342_v11 = vld [vmem:[%s684_s27 + $0x90] sm:$0xff] }
  0x1f   : > { %499 = vst [vmem:[%s729_s8 + $0x28] sm:$0xff] %v467_v13  ;;  %v468_v23 = vmax.f32 %v436_v14, 0.0  ;;  %v301_v24 = vadd.f32 %v689_v2, %v264_v15  ;;  %v407_v25 = vadd.f32 %v694_v3, %v370_v16  ;;  %v266_v26 = vmul.f32 %v667_v0, %v229_v12  ;;  %v237_v16 = vld [vmem:[%s678_s24 + $0x98] sm:$0xff] }
  0x20   : > { %v469_v29 = vmax.f32 %v437_v17, 0.0  ;;  %v438_v30 = vadd.f32 %v406_v18, %v300_v10  ;;  %v302_v31 = vadd.f32 %v689_v2, %v265_v19  ;;  %v408_v32 = vadd.f32 %v694_v3, %v371_v20  ;;  %v236_v10 = vld [vmem:[%s678_s24 + $0x90] sm:$0xff] }
  0x21   : > { %500 = vst [vmem:[%s729_s8 + $0x30] sm:$0xff] %v468_v23  ;;  %v439_v34 = vadd.f32 %v407_v25, %v301_v24  ;;  %v303_v35 = vadd.f32 %v689_v2, %v266_v26  ;;  %v372_v36 = vmul.f32 %v672_v1, %v335_v21  ;;  %v267_v37 = vmul.f32 %v667_v0, %v230_v22  ;;  %v343_v25 = vld [vmem:[%s684_s27 + $0x98] sm:$0xff]  ;;  %v238_v26 = vld [vmem:[%s678_s24 + $0xa0] sm:$0xff] }
  0x22   : > { %501 = vst [vmem:[%s729_s8 + $0x38] sm:$0xff] %v469_v29  ;;  %v470_v39 = vmax.f32 %v438_v30, 0.0  ;;  %v440_v40 = vadd.f32 %v408_v32, %v302_v31  ;;  %v373_v41 = vmul.f32 %v672_v1, %v336_v27  ;;  %v268_v42 = vmul.f32 %v667_v0, %v231_v28  ;;  %v344_v31 = vld [vmem:[%s684_s27 + $0xa0] sm:$0xff]  ;;  %v239_v32 = vld [vmem:[%s678_s24 + $0xa8] sm:$0xff] }
  0x23   : > { %v471_v45 = vmax.f32 %v439_v34, 0.0  ;;  %v409_v46 = vadd.f32 %v694_v3, %v372_v36  ;;  %v304_v47 = vadd.f32 %v689_v2, %v267_v37  ;;  %v374_v48 = vmul.f32 %v672_v1, %v337_v33  ;;  %v345_v37 = vld [vmem:[%s684_s27 + $0xa8] sm:$0xff] }
  0x24   : > { %502 = vst [vmem:[%s729_s8 + $0x40] sm:$0xff] %v470_v39  ;;  %v472_v51 = vmax.f32 %v440_v40, 0.0  ;;  %v410_v52 = vadd.f32 %v694_v3, %v373_v41  ;;  %v305_v53 = vadd.f32 %v689_v2, %v268_v42  ;;  %v269_v54 = vmul.f32 %v667_v0, %v232_v38  ;;  %v240_v42 = vld [vmem:[%s678_s24 + $0xb0] sm:$0xff] }
  0x25   : > { %503 = vst [vmem:[%s729_s8 + $0x48] sm:$0xff] %v471_v45  ;;  %v441_v55 = vadd.f32 %v409_v46, %v303_v35  ;;  %v411_v56 = vadd.f32 %v694_v3, %v374_v48  ;;  %v375_v57 = vmul.f32 %v672_v1, %v338_v43  ;;  %v270_v58 = vmul.f32 %v667_v0, %v233_v44  ;;  %v241_v48 = vld [vmem:[%s678_s24 + $0xb8] sm:$0xff] }
  0x26   : > { %504 = vst [vmem:[%s729_s8 + $0x50] sm:$0xff] %v472_v51  ;;  %v442_v60 = vadd.f32 %v410_v52, %v304_v47  ;;  %v306_v61 = vadd.f32 %v689_v2, %v269_v54  ;;  %v376_v62 = vmul.f32 %v672_v1, %v339_v49  ;;  %v271_v63 = vmul.f32 %v667_v0, %v234_v50  ;;  %v346_v47 = vld [vmem:[%s684_s27 + $0xb0] sm:$0xff]  ;;  %v242_v54 = vld [vmem:[%s678_s24 + $0xc0] sm:$0xff] }
  0x27   : > { %v473_v6 = vmax.f32 %v441_v55, 0.0  ;;  %v443_v7 = vadd.f32 %v411_v56, %v305_v53  ;;  %v412_v8 = vadd.f32 %v694_v3, %v375_v57  ;;  %v307_v9 = vadd.f32 %v689_v2, %v270_v58  ;;  %v347_v53 = vld [vmem:[%s684_s27 + $0xb8] sm:$0xff] }
  0x28   : > { %v474_v12 = vmax.f32 %v442_v60, 0.0  ;;  %v413_v13 = vadd.f32 %v694_v3, %v376_v62  ;;  %v308_v14 = vadd.f32 %v689_v2, %v271_v63  ;;  %v377_v15 = vmul.f32 %v672_v1, %v340_v59  ;;  %v348_v63 = vld [vmem:[%s684_s27 + $0xc0] sm:$0xff] }
  0x29   : > { %505 = vst [vmem:[%s729_s8 + $0x58] sm:$0xff] %v473_v6  ;;  %v475_v17 = vmax.f32 %v443_v7, 0.0  ;;  %v444_v18 = vadd.f32 %v412_v8, %v306_v61  ;;  %v272_v19 = vmul.f32 %v667_v0, %v235_v4  ;;  %v378_v20 = vmul.f32 %v672_v1, %v341_v5  ;;  %v243_v8 = vld [vmem:[%s678_s24 + $0xc8] sm:$0xff] }
  0x2a   : > { %506 = vst [vmem:[%s729_s8 + $0x60] sm:$0xff] %v474_v12  ;;  %v445_v21 = vadd.f32 %v413_v13, %v307_v9  ;;  %v414_v22 = vadd.f32 %v694_v3, %v377_v15  ;;  %v273_v23 = vmul.f32 %v667_v0, %v236_v10  ;;  %v379_v24 = vmul.f32 %v672_v1, %v342_v11  ;;  %v349_v9 = vld [vmem:[%s684_s27 + $0xc8] sm:$0xff]  ;;  %v350_v15 = vld [vmem:[%s684_s27 + $0xd0] sm:$0xff] }
  0x2b   : > { %507 = vst [vmem:[%s729_s8 + $0x68] sm:$0xff] %v475_v17  ;;  %v476_v27 = vmax.f32 %v444_v18, 0.0  ;;  %v309_v28 = vadd.f32 %v689_v2, %v272_v19  ;;  %v415_v29 = vadd.f32 %v694_v3, %v378_v20  ;;  %v274_v30 = vmul.f32 %v667_v0, %v237_v16  ;;  %v245_v20 = vld [vmem:[%s678_s24 + $0xd8] sm:$0xff] }
  0x2c   : > { %v477_v33 = vmax.f32 %v445_v21, 0.0  ;;  %v446_v34 = vadd.f32 %v414_v22, %v308_v14  ;;  %v310_v35 = vadd.f32 %v689_v2, %v273_v23  ;;  %v416_v36 = vadd.f32 %v694_v3, %v379_v24  ;;  %v244_v14 = vld [vmem:[%s678_s24 + $0xd0] sm:$0xff] }
  0x2d   : > { %508 = vst [vmem:[%s729_s8 + $0x70] sm:$0xff] %v476_v27  ;;  %v447_v38 = vadd.f32 %v415_v29, %v309_v28  ;;  %v311_v39 = vadd.f32 %v689_v2, %v274_v30  ;;  %v380_v40 = vmul.f32 %v672_v1, %v343_v25  ;;  %v275_v41 = vmul.f32 %v667_v0, %v238_v26  ;;  %v351_v29 = vld [vmem:[%s684_s27 + $0xd8] sm:$0xff]  ;;  %v246_v30 = vld [vmem:[%s678_s24 + $0xe0] sm:$0xff] }
  0x2e   : > { %509 = vst [vmem:[%s729_s8 + $0x78] sm:$0xff] %v477_v33  ;;  %v478_v43 = vmax.f32 %v446_v34, 0.0  ;;  %v448_v44 = vadd.f32 %v416_v36, %v310_v35  ;;  %v381_v45 = vmul.f32 %v672_v1, %v344_v31  ;;  %v276_v46 = vmul.f32 %v667_v0, %v239_v32  ;;  %v352_v35 = vld [vmem:[%s684_s27 + $0xe0] sm:$0xff]  ;;  %v247_v36 = vld [vmem:[%s678_s24 + $0xe8] sm:$0xff] }
  0x2f   : > { %v479_v49 = vmax.f32 %v447_v38, 0.0  ;;  %v417_v50 = vadd.f32 %v694_v3, %v380_v40  ;;  %v312_v51 = vadd.f32 %v689_v2, %v275_v41  ;;  %v382_v52 = vmul.f32 %v672_v1, %v345_v37  ;;  %v353_v41 = vld [vmem:[%s684_s27 + $0xe8] sm:$0xff] }
  0x30   : > { %510 = vst [vmem:[%s729_s8 + $0x80] sm:$0xff] %v478_v43  ;;  %v480_v55 = vmax.f32 %v448_v44, 0.0  ;;  %v418_v56 = vadd.f32 %v694_v3, %v381_v45  ;;  %v313_v57 = vadd.f32 %v689_v2, %v276_v46  ;;  %v277_v58 = vmul.f32 %v667_v0, %v240_v42  ;;  %v248_v46 = vld [vmem:[%s678_s24 + $0xf0] sm:$0xff] }
  0x31   : > { %511 = vst [vmem:[%s729_s8 + $0x88] sm:$0xff] %v479_v49  ;;  %v449_v59 = vadd.f32 %v417_v50, %v311_v39  ;;  %v419_v60 = vadd.f32 %v694_v3, %v382_v52  ;;  %v383_v61 = vmul.f32 %v672_v1, %v346_v47  ;;  %v278_v62 = vmul.f32 %v667_v0, %v241_v48  ;;  %v249_v52 = vld [vmem:[%s678_s24 + $0xf8] sm:$0xff] }
  0x32   : > { %512 = vst [vmem:[%s729_s8 + $0x90] sm:$0xff] %v480_v55  ;;  %v450_v4 = vadd.f32 %v418_v56, %v312_v51  ;;  %v314_v5 = vadd.f32 %v689_v2, %v277_v58  ;;  %v384_v6 = vmul.f32 %v672_v1, %v347_v53  ;;  %v279_v7 = vmul.f32 %v667_v0, %v242_v54  ;;  %v354_v51 = vld [vmem:[%s684_s27 + $0xf0] sm:$0xff] }
  0x33   : > { %v481_v10 = vmax.f32 %v449_v59, 0.0  ;;  %v451_v11 = vadd.f32 %v419_v60, %v313_v57  ;;  %v420_v12 = vadd.f32 %v694_v3, %v383_v61  ;;  %v315_v13 = vadd.f32 %v689_v2, %v278_v62  ;;  %v355_v57 = vld [vmem:[%s684_s27 + $0xf8] sm:$0xff] }
  0x34   : > { %v482_v16 = vmax.f32 %v450_v4, 0.0  ;;  %v421_v17 = vadd.f32 %v694_v3, %v384_v6  ;;  %v316_v18 = vadd.f32 %v689_v2, %v279_v7  ;;  %v385_v19 = vmul.f32 %v672_v1, %v348_v63 }
  0x35   : > { %513 = vst [vmem:[%s729_s8 + $0x98] sm:$0xff] %v481_v10  ;;  %v483_v21 = vmax.f32 %v451_v11, 0.0  ;;  %v452_v22 = vadd.f32 %v420_v12, %v314_v5  ;;  %v280_v23 = vmul.f32 %v667_v0, %v243_v8  ;;  %v386_v24 = vmul.f32 %v672_v1, %v349_v9 }
  0x36   : > { %514 = vst [vmem:[%s729_s8 + $0xa0] sm:$0xff] %v482_v16  ;;  %v453_v25 = vadd.f32 %v421_v17, %v315_v13  ;;  %v422_v26 = vadd.f32 %v694_v3, %v385_v19  ;;  %v281_v27 = vmul.f32 %v667_v0, %v244_v14  ;;  %v387_v28 = vmul.f32 %v672_v1, %v350_v15 }
  0x37   : > { %515 = vst [vmem:[%s729_s8 + $0xa8] sm:$0xff] %v483_v21  ;;  %v484_v31 = vmax.f32 %v452_v22, 0.0  ;;  %v317_v32 = vadd.f32 %v689_v2, %v280_v23  ;;  %v423_v33 = vadd.f32 %v694_v3, %v386_v24  ;;  %v282_v34 = vmul.f32 %v667_v0, %v245_v20 }
  0x38   : > { %v485_v37 = vmax.f32 %v453_v25, 0.0  ;;  %v454_v38 = vadd.f32 %v422_v26, %v316_v18  ;;  %v318_v39 = vadd.f32 %v689_v2, %v281_v27  ;;  %v424_v40 = vadd.f32 %v694_v3, %v387_v28 }
  0x39   : > { %516 = vst [vmem:[%s729_s8 + $0xb0] sm:$0xff] %v484_v31  ;;  %v455_v42 = vadd.f32 %v423_v33, %v317_v32  ;;  %v319_v43 = vadd.f32 %v689_v2, %v282_v34  ;;  %v388_v44 = vmul.f32 %v672_v1, %v351_v29  ;;  %v283_v45 = vmul.f32 %v667_v0, %v246_v30 }
  0x3a   : > { %517 = vst [vmem:[%s729_s8 + $0xb8] sm:$0xff] %v485_v37  ;;  %v486_v47 = vmax.f32 %v454_v38, 0.0  ;;  %v456_v48 = vadd.f32 %v424_v40, %v318_v39  ;;  %v389_v49 = vmul.f32 %v672_v1, %v352_v35  ;;  %v284_v50 = vmul.f32 %v667_v0, %v247_v36 }
  0x3b   : > { %v487_v53 = vmax.f32 %v455_v42, 0.0  ;;  %v425_v54 = vadd.f32 %v694_v3, %v388_v44  ;;  %v320_v55 = vadd.f32 %v689_v2, %v283_v45  ;;  %v390_v56 = vmul.f32 %v672_v1, %v353_v41 }
  0x3c   : > { %518 = vst [vmem:[%s729_s8 + $0xc0] sm:$0xff] %v486_v47  ;;  %v488_v58 = vmax.f32 %v456_v48, 0.0  ;;  %v426_v59 = vadd.f32 %v694_v3, %v389_v49  ;;  %v321_v60 = vadd.f32 %v689_v2, %v284_v50  ;;  %v285_v61 = vmul.f32 %v667_v0, %v248_v46 }
  0x3d   : > { %519 = vst [vmem:[%s729_s8 + $0xc8] sm:$0xff] %v487_v53  ;;  %v457_v62 = vadd.f32 %v425_v54, %v319_v43  ;;  %v427_v63 = vadd.f32 %v694_v3, %v390_v56  ;;  %v391_v4 = vmul.f32 %v672_v1, %v354_v51  ;;  %v286_v5 = vmul.f32 %v667_v0, %v249_v52 }
  0x3e   : > { %520 = vst [vmem:[%s729_s8 + $0xd0] sm:$0xff] %v488_v58  ;;  %v458_v6 = vadd.f32 %v426_v59, %v320_v55  ;;  %v322_v7 = vadd.f32 %v689_v2, %v285_v61  ;;  %v392_v8 = vmul.f32 %v672_v1, %v355_v57 }
  0x3f   : > { %v489_v9 = vmax.f32 %v457_v62, 0.0  ;;  %v459_v10 = vadd.f32 %v427_v63, %v321_v60  ;;  %v428_v11 = vadd.f32 %v694_v3, %v391_v4  ;;  %v323_v12 = vadd.f32 %v689_v2, %v286_v5 }
  0x40   : > { %v490_v13 = vmax.f32 %v458_v6, 0.0  ;;  %v429_v14 = vadd.f32 %v694_v3, %v392_v8 }
  0x41   : > { %521 = vst [vmem:[%s729_s8 + $0xd8] sm:$0xff] %v489_v9  ;;  %v491_v0 = vmax.f32 %v459_v10, 0.0  ;;  %v460_v15 = vadd.f32 %v428_v11, %v322_v7 }
  0x42   : > { %522 = vst [vmem:[%s729_s8 + $0xe0] sm:$0xff] %v490_v13  ;;  %v461_v16 = vadd.f32 %v429_v14, %v323_v12 }
  0x43   : > { %523 = vst [vmem:[%s729_s8 + $0xe8] sm:$0xff] %v491_v0  ;;  %v492_v17 = vmax.f32 %v460_v15, 0.0 }
  0x44   : > { %v493_v18 = vmax.f32 %v461_v16, 0.0 }
  0x45   : > { %524 = vst [vmem:[%s729_s8 + $0xf0] sm:$0xff] %v492_v17 }
  0x46   : > { %525 = vst [vmem:[%s729_s8 + $0xf8] sm:$0xff] %v493_v18 }
  0x47 PF: > { %s14_s15 = sadd.s32 1, %s627_s15  }
  0x48   : > { %p11_p4 = scmp.ge.s32.totalorder %s14_s15, 4  }
  0x4a   :  { %13 = sbr.rel (!%p11_p4) target bundleno = 1 (0x1), region = 69 }

// kernel: bottleneck_forward.6
= control target key start
LH: loop header
LB: loop body
LE: loop exit
PB: predicated region body
PF: predicated region fallthrough
CT: control target
= control target key end

     0   :  { %s1019_s15 = smov 0   ;;  %s1313_s0 = inlined_call_operand.vmem [shape: f32[2,256,128], index: 0, kind: input, shape index: {}]   ;;  %s1314_s1 = inlined_call_operand.vmem [shape: f32[2,128], index: 1, kind: input, shape index: {}]   ;;  %s1315_s2 = inlined_call_operand.vmem [shape: f32[128,128], index: 2, kind: input, shape index: {}]   ;;  %s1316_s3 = inlined_call_operand.vmem [shape: f32[2,256,128], index: 3, kind: output, shape index: {0}]   ;;  %s1317_s4 = inlined_call_operand.vmem [shape: f32[2,128], index: 4, kind: output, shape index: {1}]  }
   0x1 LB: > { %s784_s16 = sadd.s32 4294967295, %s991_s15   ;;  %p788_p0 = scmp.ge.s32.totalorder %s991_s15, 1  ;;  %s991_s15 = sphi %s1019_s15, %s15_s15  }
   0x2   : > { %p160_p1 = scmp.lt.s32.totalorder %s991_s15, 3 }
   0x4   : > { %p161_p2 = pnand %p788_p0, %p160_p1 }
   0x5   : > { %p186_p3 = scmp.lt.s32.totalorder (!%p161_p2), %s784_s16, 1  ;;  %p793_p4 = scmp.ne.s32.totalorder (!%p161_p2), %s784_s16, 0 }
   0x6   : > { %164 = sbr.rel (%p161_p2) target bundleno = 351 (0x15f), region = 32 }
   0xd   : > { %s187_s17 = scalar_select %p186_p3, %s784_s16, 1 }
   0xe   : > { %199 = sbr.rel (%p793_p4) target bundleno = 21 (0x15), region = 36  ;;  %v993_v0 = vmov (!%p793_p4), 0.0  }
   0xf   : > { %s798_s18 = sshll.u32 %s187_s17, 8  ;;  %200 = vst [vmem:[%s1317_s4] sm:$0x3] (!%p793_p4), %v993_v0 }
  0x10   : > { %s1030_s21 = scalar_lea.vmem %s1313_s0, %s798_s18  ;;  %s1035_s24 = scalar_lea.vmem %s1316_s3, %s798_s18 }
  0x15 PF: > { %v339_v1 = vld [vmem:[%s1315_s2] sm:$0xff]  ;;  %v340_v2 = vld [vmem:[%s1315_s2 + $0x8] sm:$0xff]  ;;  %v341_v3 = vld [vmem:[%s1315_s2 + $0x10] sm:$0xff]  ;;  %vm719_vm0 = vcmask 1040384  }
  0x16   : > { %v928_v4 = vpack.c.bf16 %v340_v2, %v339_v1  ;;  %v342_v5 = vld [vmem:[%s1315_s2 + $0x18] sm:$0xff]  ;;  %v343_v7 = vld [vmem:[%s1315_s2 + $0x20] sm:$0xff]  ;;  %v344_v8 = vld [vmem:[%s1315_s2 + $0x28] sm:$0xff] }
  0x17   : > { %v932_v6 = vpack.c.bf16 %v342_v5, %v341_v3  ;;  %v936_v9 = vpack.c.bf16 %v344_v8, %v343_v7  ;;  %v201_v10 = vld [vmem:[%s1030_s21] sm:$0xff]  ;;  %v345_v12 = vld [vmem:[%s1315_s2 + $0x30] sm:$0xff]  ;;  %v346_v13 = vld [vmem:[%s1315_s2 + $0x38] sm:$0xff] }
  0x18   : > { %929 = vmatprep.subr.bf16.mxu0 %v928_v4  ;;  %960 = vmatprep.subr.bf16.mxu1 %v928_v4  ;;  %v1062_v11 = vld [vmem:[%s1314_s1] ss:$0 sm:$0xff]  ;;  %v1074_v15 = vld [vmem:[%s1314_s1 + $0x1] ss:$0 sm:$0xff]  ;;  %v940_v17 = vpack.c.bf16 %v346_v13, %v345_v12  ;;  %v348_v19 = vld [vmem:[%s1315_s2 + $0x48] sm:$0xff] }
  0x19   : > { %931 = vmatpush3.bf16.msra.mxu0 %v928_v4  ;;  %968 = vmatpush3.bf16.msra.mxu1 %v928_v4  ;;  %v238_v14 = vmul.f32 %v1062_v11, %v201_v10  ;;  %v347_v18 = vld [vmem:[%s1315_s2 + $0x40] sm:$0xff]  ;;  %v349_v22 = vld [vmem:[%s1315_s2 + $0x50] sm:$0xff]  ;;  %v350_v23 = vld [vmem:[%s1315_s2 + $0x58] sm:$0xff] }
  0x1a   : > { %933 = vmatprep.subr.bf16.mxu0 %v932_v6  ;;  %961 = vmatprep.subr.bf16.mxu1 %v932_v6  ;;  %v944_v21 = vpack.c.bf16 %v348_v19, %v347_v18  ;;  %v217_v24 = vld [vmem:[%s1030_s21 + $0x80] sm:$0xff]  ;;  %v948_v25 = vpack.c.bf16 %v350_v23, %v349_v22  ;;  %v352_v27 = vld [vmem:[%s1315_s2 + $0x68] sm:$0xff]  ;;  %v203_v32 = vld [vmem:[%s1030_s21 + $0x10] sm:$0xff] }
  0x1b   : > { %v275_v16 = vadd.f32 %v1074_v15, %v238_v14  ;;  %v351_v26 = vld [vmem:[%s1315_s2 + $0x60] sm:$0xff]  ;;  %v254_v28 = vmul.f32 %v1062_v11, %v217_v24  ;;  %v202_v29 = vld [vmem:[%s1030_s21 + $0x8] sm:$0xff]  ;;  %v353_v34 = vld [vmem:[%s1315_s2 + $0x70] sm:$0xff]  ;;  %v240_v39 = vmul.f32 %v1062_v11, %v203_v32 }
  0x1c   : > { %v952_v31 = vpack.c.bf16 %v352_v27, %v351_v26  ;;  %v218_v33 = vld [vmem:[%s1030_s21 + $0x88] sm:$0xff]  ;;  %v354_v35 = vld [vmem:[%s1315_s2 + $0x78] sm:$0xff]  ;;  %v219_v37 = vld [vmem:[%s1030_s21 + $0x90] sm:$0xff]  ;;  %v239_v38 = vmul.f32 %v1062_v11, %v202_v29 }
  0x1d   : > { %935 = vmatpush3.bf16.msra.mxu0 %v932_v6  ;;  %969 = vmatpush3.bf16.msra.mxu1 %v932_v6  ;;  %v307_v20 = vmax.f32 %v275_v16, 0.0  ;;  %v291_v30 = vadd.f32 %v1074_v15, %v254_v28  ;;  %v204_v40 = vld [vmem:[%s1030_s21 + $0x18] sm:$0xff]  ;;  %v205_v41 = vld [vmem:[%s1030_s21 + $0x20] sm:$0xff]  ;;  %v255_v42 = vmul.f32 %v1062_v11, %v218_v33  ;;  %v956_v43 = vpack.c.bf16 %v354_v35, %v353_v34  ;;  %v206_v50 = vld [vmem:[%s1030_s21 + $0x28] sm:$0xff] }
  0x1e   : > { %937 = vmatprep.subr.bf16.mxu0 %v936_v9  ;;  %962 = vmatprep.subr.bf16.mxu1 %v936_v9  ;;  %v256_v44 = vmul.f32 %v1062_v11, %v219_v37  ;;  %v220_v45 = vld [vmem:[%s1030_s21 + $0x98] sm:$0xff]  ;;  %v221_v46 = vld [vmem:[%s1030_s21 + $0xa0] sm:$0xff]  ;;  %v276_v47 = vadd.f32 %v1074_v15, %v239_v38  ;;  %v241_v48 = vmul.f32 %v1062_v11, %v204_v40  ;;  %v207_v52 = vld [vmem:[%s1030_s21 + $0x30] sm:$0xff] }
  0x1f   : > { %880 = vmatprep.mubr.f32.mxu0 %v307_v20  ;;  %v323_v36 = vmax.f32 %v291_v30, 0.0  ;;  %v242_v49 = vmul.f32 %v1062_v11, %v205_v41  ;;  %v277_v51 = vadd.f32 %v1074_v15, %v240_v39  ;;  %v292_v53 = vadd.f32 %v1074_v15, %v255_v42  ;;  %v222_v57 = vld [vmem:[%s1030_s21 + $0xa8] sm:$0xff]  ;;  %v223_v59 = vld [vmem:[%s1030_s21 + $0xb0] sm:$0xff]  ;;  %v208_v1 = vld [vmem:[%s1030_s21 + $0x38] sm:$0xff] }
  0x20   : > { %v257_v54 = vmul.f32 %v1062_v11, %v220_v45  ;;  %v293_v55 = vadd.f32 %v1074_v15, %v256_v44  ;;  %v258_v56 = vmul.f32 %v1062_v11, %v221_v46  ;;  %v243_v58 = vmul.f32 %v1062_v11, %v206_v50  ;;  %v209_v5 = vld [vmem:[%s1030_s21 + $0x40] sm:$0xff]  ;;  %v210_v19 = vld [vmem:[%s1030_s21 + $0x48] sm:$0xff]  ;;  %v211_v20 = vld [vmem:[%s1030_s21 + $0x50] sm:$0xff] }
  0x21   : > { %939 = vmatpush3.bf16.msra.mxu0 %v936_v9  ;;  %970 = vmatpush3.bf16.msra.mxu1 %v936_v9  ;;  %v308_v60 = vmax.f32 %v276_v47, 0.0  ;;  %v278_v61 = vadd.f32 %v1074_v15, %v241_v48  ;;  %v279_v62 = vadd.f32 %v1074_v15, %v242_v49  ;;  %v244_v63 = vmul.f32 %v1062_v11, %v207_v52  ;;  %v224_v9 = vld [vmem:[%s1030_s21 + $0xb8] sm:$0xff]  ;;  %v225_v12 = vld [vmem:[%s1030_s21 + $0xc0] sm:$0xff]  ;;  %v226_v27 = vld [vmem:[%s1030_s21 + $0xc8] sm:$0xff] }
  0x22   : > { %941 = vmatprep.subr.bf16.mxu0 %v940_v17  ;;  %963 = vmatprep.subr.bf16.mxu1 %v940_v17  ;;  %v309_v0 = vmax.f32 %v277_v51, 0.0  ;;  %v324_v2 = vmax.f32 %v292_v53, 0.0  ;;  %v294_v3 = vadd.f32 %v1074_v15, %v257_v54  ;;  %v259_v4 = vmul.f32 %v1062_v11, %v222_v57  ;;  %v227_v29 = vld [vmem:[%s1030_s21 + $0xd0] sm:$0xff]  ;;  %v212_v34 = vld [vmem:[%s1030_s21 + $0x58] sm:$0xff]  ;;  %v229_v45 = vld [vmem:[%s1030_s21 + $0xe0] sm:$0xff] }
  0x23   : > { %904 = vmatprep.mubr.f32.mxu1 %v323_v36  ;;  %v325_v6 = vmax.f32 %v293_v55, 0.0  ;;  %v295_v7 = vadd.f32 %v1074_v15, %v258_v56  ;;  %v260_v8 = vmul.f32 %v1062_v11, %v223_v59  ;;  %v280_v10 = vadd.f32 %v1074_v15, %v243_v58  ;;  %v213_v36 = vld [vmem:[%s1030_s21 + $0x60] sm:$0xff]  ;;  %v214_v50 = vld [vmem:[%s1030_s21 + $0x68] sm:$0xff]  ;;  %v215_v52 = vld [vmem:[%s1030_s21 + $0x70] sm:$0xff] }
  0x24   : > { %v310_v13 = vmax.f32 %v278_v61, 0.0  ;;  %v311_v14 = vmax.f32 %v279_v62, 0.0  ;;  %v281_v16 = vadd.f32 %v1074_v15, %v244_v63  ;;  %v246_v18 = vmul.f32 %v1062_v11, %v209_v5  ;;  %v230_v59 = vld [vmem:[%s1030_s21 + $0xe8] sm:$0xff]  ;;  %v231_v61 = vld [vmem:[%s1030_s21 + $0xf0] sm:$0xff] }
  0x25   : > { %943 = vmatpush3.bf16.msra.mxu0 %v940_v17  ;;  %971 = vmatpush3.bf16.msra.mxu1 %v940_v17  ;;  %v245_v17 = vmul.f32 %v1062_v11, %v208_v1  ;;  %v296_v22 = vadd.f32 %v1074_v15, %v259_v4  ;;  %v261_v23 = vmul.f32 %v1062_v11, %v224_v9  ;;  %v327_v24 = vmax.f32 %v295_v7, 0.0 }
  0x26   : > { %945 = vmatprep.subr.bf16.mxu0 %v944_v21  ;;  %964 = vmatprep.subr.bf16.mxu1 %v944_v21  ;;  %v262_v26 = vmul.f32 %v1062_v11, %v225_v12  ;;  %v312_v28 = vmax.f32 %v280_v10, 0.0  ;;  %v313_v30 = vmax.f32 %v281_v16, 0.0  ;;  %v247_v32 = vmul.f32 %v1062_v11, %v210_v19  ;;  %v232_v10 = vld [vmem:[%s1030_s21 + $0xf8] sm:$0xff] }
  0x27   : > { %v248_v33 = vmul.f32 %v1062_v11, %v211_v20  ;;  %v283_v35 = vadd.f32 %v1074_v15, %v246_v18  ;;  %v328_v37 = vmax.f32 %v296_v22, 0.0  ;;  %v298_v38 = vadd.f32 %v1074_v15, %v261_v23 }
  0x28   : > { %v263_v39 = vmul.f32 %v1062_v11, %v226_v27  ;;  %v299_v41 = vadd.f32 %v1074_v15, %v262_v26  ;;  %v264_v42 = vmul.f32 %v1062_v11, %v227_v29  ;;  %v249_v44 = vmul.f32 %v1062_v11, %v212_v34 }
  0x29   : > { %947 = vmatpush3.bf16.msra.mxu0 %v944_v21  ;;  %972 = vmatpush3.bf16.msra.mxu1 %v944_v21  ;;  %v326_v21 = vmax.f32 %v294_v3, 0.0  ;;  %v284_v47 = vadd.f32 %v1074_v15, %v247_v32  ;;  %v285_v48 = vadd.f32 %v1074_v15, %v248_v33  ;;  %v250_v49 = vmul.f32 %v1062_v11, %v213_v36  ;;  %v216_v3 = vld [vmem:[%s1030_s21 + $0x78] sm:$0xff] }
  0x2a   : > { %949 = vmatprep.subr.bf16.mxu0 %v948_v25  ;;  %965 = vmatprep.subr.bf16.mxu1 %v948_v25  ;;  %v315_v51 = vmax.f32 %v283_v35, 0.0  ;;  %v330_v53 = vmax.f32 %v298_v38, 0.0  ;;  %v300_v54 = vadd.f32 %v1074_v15, %v263_v39  ;;  %v331_v56 = vmax.f32 %v299_v41, 0.0 }
  0x2b   : > { %v301_v57 = vadd.f32 %v1074_v15, %v264_v42  ;;  %v266_v58 = vmul.f32 %v1062_v11, %v229_v45  ;;  %v316_v62 = vmax.f32 %v284_v47, 0.0  ;;  %v286_v63 = vadd.f32 %v1074_v15, %v249_v44 }
  0x2c   : > { %v252_v1 = vmul.f32 %v1062_v11, %v215_v52  ;;  %v332_v4 = vmax.f32 %v300_v54, 0.0  ;;  %v268_v9 = vmul.f32 %v1062_v11, %v231_v61  ;;  %v253_v16 = vmul.f32 %v1062_v11, %v216_v3 }
  0x2d   : > { %951 = vmatpush3.bf16.msra.mxu0 %v948_v25  ;;  %973 = vmatpush3.bf16.msra.mxu1 %v948_v25  ;;  %v297_v25 = vadd.f32 %v1074_v15, %v260_v8  ;;  %v333_v7 = vmax.f32 %v301_v57, 0.0  ;;  %v303_v8 = vadd.f32 %v1074_v15, %v266_v58  ;;  %v318_v12 = vmax.f32 %v286_v63, 0.0 }
  0x2e   : > { %953 = vmatprep.subr.bf16.mxu0 %v952_v31  ;;  %966 = vmatprep.subr.bf16.mxu1 %v952_v31  ;;  %v269_v20 = vmul.f32 %v1062_v11, %v232_v10  ;;  %v305_v22 = vadd.f32 %v1074_v15, %v268_v9 }
  0x2f   : > { %v329_v40 = vmax.f32 %v297_v25, 0.0 }
  0x30   : > { %v306_v27 = vadd.f32 %v1074_v15, %v269_v20 }
  0x31   : > { %955 = vmatpush3.bf16.msra.mxu0 %v952_v31  ;;  %974 = vmatpush3.bf16.msra.mxu1 %v952_v31  ;;  %v282_v31 = vadd.f32 %v1074_v15, %v245_v17  ;;  %v289_v17 = vadd.f32 %v1074_v15, %v252_v1 }
  0x32   : > { %957 = vmatprep.subr.bf16.mxu0 %v956_v43  ;;  %967 = vmatprep.subr.bf16.mxu1 %v956_v43  ;;  %v338_v29 = vmax.f32 %v306_v27, 0.0 }
  0x33   : > { %v314_v46 = vmax.f32 %v282_v31, 0.0  ;;  %v321_v25 = vmax.f32 %v289_v17, 0.0 }
  0x35   : > { %959 = vmatpush3.bf16.msra.mxu0 %v956_v43  ;;  %975 = vmatpush3.bf16.msra.mxu1 %v956_v43  ;;  %v228_v43 = vld [vmem:[%s1030_s21 + $0xd8] sm:$0xff] }
  0x36   : > { %v265_v55 = vmul.f32 %v1062_v11, %v228_v43 }
  0x38   : > { %881 = vmatmul.mubr.f32.vlgmr.msra.gmra.mrb[0].mxu0 %v308_v60  ;;  %905 = vmatmul.mubr.f32.vlgmr.msra.gmra.mrb[0].mxu1 %v324_v2  ;;  %v251_v60 = vmul.f32 %v1062_v11, %v214_v50  ;;  %v317_v2 = vmax.f32 %v285_v48, 0.0  ;;  %v302_v5 = vadd.f32 %v1074_v15, %v265_v55 }
  0x39   : > { %883 = vmatprep.mubr.f32.mxu0 %v309_v0  ;;  %907 = vmatprep.mubr.f32.mxu1 %v325_v6  ;;  %v287_v0 = vadd.f32 %v1074_v15, %v250_v49  ;;  %v267_v6 = vmul.f32 %v1062_v11, %v230_v59 }
  0x3a   : > { %v334_v18 = vmax.f32 %v302_v5, 0.0 }
  0x3b   : > { %v304_v19 = vadd.f32 %v1074_v15, %v267_v6 }
  0x3c   : > { %884 = vmatmul.mubr.f32.gmra.mrb[2].mxu0 %v310_v13  ;;  %908 = vmatmul.mubr.f32.gmra.mrb[2].mxu1 %v326_v21  ;;  %v319_v13 = vmax.f32 %v287_v0, 0.0  ;;  %v335_v21 = vmax.f32 %v303_v8, 0.0 }
  0x3d   : > { %886 = vmatprep.mubr.f32.mxu0 %v311_v14  ;;  %910 = vmatprep.mubr.f32.mxu1 %v327_v24  ;;  %v288_v14 = vadd.f32 %v1074_v15, %v251_v60  ;;  %v290_v24 = vadd.f32 %v1074_v15, %v253_v16  ;;  %v336_v26 = vmax.f32 %v304_v19, 0.0 }
  0x3f   : > { %v320_v23 = vmax.f32 %v288_v14, 0.0  ;;  %v322_v11 = vmax.f32 %v290_v24, 0.0 }
  0x40   : > { %887 = vmatmul.mubr.f32.gmra.mrb[4].mxu0 %v312_v28  ;;  %911 = vmatmul.mubr.f32.gmra.mrb[4].mxu1 %v328_v37  ;;  %v337_v28 = vmax.f32 %v305_v22, 0.0 }
  0x41   : > { %889 = vmatprep.mubr.f32.mxu0 %v313_v30  ;;  %913 = vmatprep.mubr.f32.mxu1 %v329_v40 }
  0x44   : > { %890 = vmatmul.mubr.f32.gmra.mrb[6].mxu0 %v314_v46  ;;  %914 = vmatmul.mubr.f32.gmra.mrb[6].mxu1 %v330_v53 }
  0x45   : > { %892 = vmatprep.mubr.f32.mxu0 %v315_v51  ;;  %916 = vmatprep.mubr.f32.mxu1 %v331_v56 }
  0x48   : > { %893 = vmatmul.mubr.f32.gmra.mrb[8].mxu0 %v316_v62  ;;  %917 = vmatmul.mubr.f32.gmra.mrb[8].mxu1 %v332_v4 }
  0x49   : > { %895 = vmatprep.mubr.f32.mxu0 %v317_v2  ;;  %919 = vmatprep.mubr.f32.mxu1 %v333_v7 }
  0x4c   : > { %896 = vmatmul.mubr.f32.gmra.mrb[10].mxu0 %v318_v12  ;;  %920 = vmatmul.mubr.f32.gmra.mrb[10].mxu1 %v334_v18 }
  0x4d   : > { %898 = vmatprep.mubr.f32.mxu0 %v319_v13  ;;  %922 = vmatprep.mubr.f32.mxu1 %v335_v21 }
  0x50   : > { %899 = vmatmul.mubr.f32.gmra.mrb[12].mxu0 %v320_v23  ;;  %923 = vmatmul.mubr.f32.gmra.mrb[12].mxu1 %v336_v26 }
  0x51   : > { %901 = vmatprep.mubr.f32.mxu0 %v321_v25  ;;  %925 = vmatprep.mubr.f32.mxu1 %v337_v28 }
  0x54   : > { %902 = vmatmul.mubr.f32.gmra.mrb[14].mxu0 %v322_v11  ;;  %926 = vmatmul.mubr.f32.gmra.mrb[14].mxu1 %v338_v29 }
 0x10b   : > { %v882_v30 = vpop.f32.mrb[0].mxu0  ;;  %v1195_v15 = vpop.f32.mrb[0].mxu1 }
 0x10c   : > { %581 = vst [vmem:[%s1035_s24 + $0x8] sm:$0xff] %v882_v30  ;;  %v651_v31 = vmul.f32 %v882_v30, %v882_v30  ;;  %v421_v32 = vpop.f32.mrb[1].mxu0  ;;  %597 = vst [vmem:[%s1035_s24 + $0x88] sm:$0xff] %v1195_v15  ;;  %v1200_v35 = vpop.f32.mrb[1].mxu1 }
 0x10d   : > { %580 = vst [vmem:[%s1035_s24] sm:$0xff] %v421_v32  ;;  %v613_v33 = vadd.f32 %v882_v30, %v421_v32  ;;  %v650_v34 = vmul.f32 %v421_v32, %v421_v32  ;;  %596 = vst [vmem:[%s1035_s24 + $0x80] sm:$0xff] %v1200_v35 }
 0x10f   : > { %v682_v36 = vadd.f32 %v651_v31, %v650_v34  ;;  %v885_v37 = vpop.f32.mrb[2].mxu0  ;;  %v1205_v39 = vpop.f32.mrb[2].mxu1 }
 0x110   : > { %583 = vst [vmem:[%s1035_s24 + $0x18] sm:$0xff] %v885_v37  ;;  %v431_v38 = vpop.f32.mrb[3].mxu0  ;;  %599 = vst [vmem:[%s1035_s24 + $0x98] sm:$0xff] %v1205_v39  ;;  %v1210_v42 = vpop.f32.mrb[3].mxu1  ;;  %v653_v43 = vmul.f32 %v885_v37, %v885_v37 }
 0x111   : > { %582 = vst [vmem:[%s1035_s24 + $0x10] sm:$0xff] %v431_v38  ;;  %v614_v40 = vadd.f32 %v613_v33, %v431_v38  ;;  %v652_v41 = vmul.f32 %v431_v38, %v431_v38  ;;  %598 = vst [vmem:[%s1035_s24 + $0x90] sm:$0xff] %v1210_v42 }
 0x113   : > { %v683_v44 = vadd.f32 %v682_v36, %v652_v41  ;;  %v888_v45 = vpop.f32.mrb[4].mxu0  ;;  %v615_v46 = vadd.f32 %v885_v37, %v614_v40  ;;  %v1215_v48 = vpop.f32.mrb[4].mxu1 }
 0x114   : > { %585 = vst [vmem:[%s1035_s24 + $0x28] sm:$0xff] %v888_v45  ;;  %v441_v47 = vpop.f32.mrb[5].mxu0  ;;  %601 = vst [vmem:[%s1035_s24 + $0xa8] sm:$0xff] %v1215_v48  ;;  %v1220_v52 = vpop.f32.mrb[5].mxu1  ;;  %v655_v53 = vmul.f32 %v888_v45, %v888_v45 }
 0x115   : > { %584 = vst [vmem:[%s1035_s24 + $0x20] sm:$0xff] %v441_v47  ;;  %v616_v49 = vadd.f32 %v615_v46, %v441_v47  ;;  %v654_v50 = vmul.f32 %v441_v47, %v441_v47  ;;  %v684_v51 = vadd.f32 %v683_v44, %v653_v43  ;;  %600 = vst [vmem:[%s1035_s24 + $0xa0] sm:$0xff] %v1220_v52 }
 0x116   : > { %v666_v46 = vmul.f32 %v1200_v35, %v1200_v35 }
 0x117   : > { %v685_v54 = vadd.f32 %v684_v51, %v654_v50  ;;  %v891_v55 = vpop.f32.mrb[6].mxu0  ;;  %v617_v56 = vadd.f32 %v888_v45, %v616_v49  ;;  %v1225_v58 = vpop.f32.mrb[6].mxu1  ;;  %v667_v50 = vmul.f32 %v1195_v15, %v1195_v15 }
 0x118   : > { %587 = vst [vmem:[%s1035_s24 + $0x38] sm:$0xff] %v891_v55  ;;  %v451_v57 = vpop.f32.mrb[7].mxu0  ;;  %603 = vst [vmem:[%s1035_s24 + $0xb8] sm:$0xff] %v1225_v58  ;;  %v1230_v62 = vpop.f32.mrb[7].mxu1  ;;  %v657_v63 = vmul.f32 %v891_v55, %v891_v55 }
 0x119   : > { %586 = vst [vmem:[%s1035_s24 + $0x30] sm:$0xff] %v451_v57  ;;  %v618_v59 = vadd.f32 %v617_v56, %v451_v57  ;;  %v656_v60 = vmul.f32 %v451_v57, %v451_v57  ;;  %v686_v61 = vadd.f32 %v685_v54, %v655_v53  ;;  %602 = vst [vmem:[%s1035_s24 + $0xb0] sm:$0xff] %v1230_v62 }
 0x11a   : > { %v668_v54 = vmul.f32 %v1210_v42, %v1210_v42  ;;  %v669_v57 = vmul.f32 %v1205_v39, %v1205_v39 }
 0x11b   : > { %v687_v0 = vadd.f32 %v686_v61, %v656_v60  ;;  %v894_v1 = vpop.f32.mrb[8].mxu0  ;;  %v619_v2 = vadd.f32 %v891_v55, %v618_v59  ;;  %v1235_v4 = vpop.f32.mrb[8].mxu1 }
 0x11c   : > { %589 = vst [vmem:[%s1035_s24 + $0x48] sm:$0xff] %v894_v1  ;;  %v461_v3 = vpop.f32.mrb[9].mxu0  ;;  %605 = vst [vmem:[%s1035_s24 + $0xc8] sm:$0xff] %v1235_v4  ;;  %v1240_v8 = vpop.f32.mrb[9].mxu1  ;;  %v659_v9 = vmul.f32 %v894_v1, %v894_v1 }
 0x11d   : > { %588 = vst [vmem:[%s1035_s24 + $0x40] sm:$0xff] %v461_v3  ;;  %v620_v5 = vadd.f32 %v619_v2, %v461_v3  ;;  %v658_v6 = vmul.f32 %v461_v3, %v461_v3  ;;  %v688_v7 = vadd.f32 %v687_v0, %v657_v63  ;;  %604 = vst [vmem:[%s1035_s24 + $0xc0] sm:$0xff] %v1240_v8 }
 0x11f   : > { %v689_v10 = vadd.f32 %v688_v7, %v658_v6  ;;  %v897_v12 = vpop.f32.mrb[10].mxu0  ;;  %v621_v13 = vadd.f32 %v894_v1, %v620_v5  ;;  %v1245_v16 = vpop.f32.mrb[10].mxu1 }
 0x120   : > { %591 = vst [vmem:[%s1035_s24 + $0x58] sm:$0xff] %v897_v12  ;;  %v471_v14 = vpop.f32.mrb[11].mxu0  ;;  %607 = vst [vmem:[%s1035_s24 + $0xd8] sm:$0xff] %v1245_v16  ;;  %v1250_v20 = vpop.f32.mrb[11].mxu1  ;;  %v661_v21 = vmul.f32 %v897_v12, %v897_v12 }
 0x121   : > { %590 = vst [vmem:[%s1035_s24 + $0x50] sm:$0xff] %v471_v14  ;;  %v622_v17 = vadd.f32 %v621_v13, %v471_v14  ;;  %v660_v18 = vmul.f32 %v471_v14, %v471_v14  ;;  %v690_v19 = vadd.f32 %v689_v10, %v659_v9  ;;  %606 = vst [vmem:[%s1035_s24 + $0xd0] sm:$0xff] %v1250_v20 }
 0x123   : > { %v691_v22 = vadd.f32 %v690_v19, %v660_v18  ;;  %v900_v23 = vpop.f32.mrb[12].mxu0  ;;  %v623_v24 = vadd.f32 %v897_v12, %v622_v17  ;;  %v1255_v26 = vpop.f32.mrb[12].mxu1 }
 0x124   : > { %593 = vst [vmem:[%s1035_s24 + $0x68] sm:$0xff] %v900_v23  ;;  %v481_v25 = vpop.f32.mrb[13].mxu0  ;;  %609 = vst [vmem:[%s1035_s24 + $0xe8] sm:$0xff] %v1255_v26  ;;  %v561_v29 = vpop.f32.mrb[13].mxu1  ;;  %v663_v30 = vmul.f32 %v900_v23, %v900_v23 }
 0x125   : > { %592 = vst [vmem:[%s1035_s24 + $0x60] sm:$0xff] %v481_v25  ;;  %v624_v27 = vadd.f32 %v623_v24, %v481_v25  ;;  %v662_v28 = vmul.f32 %v481_v25, %v481_v25  ;;  %v692_v11 = vadd.f32 %v691_v22, %v661_v21  ;;  %608 = vst [vmem:[%s1035_s24 + $0xe0] sm:$0xff] %v561_v29 }
 0x126   : > { %v679_v22 = vmul.f32 %v1255_v26, %v1255_v26 }
 0x127   : > { %v693_v31 = vadd.f32 %v692_v11, %v662_v28  ;;  %v903_v32 = vpop.f32.mrb[14].mxu0  ;;  %v625_v33 = vadd.f32 %v900_v23, %v624_v27  ;;  %v927_v36 = vpop.f32.mrb[14].mxu1 }
 0x128   : > { %595 = vst [vmem:[%s1035_s24 + $0x78] sm:$0xff] %v903_v32  ;;  %v491_v34 = vpop.f32.mrb[15].mxu0  ;;  %611 = vst [vmem:[%s1035_s24 + $0xf8] sm:$0xff] %v927_v36  ;;  %v571_v41 = vpop.f32.mrb[15].mxu1  ;;  %v665_v43 = vmul.f32 %v903_v32, %v903_v32 }
 0x129   : > { %594 = vst [vmem:[%s1035_s24 + $0x70] sm:$0xff] %v491_v34  ;;  %v626_v37 = vadd.f32 %v625_v33, %v491_v34  ;;  %v664_v38 = vmul.f32 %v491_v34, %v491_v34  ;;  %v694_v40 = vadd.f32 %v693_v31, %v663_v30  ;;  %610 = vst [vmem:[%s1035_s24 + $0xf0] sm:$0xff] %v571_v41 }
 0x12a   : > { %v680_v24 = vmul.f32 %v571_v41, %v571_v41 }
 0x12b   : > { %v627_v44 = vadd.f32 %v903_v32, %v626_v37  ;;  %v695_v45 = vadd.f32 %v694_v40, %v664_v38 }
 0x12d   : > { %v696_v47 = vadd.f32 %v695_v45, %v665_v43  ;;  %v628_v49 = vadd.f32 %v627_v44, %v1200_v35  ;;  %v670_v35 = vmul.f32 %v1220_v52, %v1220_v52 }
 0x12f   : > { %v697_v51 = vadd.f32 %v696_v47, %v666_v46  ;;  %v629_v53 = vadd.f32 %v1195_v15, %v628_v49  ;;  %v671_v15 = vmul.f32 %v1215_v48, %v1215_v48 }
 0x131   : > { %v630_v55 = vadd.f32 %v629_v53, %v1210_v42  ;;  %v698_v56 = vadd.f32 %v697_v51, %v667_v50  ;;  %v672_v42 = vmul.f32 %v1230_v62, %v1230_v62 }
 0x133   : > { %v699_v59 = vadd.f32 %v698_v56, %v668_v54  ;;  %v631_v60 = vadd.f32 %v1205_v39, %v630_v55  ;;  %v673_v39 = vmul.f32 %v1225_v58, %v1225_v58 }
 0x135   : > { %v632_v61 = vadd.f32 %v631_v60, %v1220_v52  ;;  %v700_v63 = vadd.f32 %v699_v59, %v669_v57  ;;  %v674_v52 = vmul.f32 %v1240_v8, %v1240_v8 }
 0x137   : > { %v701_v0 = vadd.f32 %v700_v63, %v670_v35  ;;  %v633_v1 = vadd.f32 %v1215_v48, %v632_v61  ;;  %v675_v48 = vmul.f32 %v1235_v4, %v1235_v4 }
 0x139   : > { %v634_v2 = vadd.f32 %v633_v1, %v1230_v62  ;;  %v702_v3 = vadd.f32 %v701_v0, %v671_v15  ;;  %v676_v62 = vmul.f32 %v1250_v20, %v1250_v20 }
 0x13b   : > { %v703_v5 = vadd.f32 %v702_v3, %v672_v42  ;;  %v635_v6 = vadd.f32 %v1225_v58, %v634_v2  ;;  %v677_v58 = vmul.f32 %v1245_v16, %v1245_v16 }
 0x13d   : > { %v636_v7 = vadd.f32 %v635_v6, %v1240_v8  ;;  %v704_v9 = vadd.f32 %v703_v5, %v673_v39  ;;  %v678_v8 = vmul.f32 %v561_v29, %v561_v29 }
 0x13f   : > { %v705_v10 = vadd.f32 %v704_v9, %v674_v52  ;;  %v637_v12 = vadd.f32 %v1235_v4, %v636_v7 }
 0x141   : > { %v638_v13 = vadd.f32 %v637_v12, %v1250_v20  ;;  %v706_v14 = vadd.f32 %v705_v10, %v675_v48  ;;  %v681_v20 = vmul.f32 %v927_v36, %v927_v36 }
 0x143   : > { %v707_v17 = vadd.f32 %v706_v14, %v676_v62  ;;  %v639_v18 = vadd.f32 %v1245_v16, %v638_v13 }
 0x145   : > { %v640_v19 = vadd.f32 %v639_v18, %v561_v29  ;;  %v708_v21 = vadd.f32 %v707_v17, %v677_v58 }
 0x147   : > { %v709_v23 = vadd.f32 %v708_v21, %v678_v8  ;;  %v641_v4 = vadd.f32 %v1255_v26, %v640_v19  ;;  %v612_v26 = vld [vmem:[%s1317_s4] sm:$0x3] }
 0x149   : > { %v642_v25 = vadd.f32 %v641_v4, %v571_v41  ;;  %v710_v27 = vadd.f32 %v709_v23, %v679_v22 }
 0x14b   : > { %v643_v28 = vadd.f32 %v927_v36, %v642_v25  ;;  %v711_v11 = vadd.f32 %v710_v27, %v680_v24 }
 0x14d   : > { %v644_v30 = vrot.slane %v643_v28, 4  ;;  %v712_v31 = vadd.f32 %v711_v11, %v681_v20 }
 0x14f   : > { %v645_v32 = vadd.f32 %v644_v30, %v643_v28  ;;  %v713_v33 = vrot.slane %v712_v31, 4 }
 0x151   : > { %v646_v16 = vrot.slane %v645_v32, 2  ;;  %v714_v34 = vadd.f32 %v713_v33, %v712_v31 }
 0x153   : > { %v647_v29 = vadd.f32 %v646_v16, %v645_v32  ;;  %v715_v37 = vrot.slane %v714_v34, 2 }
 0x155   : > { %v648_v38 = vrot.slane %v647_v29, 1  ;;  %v716_v40 = vadd.f32 %v715_v37, %v714_v34 }
 0x157   : > { %v717_v43 = vrot.slane %v716_v40, 1  ;;  %v649_v41 = vadd.f32 %v648_v38, %v647_v29 }
 0x159   : > { %v718_v44 = vadd.f32 %v717_v43, %v716_v40 }
 0x15b   : > { %v720_v36 = vsel %vm719_vm0, %v649_v41, %v718_v44 }
 0x15c   : > { %v721_v45 = vadd.f32 %v720_v36, %v612_v26 }
 0x15e   : > { %722 = vst [vmem:[%s1317_s4] sm:$0x3] %v721_v45 }
 0x15f PF: > { %s15_s15 = sadd.s32 1, %s991_s15  }
 0x160   : > { %p12_p5 = scmp.ge.s32.totalorder %s15_s15, 4  }
 0x162   :  { %14 = sbr.rel (!%p12_p5) target bundleno = 1 (0x1), region = 74 }

// kernel: bottleneck_forward.4
= control target key start
LH: loop header
LB: loop body
LE: loop exit
PB: predicated region body
PF: predicated region fallthrough
CT: control target
= control target key end

     0   :  { %s1554_s21 = smov 0   ;;  %s1790_s0 = inlined_call_operand.vmem [shape: f32[2,256,128], index: 0, kind: input, shape index: {}]   ;;  %s1791_s1 = inlined_call_operand.vmem [shape: f32[128,128], index: 1, kind: input, shape index: {}]   ;;  %s1792_s2 = inlined_call_operand.vmem [shape: f32[128,128], index: 2, kind: input, shape index: {}]   ;;  %s1793_s3 = inlined_call_operand.vmem [shape: f32[2,256,128], index: 3, kind: output, shape index: {0}]   ;;  %s1794_s4 = inlined_call_operand.vmem [shape: f32[2,256,128], index: 4, kind: output, shape index: {1}]   ;;  %s1795_s5 = inlined_call_operand.vmem [shape: f32[2,128], index: 5, kind: output, shape index: {2}]   ;;  %s1796_s6 = inlined_call_operand.vmem [shape: f32[2,128], index: 6, kind: output, shape index: {3}]  }
   0x1 LB: > { %s1164_s22 = sadd.s32 4294967295, %s1516_s21   ;;  %p1168_p0 = scmp.ge.s32.totalorder %s1516_s21, 1  ;;  %s1516_s21 = sphi %s1554_s21, %s17_s21  }
   0x2   : > { %p209_p1 = scmp.lt.s32.totalorder %s1516_s21, 3 }
   0x4   : > { %p210_p2 = pnand %p1168_p0, %p209_p1 }
   0x5   : > { %p244_p3 = scmp.lt.s32.totalorder (!%p210_p2), %s1164_s22, 1  ;;  %p1175_p4 = scmp.ne.s32.totalorder (!%p210_p2), %s1164_s22, 0 }
   0x6   : > { %213 = sbr.rel (%p210_p2) target bundleno = 352 (0x160), region = 32 }
   0xd   : > { %s245_s23 = scalar_select %p244_p3, %s1164_s22, 1 }
   0xe   : > { %262 = sbr.rel (%p1175_p4) target bundleno = 21 (0x15), region = 36  ;;  %v1518_v0 = vmov (!%p1175_p4), 0.0  }
   0xf   : > { %s1178_s24 = sshll.u32 %s245_s23, 8  ;;  %263 = vst [vmem:[%s1795_s5] sm:$0x3] (!%p1175_p4), %v1518_v0  ;;  %264 = vst [vmem:[%s1796_s6] sm:$0x3] (!%p1175_p4), %v1518_v0 }
  0x10   : > { %s1565_s27 = scalar_lea.vmem %s1790_s0, %s1178_s24  ;;  %s1570_s30 = scalar_lea.vmem %s1793_s3, %s1178_s24 }
  0x11   : > { %s1575_s9 = scalar_lea.vmem %s1794_s4, %s1178_s24 }
  0x15 PF: > { %v297_v1 = vld [vmem:[%s1791_s1] sm:$0xff]  ;;  %v298_v2 = vld [vmem:[%s1791_s1 + $0x8] sm:$0xff]  ;;  %v299_v6 = vld [vmem:[%s1791_s1 + $0x10] sm:$0xff]  ;;  %vm950_vm0 = vcmask 1040384  }
  0x16   : > { %v538_v3 = vld [vmem:[%s1792_s2] sm:$0xff]  ;;  %v1437_v4 = vpack.c.bf16 %v298_v2, %v297_v1  ;;  %v539_v5 = vld [vmem:[%s1792_s2 + $0x8] sm:$0xff]  ;;  %v300_v7 = vld [vmem:[%s1791_s1 + $0x18] sm:$0xff] }
  0x17   : > { %v1469_v8 = vpack.c.bf16 %v539_v5, %v538_v3  ;;  %v1441_v9 = vpack.c.bf16 %v300_v7, %v299_v6  ;;  %v540_v10 = vld [vmem:[%s1792_s2 + $0x10] sm:$0xff]  ;;  %v541_v11 = vld [vmem:[%s1792_s2 + $0x18] sm:$0xff]  ;;  %v301_v12 = vld [vmem:[%s1791_s1 + $0x20] sm:$0xff] }
  0x18   : > { %1438 = vmatprep.subr.bf16.mxu0 %v1437_v4  ;;  %v1473_v13 = vpack.c.bf16 %v541_v11, %v540_v10  ;;  %v302_v14 = vld [vmem:[%s1791_s1 + $0x28] sm:$0xff]  ;;  %v542_v15 = vld [vmem:[%s1792_s2 + $0x20] sm:$0xff]  ;;  %v303_v19 = vld [vmem:[%s1791_s1 + $0x30] sm:$0xff] }
  0x19   : > { %v543_v16 = vld [vmem:[%s1792_s2 + $0x28] sm:$0xff]  ;;  %1470 = vmatprep.subr.bf16.mxu1 %v1469_v8  ;;  %1440 = vmatpush3.bf16.msra.mxu0 %v1437_v4  ;;  %v1445_v17 = vpack.c.bf16 %v302_v14, %v301_v12  ;;  %v304_v20 = vld [vmem:[%s1791_s1 + $0x38] sm:$0xff]  ;;  %v544_v21 = vld [vmem:[%s1792_s2 + $0x30] sm:$0xff] }
  0x1a   : > { %1472 = vmatpush3.bf16.msra.mxu1 %v1469_v8  ;;  %1442 = vmatprep.subr.bf16.mxu0 %v1441_v9  ;;  %v1477_v18 = vpack.c.bf16 %v543_v16, %v542_v15  ;;  %v545_v22 = vld [vmem:[%s1792_s2 + $0x38] sm:$0xff]  ;;  %v1449_v23 = vpack.c.bf16 %v304_v20, %v303_v19  ;;  %v305_v25 = vld [vmem:[%s1791_s1 + $0x40] sm:$0xff]  ;;  %v306_v26 = vld [vmem:[%s1791_s1 + $0x48] sm:$0xff] }
  0x1b   : > { %1474 = vmatprep.subr.bf16.mxu1 %v1473_v13  ;;  %v1481_v24 = vpack.c.bf16 %v545_v22, %v544_v21  ;;  %v265_v27 = vld [vmem:[%s1565_s27] sm:$0xff]  ;;  %v547_v29 = vld [vmem:[%s1792_s2 + $0x48] sm:$0xff]  ;;  %v1453_v30 = vpack.c.bf16 %v306_v26, %v305_v25  ;;  %v307_v32 = vld [vmem:[%s1791_s1 + $0x50] sm:$0xff] }
  0x1c   : > { %v546_v28 = vld [vmem:[%s1792_s2 + $0x40] sm:$0xff]  ;;  %1309 = vmatprep.mubr.f32.mxu0 %v265_v27  ;;  %1389 = vmatprep.mubr.f32.mxu1 %v265_v27  ;;  %v308_v33 = vld [vmem:[%s1791_s1 + $0x58] sm:$0xff]  ;;  %v548_v34 = vld [vmem:[%s1792_s2 + $0x50] sm:$0xff] }
  0x1d   : > { %1444 = vmatpush3.bf16.msra.mxu0 %v1441_v9  ;;  %v1485_v31 = vpack.c.bf16 %v547_v29, %v546_v28  ;;  %v549_v35 = vld [vmem:[%s1792_s2 + $0x58] sm:$0xff]  ;;  %v1457_v36 = vpack.c.bf16 %v308_v33, %v307_v32  ;;  %v309_v38 = vld [vmem:[%s1791_s1 + $0x60] sm:$0xff]  ;;  %v310_v39 = vld [vmem:[%s1791_s1 + $0x68] sm:$0xff] }
  0x1e   : > { %1476 = vmatpush3.bf16.msra.mxu1 %v1473_v13  ;;  %1446 = vmatprep.subr.bf16.mxu0 %v1445_v17  ;;  %v1489_v37 = vpack.c.bf16 %v549_v35, %v548_v34  ;;  %v550_v40 = vld [vmem:[%s1792_s2 + $0x60] sm:$0xff]  ;;  %v551_v41 = vld [vmem:[%s1792_s2 + $0x68] sm:$0xff]  ;;  %v1461_v42 = vpack.c.bf16 %v310_v39, %v309_v38  ;;  %v311_v44 = vld [vmem:[%s1791_s1 + $0x70] sm:$0xff] }
  0x1f   : > { %1478 = vmatprep.subr.bf16.mxu1 %v1477_v18  ;;  %v1493_v43 = vpack.c.bf16 %v551_v41, %v550_v40  ;;  %v312_v45 = vld [vmem:[%s1791_s1 + $0x78] sm:$0xff]  ;;  %v552_v46 = vld [vmem:[%s1792_s2 + $0x70] sm:$0xff]  ;;  %v266_v50 = vld [vmem:[%s1565_s27 + $0x8] sm:$0xff] }
  0x20   : > { %v553_v47 = vld [vmem:[%s1792_s2 + $0x78] sm:$0xff]  ;;  %v1465_v48 = vpack.c.bf16 %v312_v45, %v311_v44  ;;  %v267_v51 = vld [vmem:[%s1565_s27 + $0x10] sm:$0xff]  ;;  %v269_v53 = vld [vmem:[%s1565_s27 + $0x20] sm:$0xff] }
  0x21   : > { %1448 = vmatpush3.bf16.msra.mxu0 %v1445_v17  ;;  %v1497_v49 = vpack.c.bf16 %v553_v47, %v552_v46  ;;  %v268_v52 = vld [vmem:[%s1565_s27 + $0x18] sm:$0xff]  ;;  %v270_v54 = vld [vmem:[%s1565_s27 + $0x28] sm:$0xff]  ;;  %v271_v55 = vld [vmem:[%s1565_s27 + $0x30] sm:$0xff] }
  0x22   : > { %1480 = vmatpush3.bf16.msra.mxu1 %v1477_v18  ;;  %1450 = vmatprep.subr.bf16.mxu0 %v1449_v23  ;;  %v272_v56 = vld [vmem:[%s1565_s27 + $0x38] sm:$0xff]  ;;  %v273_v57 = vld [vmem:[%s1565_s27 + $0x40] sm:$0xff]  ;;  %v274_v58 = vld [vmem:[%s1565_s27 + $0x48] sm:$0xff] }
  0x23   : > { %1482 = vmatprep.subr.bf16.mxu1 %v1481_v24  ;;  %v275_v59 = vld [vmem:[%s1565_s27 + $0x50] sm:$0xff]  ;;  %v276_v60 = vld [vmem:[%s1565_s27 + $0x58] sm:$0xff]  ;;  %v277_v61 = vld [vmem:[%s1565_s27 + $0x60] sm:$0xff] }
  0x24   : > { %v278_v62 = vld [vmem:[%s1565_s27 + $0x68] sm:$0xff]  ;;  %v279_v63 = vld [vmem:[%s1565_s27 + $0x70] sm:$0xff]  ;;  %v280_v0 = vld [vmem:[%s1565_s27 + $0x78] sm:$0xff] }
  0x25   : > { %1452 = vmatpush3.bf16.msra.mxu0 %v1449_v23  ;;  %v281_v1 = vld [vmem:[%s1565_s27 + $0x80] sm:$0xff]  ;;  %v282_v2 = vld [vmem:[%s1565_s27 + $0x88] sm:$0xff]  ;;  %v283_v3 = vld [vmem:[%s1565_s27 + $0x90] sm:$0xff] }
  0x26   : > { %1484 = vmatpush3.bf16.msra.mxu1 %v1481_v24  ;;  %1454 = vmatprep.subr.bf16.mxu0 %v1453_v30  ;;  %v284_v4 = vld [vmem:[%s1565_s27 + $0x98] sm:$0xff]  ;;  %v285_v5 = vld [vmem:[%s1565_s27 + $0xa0] sm:$0xff]  ;;  %v286_v6 = vld [vmem:[%s1565_s27 + $0xa8] sm:$0xff] }
  0x27   : > { %1486 = vmatprep.subr.bf16.mxu1 %v1485_v31  ;;  %v287_v7 = vld [vmem:[%s1565_s27 + $0xb0] sm:$0xff]  ;;  %v288_v8 = vld [vmem:[%s1565_s27 + $0xb8] sm:$0xff]  ;;  %v289_v9 = vld [vmem:[%s1565_s27 + $0xc0] sm:$0xff] }
  0x28   : > { %v290_v10 = vld [vmem:[%s1565_s27 + $0xc8] sm:$0xff]  ;;  %v291_v11 = vld [vmem:[%s1565_s27 + $0xd0] sm:$0xff]  ;;  %v292_v12 = vld [vmem:[%s1565_s27 + $0xd8] sm:$0xff] }
  0x29   : > { %1456 = vmatpush3.bf16.msra.mxu0 %v1453_v30  ;;  %v293_v13 = vld [vmem:[%s1565_s27 + $0xe0] sm:$0xff]  ;;  %v294_v14 = vld [vmem:[%s1565_s27 + $0xe8] sm:$0xff]  ;;  %v295_v15 = vld [vmem:[%s1565_s27 + $0xf0] sm:$0xff] }
  0x2a   : > { %1488 = vmatpush3.bf16.msra.mxu1 %v1485_v31  ;;  %1458 = vmatprep.subr.bf16.mxu0 %v1457_v36  ;;  %v296_v16 = vld [vmem:[%s1565_s27 + $0xf8] sm:$0xff] }
  0x2b   : > { %1490 = vmatprep.subr.bf16.mxu1 %v1489_v37 }
  0x2d   : > { %1460 = vmatpush3.bf16.msra.mxu0 %v1457_v36 }
  0x2e   : > { %1492 = vmatpush3.bf16.msra.mxu1 %v1489_v37  ;;  %1462 = vmatprep.subr.bf16.mxu0 %v1461_v42 }
  0x2f   : > { %1494 = vmatprep.subr.bf16.mxu1 %v1493_v43 }
  0x31   : > { %1464 = vmatpush3.bf16.msra.mxu0 %v1461_v42 }
  0x32   : > { %1496 = vmatpush3.bf16.msra.mxu1 %v1493_v43  ;;  %1466 = vmatprep.subr.bf16.mxu0 %v1465_v48 }
  0x33   : > { %1498 = vmatprep.subr.bf16.mxu1 %v1497_v49 }
  0x35   : > { %1468 = vmatpush3.bf16.msra.mxu0 %v1465_v48 }
  0x36   : > { %1500 = vmatpush3.bf16.msra.mxu1 %v1497_v49 }
  0x38   : > { %1310 = vmatmul.mubr.f32.vlgmr.msra.gmra.mrb[0].mxu0 %v266_v50 }
  0x39   : > { %1390 = vmatmul.mubr.f32.vlgmr.msra.gmra.mrb[0].mxu1 %v266_v50  ;;  %1312 = vmatprep.mubr.f32.mxu0 %v267_v51 }
  0x3a   : > { %1392 = vmatprep.mubr.f32.mxu1 %v267_v51 }
  0x3c   : > { %1313 = vmatmul.mubr.f32.gmra.mrb[2].mxu0 %v268_v52 }
  0x3d   : > { %1393 = vmatmul.mubr.f32.gmra.mrb[2].mxu1 %v268_v52  ;;  %1315 = vmatprep.mubr.f32.mxu0 %v269_v53 }
  0x3e   : > { %1395 = vmatprep.mubr.f32.mxu1 %v269_v53 }
  0x40   : > { %1316 = vmatmul.mubr.f32.gmra.mrb[4].mxu0 %v270_v54 }
  0x41   : > { %1396 = vmatmul.mubr.f32.gmra.mrb[4].mxu1 %v270_v54  ;;  %1318 = vmatprep.mubr.f32.mxu0 %v271_v55 }
  0x42   : > { %1398 = vmatprep.mubr.f32.mxu1 %v271_v55 }
  0x44   : > { %1319 = vmatmul.mubr.f32.gmra.mrb[6].mxu0 %v272_v56 }
  0x45   : > { %1399 = vmatmul.mubr.f32.gmra.mrb[6].mxu1 %v272_v56  ;;  %1321 = vmatprep.mubr.f32.mxu0 %v273_v57 }
  0x46   : > { %1401 = vmatprep.mubr.f32.mxu1 %v273_v57 }
  0x48   : > { %1322 = vmatmul.mubr.f32.gmra.mrb[8].mxu0 %v274_v58 }
  0x49   : > { %1402 = vmatmul.mubr.f32.gmra.mrb[8].mxu1 %v274_v58  ;;  %1324 = vmatprep.mubr.f32.mxu0 %v275_v59 }
  0x4a   : > { %1404 = vmatprep.mubr.f32.mxu1 %v275_v59 }
  0x4c   : > { %1325 = vmatmul.mubr.f32.gmra.mrb[10].mxu0 %v276_v60 }
  0x4d   : > { %1405 = vmatmul.mubr.f32.gmra.mrb[10].mxu1 %v276_v60  ;;  %1327 = vmatprep.mubr.f32.mxu0 %v277_v61 }
  0x4e   : > { %1407 = vmatprep.mubr.f32.mxu1 %v277_v61 }
  0x50   : > { %1328 = vmatmul.mubr.f32.gmra.mrb[12].mxu0 %v278_v62 }
  0x51   : > { %1408 = vmatmul.mubr.f32.gmra.mrb[12].mxu1 %v278_v62  ;;  %1330 = vmatprep.mubr.f32.mxu0 %v279_v63 }
  0x52   : > { %1410 = vmatprep.mubr.f32.mxu1 %v279_v63 }
  0x54   : > { %1331 = vmatmul.mubr.f32.gmra.mrb[14].mxu0 %v280_v0 }
  0x55   : > { %1411 = vmatmul.mubr.f32.gmra.mrb[14].mxu1 %v280_v0  ;;  %1333 = vmatprep.mubr.f32.mxu0 %v281_v1 }
  0x56   : > { %1413 = vmatprep.mubr.f32.mxu1 %v281_v1 }
  0x58   : > { %1334 = vmatmul.mubr.f32.gmra.mrb[16].mxu0 %v282_v2 }
  0x59   : > { %1414 = vmatmul.mubr.f32.gmra.mrb[16].mxu1 %v282_v2  ;;  %1336 = vmatprep.mubr.f32.mxu0 %v283_v3 }
  0x5a   : > { %1416 = vmatprep.mubr.f32.mxu1 %v283_v3 }
  0x5c   : > { %1337 = vmatmul.mubr.f32.gmra.mrb[18].mxu0 %v284_v4 }
  0x5d   : > { %1417 = vmatmul.mubr.f32.gmra.mrb[18].mxu1 %v284_v4  ;;  %1339 = vmatprep.mubr.f32.mxu0 %v285_v5 }
  0x5e   : > { %1419 = vmatprep.mubr.f32.mxu1 %v285_v5 }
  0x60   : > { %1340 = vmatmul.mubr.f32.gmra.mrb[20].mxu0 %v286_v6 }
  0x61   : > { %1420 = vmatmul.mubr.f32.gmra.mrb[20].mxu1 %v286_v6  ;;  %1342 = vmatprep.mubr.f32.mxu0 %v287_v7 }
  0x62   : > { %1422 = vmatprep.mubr.f32.mxu1 %v287_v7 }
  0x64   : > { %1343 = vmatmul.mubr.f32.gmra.mrb[22].mxu0 %v288_v8 }
  0x65   : > { %1423 = vmatmul.mubr.f32.gmra.mrb[22].mxu1 %v288_v8  ;;  %1345 = vmatprep.mubr.f32.mxu0 %v289_v9 }
  0x66   : > { %1425 = vmatprep.mubr.f32.mxu1 %v289_v9 }
  0x68   : > { %1346 = vmatmul.mubr.f32.gmra.mrb[24].mxu0 %v290_v10 }
  0x69   : > { %1426 = vmatmul.mubr.f32.gmra.mrb[24].mxu1 %v290_v10  ;;  %1348 = vmatprep.mubr.f32.mxu0 %v291_v11 }
  0x6a   : > { %1428 = vmatprep.mubr.f32.mxu1 %v291_v11 }
  0x6c   : > { %1349 = vmatmul.mubr.f32.gmra.mrb[26].mxu0 %v292_v12 }
  0x6d   : > { %1429 = vmatmul.mubr.f32.gmra.mrb[26].mxu1 %v292_v12  ;;  %1351 = vmatprep.mubr.f32.mxu0 %v293_v13 }
  0x6e   : > { %1431 = vmatprep.mubr.f32.mxu1 %v293_v13 }
  0x70   : > { %1352 = vmatmul.mubr.f32.gmra.mrb[28].mxu0 %v294_v14 }
  0x71   : > { %1432 = vmatmul.mubr.f32.gmra.mrb[28].mxu1 %v294_v14  ;;  %1354 = vmatprep.mubr.f32.mxu0 %v295_v15 }
  0x72   : > { %1434 = vmatprep.mubr.f32.mxu1 %v295_v15 }
  0x74   : > { %1355 = vmatmul.mubr.f32.gmra.mrb[30].mxu0 %v296_v16 }
  0x75   : > { %1435 = vmatmul.mubr.f32.gmra.mrb[30].mxu1 %v296_v16 }
 0x10b   : > { %v1311_v17 = vpop.f32.mrb[0].mxu0 }
 0x10c   : > { %780 = vst [vmem:[%s1570_s30 + $0x8] sm:$0xff] %v1311_v17  ;;  %v882_v18 = vmul.f32 %v1311_v17, %v1311_v17  ;;  %v1391_v19 = vpop.f32.mrb[0].mxu1  ;;  %v379_v20 = vpop.f32.mrb[1].mxu0 }
 0x10d   : > { %812 = vst [vmem:[%s1575_s9 + $0x8] sm:$0xff] %v1391_v19  ;;  %v993_v21 = vmul.f32 %v1391_v19, %v1391_v19  ;;  %779 = vst [vmem:[%s1570_s30] sm:$0xff] %v379_v20  ;;  %v844_v22 = vadd.f32 %v1311_v17, %v379_v20  ;;  %v881_v23 = vmul.f32 %v379_v20, %v379_v20  ;;  %v620_v24 = vpop.f32.mrb[1].mxu1 }
 0x10e   : > { %811 = vst [vmem:[%s1575_s9] sm:$0xff] %v620_v24  ;;  %v955_v25 = vadd.f32 %v1391_v19, %v620_v24  ;;  %v992_v26 = vmul.f32 %v620_v24, %v620_v24 }
 0x10f   : > { %v913_v27 = vadd.f32 %v882_v18, %v881_v23  ;;  %v1314_v28 = vpop.f32.mrb[2].mxu0 }
 0x110   : > { %v1024_v29 = vadd.f32 %v993_v21, %v992_v26  ;;  %782 = vst [vmem:[%s1570_s30 + $0x18] sm:$0xff] %v1314_v28  ;;  %v1394_v30 = vpop.f32.mrb[2].mxu1  ;;  %v389_v31 = vpop.f32.mrb[3].mxu0  ;;  %v884_v37 = vmul.f32 %v1314_v28, %v1314_v28 }
 0x111   : > { %814 = vst [vmem:[%s1575_s9 + $0x18] sm:$0xff] %v1394_v30  ;;  %781 = vst [vmem:[%s1570_s30 + $0x10] sm:$0xff] %v389_v31  ;;  %v845_v32 = vadd.f32 %v844_v22, %v389_v31  ;;  %v883_v33 = vmul.f32 %v389_v31, %v389_v31  ;;  %v630_v34 = vpop.f32.mrb[3].mxu1  ;;  %v995_v41 = vmul.f32 %v1394_v30, %v1394_v30 }
 0x112   : > { %813 = vst [vmem:[%s1575_s9 + $0x10] sm:$0xff] %v630_v34  ;;  %v956_v35 = vadd.f32 %v955_v25, %v630_v34  ;;  %v994_v36 = vmul.f32 %v630_v34, %v630_v34 }
 0x113   : > { %v914_v38 = vadd.f32 %v913_v27, %v883_v33  ;;  %v1317_v39 = vpop.f32.mrb[4].mxu0  ;;  %v846_v40 = vadd.f32 %v1314_v28, %v845_v32 }
 0x114   : > { %v1025_v42 = vadd.f32 %v1024_v29, %v994_v36  ;;  %784 = vst [vmem:[%s1570_s30 + $0x28] sm:$0xff] %v1317_v39  ;;  %v1397_v43 = vpop.f32.mrb[4].mxu1  ;;  %v399_v44 = vpop.f32.mrb[5].mxu0  ;;  %v957_v45 = vadd.f32 %v1394_v30, %v956_v35  ;;  %v886_v53 = vmul.f32 %v1317_v39, %v1317_v39 }
 0x115   : > { %816 = vst [vmem:[%s1575_s9 + $0x28] sm:$0xff] %v1397_v43  ;;  %783 = vst [vmem:[%s1570_s30 + $0x20] sm:$0xff] %v399_v44  ;;  %v847_v46 = vadd.f32 %v846_v40, %v399_v44  ;;  %v885_v47 = vmul.f32 %v399_v44, %v399_v44  ;;  %v915_v48 = vadd.f32 %v914_v38, %v884_v37  ;;  %v640_v49 = vpop.f32.mrb[5].mxu1 }
 0x116   : > { %815 = vst [vmem:[%s1575_s9 + $0x20] sm:$0xff] %v640_v49  ;;  %v958_v50 = vadd.f32 %v957_v45, %v640_v49  ;;  %v996_v51 = vmul.f32 %v640_v49, %v640_v49  ;;  %v1026_v52 = vadd.f32 %v1025_v42, %v995_v41  ;;  %v997_v57 = vmul.f32 %v1397_v43, %v1397_v43 }
 0x117   : > { %v916_v54 = vadd.f32 %v915_v48, %v885_v47  ;;  %v1320_v55 = vpop.f32.mrb[6].mxu0  ;;  %v848_v56 = vadd.f32 %v1317_v39, %v847_v46 }
 0x118   : > { %v1027_v58 = vadd.f32 %v1026_v52, %v996_v51  ;;  %786 = vst [vmem:[%s1570_s30 + $0x38] sm:$0xff] %v1320_v55  ;;  %v1400_v59 = vpop.f32.mrb[6].mxu1  ;;  %v409_v60 = vpop.f32.mrb[7].mxu0  ;;  %v959_v61 = vadd.f32 %v1397_v43, %v958_v50  ;;  %v888_v5 = vmul.f32 %v1320_v55, %v1320_v55 }
 0x119   : > { %818 = vst [vmem:[%s1575_s9 + $0x38] sm:$0xff] %v1400_v59  ;;  %785 = vst [vmem:[%s1570_s30 + $0x30] sm:$0xff] %v409_v60  ;;  %v849_v62 = vadd.f32 %v848_v56, %v409_v60  ;;  %v887_v63 = vmul.f32 %v409_v60, %v409_v60  ;;  %v917_v0 = vadd.f32 %v916_v54, %v886_v53  ;;  %v650_v1 = vpop.f32.mrb[7].mxu1 }
 0x11a   : > { %817 = vst [vmem:[%s1575_s9 + $0x30] sm:$0xff] %v650_v1  ;;  %v960_v2 = vadd.f32 %v959_v61, %v650_v1  ;;  %v998_v3 = vmul.f32 %v650_v1, %v650_v1  ;;  %v1028_v4 = vadd.f32 %v1027_v58, %v997_v57  ;;  %v999_v9 = vmul.f32 %v1400_v59, %v1400_v59 }
 0x11b   : > { %v918_v6 = vadd.f32 %v917_v0, %v887_v63  ;;  %v1323_v7 = vpop.f32.mrb[8].mxu0  ;;  %v850_v8 = vadd.f32 %v1320_v55, %v849_v62 }
 0x11c   : > { %v1029_v10 = vadd.f32 %v1028_v4, %v998_v3  ;;  %788 = vst [vmem:[%s1570_s30 + $0x48] sm:$0xff] %v1323_v7  ;;  %v1403_v11 = vpop.f32.mrb[8].mxu1  ;;  %v419_v12 = vpop.f32.mrb[9].mxu0  ;;  %v961_v13 = vadd.f32 %v1400_v59, %v960_v2  ;;  %v890_v21 = vmul.f32 %v1323_v7, %v1323_v7 }
 0x11d   : > { %820 = vst [vmem:[%s1575_s9 + $0x48] sm:$0xff] %v1403_v11  ;;  %787 = vst [vmem:[%s1570_s30 + $0x40] sm:$0xff] %v419_v12  ;;  %v851_v14 = vadd.f32 %v850_v8, %v419_v12  ;;  %v889_v15 = vmul.f32 %v419_v12, %v419_v12  ;;  %v919_v16 = vadd.f32 %v918_v6, %v888_v5  ;;  %v660_v17 = vpop.f32.mrb[9].mxu1 }
 0x11e   : > { %819 = vst [vmem:[%s1575_s9 + $0x40] sm:$0xff] %v660_v17  ;;  %v962_v18 = vadd.f32 %v961_v13, %v660_v17  ;;  %v1000_v19 = vmul.f32 %v660_v17, %v660_v17  ;;  %v1030_v20 = vadd.f32 %v1029_v10, %v999_v9  ;;  %v1001_v25 = vmul.f32 %v1403_v11, %v1403_v11 }
 0x11f   : > { %v920_v22 = vadd.f32 %v919_v16, %v889_v15  ;;  %v1326_v23 = vpop.f32.mrb[10].mxu0  ;;  %v852_v24 = vadd.f32 %v1323_v7, %v851_v14 }
 0x120   : > { %v1031_v26 = vadd.f32 %v1030_v20, %v1000_v19  ;;  %790 = vst [vmem:[%s1570_s30 + $0x58] sm:$0xff] %v1326_v23  ;;  %v1406_v27 = vpop.f32.mrb[10].mxu1  ;;  %v429_v28 = vpop.f32.mrb[11].mxu0  ;;  %v963_v29 = vadd.f32 %v1403_v11, %v962_v18  ;;  %v892_v37 = vmul.f32 %v1326_v23, %v1326_v23 }
 0x121   : > { %822 = vst [vmem:[%s1575_s9 + $0x58] sm:$0xff] %v1406_v27  ;;  %789 = vst [vmem:[%s1570_s30 + $0x50] sm:$0xff] %v429_v28  ;;  %v853_v30 = vadd.f32 %v852_v24, %v429_v28  ;;  %v891_v31 = vmul.f32 %v429_v28, %v429_v28  ;;  %v921_v32 = vadd.f32 %v920_v22, %v890_v21  ;;  %v670_v33 = vpop.f32.mrb[11].mxu1 }
 0x122   : > { %821 = vst [vmem:[%s1575_s9 + $0x50] sm:$0xff] %v670_v33  ;;  %v964_v34 = vadd.f32 %v963_v29, %v670_v33  ;;  %v1002_v35 = vmul.f32 %v670_v33, %v670_v33  ;;  %v1032_v36 = vadd.f32 %v1031_v26, %v1001_v25  ;;  %v1003_v41 = vmul.f32 %v1406_v27, %v1406_v27 }
 0x123   : > { %v922_v38 = vadd.f32 %v921_v32, %v891_v31  ;;  %v1329_v39 = vpop.f32.mrb[12].mxu0  ;;  %v854_v40 = vadd.f32 %v1326_v23, %v853_v30 }
 0x124   : > { %v1033_v42 = vadd.f32 %v1032_v36, %v1002_v35  ;;  %792 = vst [vmem:[%s1570_s30 + $0x68] sm:$0xff] %v1329_v39  ;;  %v1409_v43 = vpop.f32.mrb[12].mxu1  ;;  %v439_v44 = vpop.f32.mrb[13].mxu0  ;;  %v965_v45 = vadd.f32 %v1406_v27, %v964_v34  ;;  %v894_v53 = vmul.f32 %v1329_v39, %v1329_v39 }
 0x125   : > { %824 = vst [vmem:[%s1575_s9 + $0x68] sm:$0xff] %v1409_v43  ;;  %791 = vst [vmem:[%s1570_s30 + $0x60] sm:$0xff] %v439_v44  ;;  %v855_v46 = vadd.f32 %v854_v40, %v439_v44  ;;  %v893_v47 = vmul.f32 %v439_v44, %v439_v44  ;;  %v923_v48 = vadd.f32 %v922_v38, %v892_v37  ;;  %v680_v49 = vpop.f32.mrb[13].mxu1 }
 0x126   : > { %823 = vst [vmem:[%s1575_s9 + $0x60] sm:$0xff] %v680_v49  ;;  %v966_v50 = vadd.f32 %v965_v45, %v680_v49  ;;  %v1004_v51 = vmul.f32 %v680_v49, %v680_v49  ;;  %v1034_v52 = vadd.f32 %v1033_v42, %v1003_v41  ;;  %v1005_v57 = vmul.f32 %v1409_v43, %v1409_v43 }
 0x127   : > { %v924_v54 = vadd.f32 %v923_v48, %v893_v47  ;;  %v1332_v55 = vpop.f32.mrb[14].mxu0  ;;  %v856_v56 = vadd.f32 %v1329_v39, %v855_v46 }
 0x128   : > { %v1035_v58 = vadd.f32 %v1034_v52, %v1004_v51  ;;  %794 = vst [vmem:[%s1570_s30 + $0x78] sm:$0xff] %v1332_v55  ;;  %v1412_v59 = vpop.f32.mrb[14].mxu1  ;;  %v449_v60 = vpop.f32.mrb[15].mxu0  ;;  %v967_v61 = vadd.f32 %v1409_v43, %v966_v50  ;;  %v896_v5 = vmul.f32 %v1332_v55, %v1332_v55 }
 0x129   : > { %826 = vst [vmem:[%s1575_s9 + $0x78] sm:$0xff] %v1412_v59  ;;  %793 = vst [vmem:[%s1570_s30 + $0x70] sm:$0xff] %v449_v60  ;;  %v857_v62 = vadd.f32 %v856_v56, %v449_v60  ;;  %v895_v63 = vmul.f32 %v449_v60, %v449_v60  ;;  %v925_v0 = vadd.f32 %v924_v54, %v894_v53  ;;  %v690_v1 = vpop.f32.mrb[15].mxu1 }
 0x12a   : > { %825 = vst [vmem:[%s1575_s9 + $0x70] sm:$0xff] %v690_v1  ;;  %v968_v2 = vadd.f32 %v967_v61, %v690_v1  ;;  %v1006_v3 = vmul.f32 %v690_v1, %v690_v1  ;;  %v1036_v4 = vadd.f32 %v1035_v58, %v1005_v57  ;;  %v1007_v9 = vmul.f32 %v1412_v59, %v1412_v59 }
 0x12b   : > { %v926_v6 = vadd.f32 %v925_v0, %v895_v63  ;;  %v1335_v7 = vpop.f32.mrb[16].mxu0  ;;  %v858_v8 = vadd.f32 %v1332_v55, %v857_v62 }
 0x12c   : > { %v1037_v10 = vadd.f32 %v1036_v4, %v1006_v3  ;;  %796 = vst [vmem:[%s1570_s30 + $0x88] sm:$0xff] %v1335_v7  ;;  %v1415_v11 = vpop.f32.mrb[16].mxu1  ;;  %v459_v12 = vpop.f32.mrb[17].mxu0  ;;  %v969_v13 = vadd.f32 %v1412_v59, %v968_v2  ;;  %v898_v21 = vmul.f32 %v1335_v7, %v1335_v7 }
 0x12d   : > { %828 = vst [vmem:[%s1575_s9 + $0x88] sm:$0xff] %v1415_v11  ;;  %795 = vst [vmem:[%s1570_s30 + $0x80] sm:$0xff] %v459_v12  ;;  %v859_v14 = vadd.f32 %v858_v8, %v459_v12  ;;  %v897_v15 = vmul.f32 %v459_v12, %v459_v12  ;;  %v927_v16 = vadd.f32 %v926_v6, %v896_v5  ;;  %v700_v17 = vpop.f32.mrb[17].mxu1 }
 0x12e   : > { %827 = vst [vmem:[%s1575_s9 + $0x80] sm:$0xff] %v700_v17  ;;  %v970_v18 = vadd.f32 %v969_v13, %v700_v17  ;;  %v1008_v19 = vmul.f32 %v700_v17, %v700_v17  ;;  %v1038_v20 = vadd.f32 %v1037_v10, %v1007_v9  ;;  %v1009_v25 = vmul.f32 %v1415_v11, %v1415_v11 }
 0x12f   : > { %v928_v22 = vadd.f32 %v927_v16, %v897_v15  ;;  %v1338_v23 = vpop.f32.mrb[18].mxu0  ;;  %v860_v24 = vadd.f32 %v1335_v7, %v859_v14 }
 0x130   : > { %v1039_v26 = vadd.f32 %v1038_v20, %v1008_v19  ;;  %798 = vst [vmem:[%s1570_s30 + $0x98] sm:$0xff] %v1338_v23  ;;  %v1418_v27 = vpop.f32.mrb[18].mxu1  ;;  %v469_v28 = vpop.f32.mrb[19].mxu0  ;;  %v971_v29 = vadd.f32 %v1415_v11, %v970_v18  ;;  %v900_v37 = vmul.f32 %v1338_v23, %v1338_v23 }
 0x131   : > { %830 = vst [vmem:[%s1575_s9 + $0x98] sm:$0xff] %v1418_v27  ;;  %797 = vst [vmem:[%s1570_s30 + $0x90] sm:$0xff] %v469_v28  ;;  %v861_v30 = vadd.f32 %v860_v24, %v469_v28  ;;  %v899_v31 = vmul.f32 %v469_v28, %v469_v28  ;;  %v929_v32 = vadd.f32 %v928_v22, %v898_v21  ;;  %v710_v33 = vpop.f32.mrb[19].mxu1 }
 0x132   : > { %829 = vst [vmem:[%s1575_s9 + $0x90] sm:$0xff] %v710_v33  ;;  %v972_v34 = vadd.f32 %v971_v29, %v710_v33  ;;  %v1010_v35 = vmul.f32 %v710_v33, %v710_v33  ;;  %v1040_v36 = vadd.f32 %v1039_v26, %v1009_v25  ;;  %v1011_v41 = vmul.f32 %v1418_v27, %v1418_v27 }
 0x133   : > { %v930_v38 = vadd.f32 %v929_v32, %v899_v31  ;;  %v1341_v39 = vpop.f32.mrb[20].mxu0  ;;  %v862_v40 = vadd.f32 %v1338_v23, %v861_v30 }
 0x134   : > { %v1041_v42 = vadd.f32 %v1040_v36, %v1010_v35  ;;  %800 = vst [vmem:[%s1570_s30 + $0xa8] sm:$0xff] %v1341_v39  ;;  %v1421_v43 = vpop.f32.mrb[20].mxu1  ;;  %v479_v44 = vpop.f32.mrb[21].mxu0  ;;  %v973_v45 = vadd.f32 %v1418_v27, %v972_v34  ;;  %v902_v53 = vmul.f32 %v1341_v39, %v1341_v39 }
 0x135   : > { %832 = vst [vmem:[%s1575_s9 + $0xa8] sm:$0xff] %v1421_v43  ;;  %799 = vst [vmem:[%s1570_s30 + $0xa0] sm:$0xff] %v479_v44  ;;  %v863_v46 = vadd.f32 %v862_v40, %v479_v44  ;;  %v901_v47 = vmul.f32 %v479_v44, %v479_v44  ;;  %v931_v48 = vadd.f32 %v930_v38, %v900_v37  ;;  %v720_v49 = vpop.f32.mrb[21].mxu1 }
 0x136   : > { %831 = vst [vmem:[%s1575_s9 + $0xa0] sm:$0xff] %v720_v49  ;;  %v974_v50 = vadd.f32 %v973_v45, %v720_v49  ;;  %v1012_v51 = vmul.f32 %v720_v49, %v720_v49  ;;  %v1042_v52 = vadd.f32 %v1041_v42, %v1011_v41  ;;  %v1013_v57 = vmul.f32 %v1421_v43, %v1421_v43 }
 0x137   : > { %v932_v54 = vadd.f32 %v931_v48, %v901_v47  ;;  %v1344_v55 = vpop.f32.mrb[22].mxu0  ;;  %v864_v56 = vadd.f32 %v1341_v39, %v863_v46 }
 0x138   : > { %v1043_v58 = vadd.f32 %v1042_v52, %v1012_v51  ;;  %802 = vst [vmem:[%s1570_s30 + $0xb8] sm:$0xff] %v1344_v55  ;;  %v1424_v59 = vpop.f32.mrb[22].mxu1  ;;  %v489_v60 = vpop.f32.mrb[23].mxu0  ;;  %v975_v61 = vadd.f32 %v1421_v43, %v974_v50  ;;  %v904_v5 = vmul.f32 %v1344_v55, %v1344_v55 }
 0x139   : > { %834 = vst [vmem:[%s1575_s9 + $0xb8] sm:$0xff] %v1424_v59  ;;  %801 = vst [vmem:[%s1570_s30 + $0xb0] sm:$0xff] %v489_v60  ;;  %v865_v62 = vadd.f32 %v864_v56, %v489_v60  ;;  %v903_v63 = vmul.f32 %v489_v60, %v489_v60  ;;  %v933_v0 = vadd.f32 %v932_v54, %v902_v53  ;;  %v730_v1 = vpop.f32.mrb[23].mxu1 }
 0x13a   : > { %833 = vst [vmem:[%s1575_s9 + $0xb0] sm:$0xff] %v730_v1  ;;  %v976_v2 = vadd.f32 %v975_v61, %v730_v1  ;;  %v1014_v3 = vmul.f32 %v730_v1, %v730_v1  ;;  %v1044_v4 = vadd.f32 %v1043_v58, %v1013_v57  ;;  %v1015_v9 = vmul.f32 %v1424_v59, %v1424_v59 }
 0x13b   : > { %v934_v6 = vadd.f32 %v933_v0, %v903_v63  ;;  %v1347_v7 = vpop.f32.mrb[24].mxu0  ;;  %v866_v8 = vadd.f32 %v1344_v55, %v865_v62 }
 0x13c   : > { %v1045_v10 = vadd.f32 %v1044_v4, %v1014_v3  ;;  %804 = vst [vmem:[%s1570_s30 + $0xc8] sm:$0xff] %v1347_v7  ;;  %v1427_v11 = vpop.f32.mrb[24].mxu1  ;;  %v499_v12 = vpop.f32.mrb[25].mxu0  ;;  %v977_v13 = vadd.f32 %v1424_v59, %v976_v2  ;;  %v906_v21 = vmul.f32 %v1347_v7, %v1347_v7 }
 0x13d   : > { %836 = vst [vmem:[%s1575_s9 + $0xc8] sm:$0xff] %v1427_v11  ;;  %803 = vst [vmem:[%s1570_s30 + $0xc0] sm:$0xff] %v499_v12  ;;  %v867_v14 = vadd.f32 %v866_v8, %v499_v12  ;;  %v905_v15 = vmul.f32 %v499_v12, %v499_v12  ;;  %v935_v16 = vadd.f32 %v934_v6, %v904_v5  ;;  %v740_v17 = vpop.f32.mrb[25].mxu1 }
 0x13e   : > { %835 = vst [vmem:[%s1575_s9 + $0xc0] sm:$0xff] %v740_v17  ;;  %v978_v18 = vadd.f32 %v977_v13, %v740_v17  ;;  %v1016_v19 = vmul.f32 %v740_v17, %v740_v17  ;;  %v1046_v20 = vadd.f32 %v1045_v10, %v1015_v9  ;;  %v1017_v25 = vmul.f32 %v1427_v11, %v1427_v11 }
 0x13f   : > { %v936_v22 = vadd.f32 %v935_v16, %v905_v15  ;;  %v1350_v23 = vpop.f32.mrb[26].mxu0  ;;  %v868_v24 = vadd.f32 %v1347_v7, %v867_v14 }
 0x140   : > { %v1047_v26 = vadd.f32 %v1046_v20, %v1016_v19  ;;  %806 = vst [vmem:[%s1570_s30 + $0xd8] sm:$0xff] %v1350_v23  ;;  %v1430_v27 = vpop.f32.mrb[26].mxu1  ;;  %v509_v28 = vpop.f32.mrb[27].mxu0  ;;  %v979_v29 = vadd.f32 %v1427_v11, %v978_v18  ;;  %v908_v37 = vmul.f32 %v1350_v23, %v1350_v23 }
 0x141   : > { %838 = vst [vmem:[%s1575_s9 + $0xd8] sm:$0xff] %v1430_v27  ;;  %805 = vst [vmem:[%s1570_s30 + $0xd0] sm:$0xff] %v509_v28  ;;  %v869_v30 = vadd.f32 %v868_v24, %v509_v28  ;;  %v907_v31 = vmul.f32 %v509_v28, %v509_v28  ;;  %v937_v32 = vadd.f32 %v936_v22, %v906_v21  ;;  %v750_v33 = vpop.f32.mrb[27].mxu1 }
 0x142   : > { %837 = vst [vmem:[%s1575_s9 + $0xd0] sm:$0xff] %v750_v33  ;;  %v980_v34 = vadd.f32 %v979_v29, %v750_v33  ;;  %v1018_v35 = vmul.f32 %v750_v33, %v750_v33  ;;  %v1048_v36 = vadd.f32 %v1047_v26, %v1017_v25  ;;  %v1019_v41 = vmul.f32 %v1430_v27, %v1430_v27  ;;  %v843_v33 = vld [vmem:[%s1795_s5] sm:$0x3] }
 0x143   : > { %v938_v38 = vadd.f32 %v937_v32, %v907_v31  ;;  %v1353_v39 = vpop.f32.mrb[28].mxu0  ;;  %v870_v40 = vadd.f32 %v1350_v23, %v869_v30 }
 0x144   : > { %v1049_v42 = vadd.f32 %v1048_v36, %v1018_v35  ;;  %808 = vst [vmem:[%s1570_s30 + $0xe8] sm:$0xff] %v1353_v39  ;;  %v1433_v43 = vpop.f32.mrb[28].mxu1  ;;  %v519_v44 = vpop.f32.mrb[29].mxu0  ;;  %v981_v45 = vadd.f32 %v1430_v27, %v980_v34  ;;  %v910_v53 = vmul.f32 %v1353_v39, %v1353_v39  ;;  %v954_v36 = vld [vmem:[%s1796_s6] sm:$0x3] }
 0x145   : > { %840 = vst [vmem:[%s1575_s9 + $0xe8] sm:$0xff] %v1433_v43  ;;  %807 = vst [vmem:[%s1570_s30 + $0xe0] sm:$0xff] %v519_v44  ;;  %v871_v46 = vadd.f32 %v870_v40, %v519_v44  ;;  %v909_v47 = vmul.f32 %v519_v44, %v519_v44  ;;  %v939_v48 = vadd.f32 %v938_v38, %v908_v37  ;;  %v760_v49 = vpop.f32.mrb[29].mxu1 }
 0x146   : > { %839 = vst [vmem:[%s1575_s9 + $0xe0] sm:$0xff] %v760_v49  ;;  %v982_v50 = vadd.f32 %v981_v45, %v760_v49  ;;  %v1020_v51 = vmul.f32 %v760_v49, %v760_v49  ;;  %v1050_v52 = vadd.f32 %v1049_v42, %v1019_v41  ;;  %v1021_v57 = vmul.f32 %v1433_v43, %v1433_v43 }
 0x147   : > { %v940_v54 = vadd.f32 %v939_v48, %v909_v47  ;;  %v1356_v55 = vpop.f32.mrb[30].mxu0  ;;  %v872_v56 = vadd.f32 %v1353_v39, %v871_v46 }
 0x148   : > { %v1051_v58 = vadd.f32 %v1050_v52, %v1020_v51  ;;  %810 = vst [vmem:[%s1570_s30 + $0xf8] sm:$0xff] %v1356_v55  ;;  %v1436_v59 = vpop.f32.mrb[30].mxu1  ;;  %v529_v60 = vpop.f32.mrb[31].mxu0  ;;  %v983_v61 = vadd.f32 %v1433_v43, %v982_v50  ;;  %v912_v5 = vmul.f32 %v1356_v55, %v1356_v55 }
 0x149   : > { %842 = vst [vmem:[%s1575_s9 + $0xf8] sm:$0xff] %v1436_v59  ;;  %809 = vst [vmem:[%s1570_s30 + $0xf0] sm:$0xff] %v529_v60  ;;  %v873_v62 = vadd.f32 %v872_v56, %v529_v60  ;;  %v911_v63 = vmul.f32 %v529_v60, %v529_v60  ;;  %v941_v0 = vadd.f32 %v940_v54, %v910_v53  ;;  %v770_v1 = vpop.f32.mrb[31].mxu1 }
 0x14a   : > { %841 = vst [vmem:[%s1575_s9 + $0xf0] sm:$0xff] %v770_v1  ;;  %v984_v2 = vadd.f32 %v983_v61, %v770_v1  ;;  %v1022_v3 = vmul.f32 %v770_v1, %v770_v1  ;;  %v1052_v4 = vadd.f32 %v1051_v58, %v1021_v57  ;;  %v1023_v8 = vmul.f32 %v1436_v59, %v1436_v59 }
 0x14b   : > { %v874_v6 = vadd.f32 %v1356_v55, %v873_v62  ;;  %v942_v7 = vadd.f32 %v941_v0, %v911_v63 }
 0x14c   : > { %v985_v9 = vadd.f32 %v1436_v59, %v984_v2  ;;  %v1053_v10 = vadd.f32 %v1052_v4, %v1022_v3 }
 0x14d   : > { %v875_v11 = vrot.slane %v874_v6, 4  ;;  %v943_v12 = vadd.f32 %v942_v7, %v912_v5 }
 0x14e   : > { %v986_v13 = vrot.slane %v985_v9, 4  ;;  %v1054_v14 = vadd.f32 %v1053_v10, %v1023_v8 }
 0x14f   : > { %v876_v15 = vadd.f32 %v875_v11, %v874_v6  ;;  %v944_v16 = vrot.slane %v943_v12, 4 }
 0x150   : > { %v987_v17 = vadd.f32 %v986_v13, %v985_v9  ;;  %v1055_v18 = vrot.slane %v1054_v14, 4 }
 0x151   : > { %v877_v19 = vrot.slane %v876_v15, 2  ;;  %v945_v20 = vadd.f32 %v944_v16, %v943_v12 }
 0x152   : > { %v988_v21 = vrot.slane %v987_v17, 2  ;;  %v1056_v22 = vadd.f32 %v1055_v18, %v1054_v14 }
 0x153   : > { %v878_v23 = vadd.f32 %v877_v19, %v876_v15  ;;  %v946_v24 = vrot.slane %v945_v20, 2 }
 0x154   : > { %v989_v25 = vadd.f32 %v988_v21, %v987_v17  ;;  %v1057_v26 = vrot.slane %v1056_v22, 2 }
 0x155   : > { %v879_v27 = vrot.slane %v878_v23, 1  ;;  %v947_v28 = vadd.f32 %v946_v24, %v945_v20 }
 0x156   : > { %v990_v29 = vrot.slane %v989_v25, 1  ;;  %v1058_v30 = vadd.f32 %v1057_v26, %v1056_v22 }
 0x157   : > { %v948_v31 = vrot.slane %v947_v28, 1  ;;  %v880_v34 = vadd.f32 %v879_v27, %v878_v23 }
 0x158   : > { %v1059_v32 = vrot.slane %v1058_v30, 1  ;;  %v991_v37 = vadd.f32 %v990_v29, %v989_v25 }
 0x159   : > { %v949_v35 = vadd.f32 %v948_v31, %v947_v28 }
 0x15a   : > { %v1060_v38 = vadd.f32 %v1059_v32, %v1058_v30 }
 0x15b   : > { %v951_v39 = vsel %vm950_vm0, %v880_v34, %v949_v35 }
 0x15c   : > { %v952_v40 = vadd.f32 %v951_v39, %v843_v33  ;;  %v1061_v41 = vsel %vm950_vm0, %v991_v37, %v1060_v38 }
 0x15d   : > { %v1062_v42 = vadd.f32 %v1061_v41, %v954_v36 }
 0x15e   : > { %953 = vst [vmem:[%s1795_s5] sm:$0x3] %v952_v40 }
 0x15f   : > { %1063 = vst [vmem:[%s1796_s6] sm:$0x3] %v1062_v42 }
 0x160 PF: > { %s17_s21 = sadd.s32 1, %s1516_s21  }
 0x161   : > { %p14_p5 = scmp.ge.s32.totalorder %s17_s21, 4  }
 0x163   :  { %16 = sbr.rel (!%p14_p5) target bundleno = 1 (0x1), region = 94 }

// kernel: bottleneck_forward.5
= control target key start
LH: loop header
LB: loop body
LE: loop exit
PB: predicated region body
PF: predicated region fallthrough
CT: control target
= control target key end

     0   :  { %s3228_s15 = smov 0   ;;  %s4638_s0 = inlined_call_operand.vmem [shape: f32[2,16,16,128], index: 0, kind: input, shape index: {}]   ;;  %s4639_s1 = inlined_call_operand.vmem [shape: f32[2,128], index: 1, kind: input, shape index: {}]   ;;  %s4640_s2 = inlined_call_operand.vmem [shape: f32[3,384,128], index: 2, kind: input, shape index: {}]   ;;  %s4641_s3 = inlined_call_operand.vmem [shape: f32[2,256,128], index: 3, kind: output, shape index: {0}]   ;;  %s4642_s4 = inlined_call_operand.vmem [shape: f32[2,128], index: 4, kind: output, shape index: {1}]  }
   0x1 LB: > { %s2447_s16 = sadd.s32 4294967295, %s3199_s15   ;;  %p2451_p0 = scmp.ge.s32.totalorder %s3199_s15, 1  ;;  %s3199_s15 = sphi %s3228_s15, %s15_s15  }
   0x2   : > { %p160_p1 = scmp.lt.s32.totalorder %s3199_s15, 3 }
   0x4   : > { %p161_p2 = pnand %p2451_p0, %p160_p1 }
   0x5   : > { %p186_p3 = scmp.lt.s32.totalorder (!%p161_p2), %s2447_s16, 1  ;;  %p2456_p4 = scmp.ne.s32.totalorder (!%p161_p2), %s2447_s16, 0 }
   0x6   : > { %164 = sbr.rel (%p161_p2) target bundleno = 631 (0x277), region = 32 }
   0xd   : > { %s187_s17 = scalar_select %p186_p3, %s2447_s16, 1 }
   0xe   : > { %199 = sbr.rel (%p2456_p4) target bundleno = 43 (0x2b), region = 36  ;;  %v3201_v0 = vmov (!%p2456_p4), 0.0  }
   0xf   : > { %s2557_s18 = sshll.u32 %s187_s17, 8  ;;  %200 = vst [vmem:[%s4642_s4] sm:$0x3] (!%p2456_p4), %v3201_v0  ;;  %201 = vst [vmem:[#allocation2] sm:$0xff] (!%p2456_p4), %v3201_v0 }
  0x10   : > { %s3239_s21 = scalar_lea.vmem %s4638_s0, %s2557_s18  ;;  %s3244_s24 = scalar_lea.vmem %s4641_s3, %s2557_s18  ;;  %202 = vst [vmem:[#allocation2 + $0x8] sm:$0xff] (!%p2456_p4), %v3201_v0  ;;  %203 = vst [vmem:[#allocation2 + $0x10] sm:$0x3] (!%p2456_p4), %v3201_v0 }
  0x11   : > { %204 = vst [vmem:[#allocation2 + $0x18] sm:$0xff] (!%p2456_p4), %v3201_v0  ;;  %205 = vst [vmem:[#allocation2 + $0x20] sm:$0xff] (!%p2456_p4), %v3201_v0 }
  0x12   : > { %206 = vst [vmem:[#allocation2 + $0x28] sm:$0x3] (!%p2456_p4), %v3201_v0  ;;  %207 = vst [vmem:[#allocation2 + $0x30] sm:$0xff] (!%p2456_p4), %v3201_v0 }
  0x13   : > { %208 = vst [vmem:[#allocation2 + $0x38] sm:$0xff] (!%p2456_p4), %v3201_v0  ;;  %209 = vst [vmem:[#allocation2 + $0x40] sm:$0x3] (!%p2456_p4), %v3201_v0 }
  0x14   : > { %210 = vst [vmem:[#allocation2 + $0x48] sm:$0xff] (!%p2456_p4), %v3201_v0  ;;  %211 = vst [vmem:[#allocation2 + $0x50] sm:$0xff] (!%p2456_p4), %v3201_v0 }
  0x15   : > { %212 = vst [vmem:[#allocation2 + $0x58] sm:$0x3] %v3201_v0  ;;  %213 = vst [vmem:[#allocation2 + $0x60] sm:$0xff] %v3201_v0 }
  0x16   : > { %214 = vst [vmem:[#allocation2 + $0x68] sm:$0xff] %v3201_v0  ;;  %215 = vst [vmem:[#allocation2 + $0x70] sm:$0x3] %v3201_v0 }
  0x17   : > { %216 = vst [vmem:[#allocation2 + $0x78] sm:$0xff] %v3201_v0  ;;  %217 = vst [vmem:[#allocation2 + $0x80] sm:$0xff] %v3201_v0 }
  0x18   : > { %218 = vst [vmem:[#allocation2 + $0x88] sm:$0x3] %v3201_v0  ;;  %219 = vst [vmem:[#allocation2 + $0x90] sm:$0xff] %v3201_v0 }
  0x19   : > { %220 = vst [vmem:[#allocation2 + $0x98] sm:$0xff] %v3201_v0  ;;  %221 = vst [vmem:[#allocation2 + $0xa0] sm:$0x3] %v3201_v0 }
  0x1a   : > { %222 = vst [vmem:[#allocation2 + $0xa8] sm:$0xff] %v3201_v0  ;;  %223 = vst [vmem:[#allocation2 + $0xb0] sm:$0xff] %v3201_v0 }
  0x1b   : > { %224 = vst [vmem:[#allocation2 + $0xb8] sm:$0x3] %v3201_v0  ;;  %225 = vst [vmem:[#allocation2 + $0xc0] sm:$0xff] %v3201_v0 }
  0x1c   : > { %226 = vst [vmem:[#allocation2 + $0xc8] sm:$0xff] %v3201_v0  ;;  %227 = vst [vmem:[#allocation2 + $0xd0] sm:$0x3] %v3201_v0 }
  0x1d   : > { %228 = vst [vmem:[#allocation2 + $0xd8] sm:$0xff] %v3201_v0  ;;  %229 = vst [vmem:[#allocation2 + $0xe0] sm:$0xff] %v3201_v0 }
  0x1e   : > { %230 = vst [vmem:[#allocation2 + $0xe8] sm:$0x3] %v3201_v0  ;;  %231 = vst [vmem:[#allocation2 + $0xf0] sm:$0xff] %v3201_v0 }
  0x1f   : > { %232 = vst [vmem:[#allocation2 + $0xf8] sm:$0xff] %v3201_v0  ;;  %233 = vst [vmem:[#allocation2 + $0x100] sm:$0x3] %v3201_v0 }
  0x20   : > { %234 = vst [vmem:[#allocation2 + $0x108] sm:$0xff] %v3201_v0  ;;  %235 = vst [vmem:[#allocation2 + $0x110] sm:$0xff] %v3201_v0 }
  0x21   : > { %236 = vst [vmem:[#allocation2 + $0x118] sm:$0x3] %v3201_v0  ;;  %237 = vst [vmem:[#allocation2 + $0x120] sm:$0xff] %v3201_v0 }
  0x22   : > { %238 = vst [vmem:[#allocation2 + $0x128] sm:$0xff] %v3201_v0  ;;  %239 = vst [vmem:[#allocation2 + $0x130] sm:$0x3] %v3201_v0 }
  0x23   : > { %240 = vst [vmem:[#allocation2 + $0x138] sm:$0xff] %v3201_v0  ;;  %241 = vst [vmem:[#allocation2 + $0x140] sm:$0xff] %v3201_v0 }
  0x24   : > { %242 = vst [vmem:[#allocation2 + $0x148] sm:$0x3] %v3201_v0  ;;  %243 = vst [vmem:[#allocation2 + $0x150] sm:$0xff] %v3201_v0 }
  0x25   : > { %244 = vst [vmem:[#allocation2 + $0x158] sm:$0xff] %v3201_v0  ;;  %245 = vst [vmem:[#allocation2 + $0x160] sm:$0x3] %v3201_v0 }
  0x26   : > { %246 = vst [vmem:[#allocation2 + $0x168] sm:$0xff] %v3201_v0  ;;  %247 = vst [vmem:[#allocation2 + $0x170] sm:$0xff] %v3201_v0 }
  0x27   : > { %248 = vst [vmem:[#allocation2 + $0x178] sm:$0x3] %v3201_v0  ;;  %249 = vst [vmem:[#allocation2 + $0x180] sm:$0xff] %v3201_v0 }
  0x28   : > { %250 = vst [vmem:[#allocation2 + $0x188] sm:$0xff] %v3201_v0  ;;  %251 = vst [vmem:[#allocation2 + $0x190] sm:$0x3] %v3201_v0 }
  0x29   : > { %252 = vst [vmem:[#allocation2 + $0x198] sm:$0xff] %v3201_v0  ;;  %253 = vst [vmem:[#allocation2 + $0x1a0] sm:$0xff] %v3201_v0 }
  0x2a   : > { %254 = vst [vmem:[#allocation2 + $0x1a8] sm:$0x3] %v3201_v0 }
  0x2b PF: > { %v2459_v1 = vld [vmem:[%s4640_s2 + $0x180] sm:$0xff]  ;;  %v2460_v2 = vld [vmem:[%s4640_s2 + $0x188] sm:$0xff]  ;;  %v3202_v4 = vmov 0.0|0.0   ;;  %v2461_v7 = vld [vmem:[%s4640_s2 + $0x190] sm:$0xff]  ;;  %vm2382_vm0 = vcmask 1040384  }
  0x2c   : > { %v2491_v3 = vld [vmem:[%s4640_s2 + $0x280] sm:$0xff]  ;;  %2943 = vmatprep.subr.bf16.mxu0 %v3202_v4  ;;  %v2944_v5 = vpack.c.bf16 %v2460_v2, %v2459_v1  ;;  %v2492_v6 = vld [vmem:[%s4640_s2 + $0x288] sm:$0xff]  ;;  %v2462_v8 = vld [vmem:[%s4640_s2 + $0x198] sm:$0xff] }
  0x2d   : > { %v2991_v9 = vpack.c.bf16 %v2492_v6, %v2491_v3  ;;  %v2493_v10 = vld [vmem:[%s4640_s2 + $0x290] sm:$0xff]  ;;  %v2494_v11 = vld [vmem:[%s4640_s2 + $0x298] sm:$0xff]  ;;  %v2947_v12 = vpack.c.bf16 %v2462_v8, %v2461_v7  ;;  %v2495_v14 = vld [vmem:[%s4640_s2 + $0x2a0] sm:$0xff] }
  0x2e   : > { %2945 = vmatpush1.bf16.msra.mxu0 %v2944_v5  ;;  %v2995_v13 = vpack.c.bf16 %v2494_v11, %v2493_v10  ;;  %v2496_v15 = vld [vmem:[%s4640_s2 + $0x2a8] sm:$0xff]  ;;  %v2463_v16 = vld [vmem:[%s4640_s2 + $0x1a0] sm:$0xff]  ;;  %v2497_v20 = vld [vmem:[%s4640_s2 + $0x2b0] sm:$0xff] }
  0x2f   : > { %2992 = vmatprep.subr.bf16.mxu1 %v2991_v9  ;;  %2946 = vmatprep.subr.bf16.mxu0 %v3202_v4  ;;  %v2464_v17 = vld [vmem:[%s4640_s2 + $0x1a8] sm:$0xff]  ;;  %v2999_v18 = vpack.c.bf16 %v2496_v15, %v2495_v14  ;;  %v2498_v21 = vld [vmem:[%s4640_s2 + $0x2b8] sm:$0xff]  ;;  %v2465_v22 = vld [vmem:[%s4640_s2 + $0x1b0] sm:$0xff] }
  0x30   : > { %2994 = vmatpush3.bf16.msra.mxu1 %v2991_v9  ;;  %v2950_v19 = vpack.c.bf16 %v2464_v17, %v2463_v16  ;;  %v2466_v23 = vld [vmem:[%s4640_s2 + $0x1b8] sm:$0xff]  ;;  %v3003_v24 = vpack.c.bf16 %v2498_v21, %v2497_v20  ;;  %v2499_v25 = vld [vmem:[%s4640_s2 + $0x2c0] sm:$0xff]  ;;  %v2500_v26 = vld [vmem:[%s4640_s2 + $0x2c8] sm:$0xff] }
  0x31   : > { %2996 = vmatprep.subr.bf16.mxu1 %v2995_v13  ;;  %v255_v27 = vld [vmem:[%s3239_s21] sm:$0xff]  ;;  %v2953_v28 = vpack.c.bf16 %v2466_v23, %v2465_v22  ;;  %v256_v29 = vld [vmem:[%s3239_s21 + $0x8] sm:$0xff]  ;;  %v257_v36 = vld [vmem:[%s3239_s21 + $0x10] sm:$0xff]  ;;  %v3007_v38 = vpack.c.bf16 %v2500_v26, %v2499_v25 }
  0x32   : > { %2948 = vmatpush1.bf16.msra.mxu0 %v2947_v12  ;;  %v3311_v30 = vld [vmem:[%s4639_s1] ss:$0 sm:$0xff]  ;;  %v3316_v31 = vld [vmem:[%s4639_s1 + $0x1] ss:$0 sm:$0xff]  ;;  %v2468_v33 = vld [vmem:[%s4640_s2 + $0x1c8] sm:$0xff] }
  0x33   : > { %2949 = vmatprep.subr.bf16.mxu0 %v3202_v4  ;;  %v2467_v32 = vld [vmem:[%s4640_s2 + $0x1c0] sm:$0xff]  ;;  %v292_v34 = vmul.f32 %v3311_v30, %v255_v27  ;;  %v293_v35 = vmul.f32 %v3311_v30, %v256_v29  ;;  %v258_v37 = vld [vmem:[%s3239_s21 + $0x18] sm:$0xff]  ;;  %v2501_v39 = vld [vmem:[%s4640_s2 + $0x2d0] sm:$0xff]  ;;  %v294_v42 = vmul.f32 %v3311_v30, %v257_v36 }
  0x34   : > { %2998 = vmatpush3.bf16.msra.mxu1 %v2995_v13  ;;  %v2956_v43 = vpack.c.bf16 %v2468_v33, %v2467_v32  ;;  %v2502_v44 = vld [vmem:[%s4640_s2 + $0x2d8] sm:$0xff]  ;;  %v295_v45 = vmul.f32 %v3311_v30, %v258_v37  ;;  %v259_v46 = vld [vmem:[%s3239_s21 + $0x20] sm:$0xff]  ;;  %v260_v47 = vld [vmem:[%s3239_s21 + $0x28] sm:$0xff] }
  0x35   : > { %3000 = vmatprep.subr.bf16.mxu1 %v2999_v18  ;;  %v329_v40 = vadd.f32 %v3316_v31, %v292_v34  ;;  %v330_v41 = vadd.f32 %v3316_v31, %v293_v35  ;;  %v2469_v48 = vld [vmem:[%s4640_s2 + $0x1d0] sm:$0xff]  ;;  %v2470_v49 = vld [vmem:[%s4640_s2 + $0x1d8] sm:$0xff]  ;;  %v331_v52 = vadd.f32 %v3316_v31, %v294_v42  ;;  %v296_v54 = vmul.f32 %v3311_v30, %v259_v46  ;;  %v2503_v59 = vld [vmem:[%s4640_s2 + $0x2e0] sm:$0xff] }
  0x36   : > { %2951 = vmatpush1.bf16.msra.mxu0 %v2950_v19  ;;  %v332_v53 = vadd.f32 %v3316_v31, %v295_v45  ;;  %v297_v55 = vmul.f32 %v3311_v30, %v260_v47  ;;  %v261_v56 = vld [vmem:[%s3239_s21 + $0x30] sm:$0xff]  ;;  %v262_v57 = vld [vmem:[%s3239_s21 + $0x38] sm:$0xff]  ;;  %v3011_v58 = vpack.c.bf16 %v2502_v44, %v2501_v39  ;;  %v2959_v63 = vpack.c.bf16 %v2470_v49, %v2469_v48  ;;  %v2504_v0 = vld [vmem:[%s4640_s2 + $0x2e8] sm:$0xff] }
  0x37   : > { %2952 = vmatprep.subr.bf16.mxu0 %v3202_v4  ;;  %v3348_v50 = vmax.f32 %v329_v40, 0.0  ;;  %v3350_v51 = vmax.f32 %v330_v41, 0.0  ;;  %v3363_v60 = vmax.f32 %v331_v52, 0.0  ;;  %v298_v61 = vmul.f32 %v3311_v30, %v261_v56  ;;  %v263_v5 = vld [vmem:[%s3239_s21 + $0x40] sm:$0xff]  ;;  %v264_v6 = vld [vmem:[%s3239_s21 + $0x48] sm:$0xff]  ;;  %v265_v15 = vld [vmem:[%s3239_s21 + $0x50] sm:$0xff] }
  0x38   : > { %3002 = vmatpush3.bf16.msra.mxu1 %v2999_v18  ;;  %v299_v62 = vmul.f32 %v3311_v30, %v262_v57  ;;  %v3371_v1 = vmax.f32 %v332_v53, 0.0  ;;  %v333_v2 = vadd.f32 %v3316_v31, %v296_v54  ;;  %v334_v3 = vadd.f32 %v3316_v31, %v297_v55  ;;  %v2471_v7 = vld [vmem:[%s4640_s2 + $0x1e0] sm:$0xff]  ;;  %v2472_v8 = vld [vmem:[%s4640_s2 + $0x1e8] sm:$0xff]  ;;  %v266_v16 = vld [vmem:[%s3239_s21 + $0x58] sm:$0xff] }
  0x39   : > { %3004 = vmatprep.subr.bf16.mxu1 %v3003_v24  ;;  %394 = vst [vmem:[#allocation2 + $0x19] sm:$0xff] %v3348_v50  ;;  %395 = vst [vmem:[#allocation2 + $0x21] sm:$0xff] %v3350_v51  ;;  %779 = vmatprep.mubr.f32.mxu0 %v3348_v50  ;;  %v335_v9 = vadd.f32 %v3316_v31, %v298_v61  ;;  %v300_v11 = vmul.f32 %v3311_v30, %v263_v5  ;;  %v2473_v18 = vld [vmem:[%s4640_s2 + $0x1f0] sm:$0xff]  ;;  %v2474_v19 = vld [vmem:[%s4640_s2 + $0x1f8] sm:$0xff] }
  0x3a   : > { %2954 = vmatpush1.bf16.msra.mxu0 %v2953_v28  ;;  %396 = vst [vmem:[#allocation2 + $0x31] sm:$0xff] %v3363_v60  ;;  %v336_v10 = vadd.f32 %v3316_v31, %v299_v62  ;;  %397 = vst [vmem:[#allocation2 + $0x39] sm:$0xff] %v3371_v1  ;;  %v3389_v12 = vmax.f32 %v333_v2, 0.0  ;;  %v3391_v13 = vmax.f32 %v334_v3, 0.0  ;;  %v301_v14 = vmul.f32 %v3311_v30, %v264_v6  ;;  %v2505_v20 = vld [vmem:[%s4640_s2 + $0x2f0] sm:$0xff]  ;;  %v2506_v25 = vld [vmem:[%s4640_s2 + $0x2f8] sm:$0xff] }
  0x3b   : > { %2955 = vmatprep.subr.bf16.mxu0 %v3202_v4  ;;  %v3015_v17 = vpack.c.bf16 %v2504_v0, %v2503_v59  ;;  %v3405_v21 = vmax.f32 %v335_v9, 0.0  ;;  %v337_v23 = vadd.f32 %v3316_v31, %v300_v11  ;;  %v302_v27 = vmul.f32 %v3311_v30, %v265_v15  ;;  %v267_v29 = vld [vmem:[%s3239_s21 + $0x60] sm:$0xff]  ;;  %v268_v32 = vld [vmem:[%s3239_s21 + $0x68] sm:$0xff]  ;;  %v269_v44 = vld [vmem:[%s3239_s21 + $0x70] sm:$0xff] }
  0x3c   : > { %3006 = vmatpush3.bf16.msra.mxu1 %v3003_v24  ;;  %v3407_v22 = vmax.f32 %v336_v10, 0.0  ;;  %v2962_v24 = vpack.c.bf16 %v2472_v8, %v2471_v7  ;;  %398 = vst [vmem:[#allocation2 + $0x49] sm:$0xff] %v3389_v12  ;;  %399 = vst [vmem:[#allocation2 + $0x51] sm:$0xff] %v3391_v13  ;;  %v338_v26 = vadd.f32 %v3316_v31, %v301_v14  ;;  %v270_v45 = vld [vmem:[%s3239_s21 + $0x78] sm:$0xff]  ;;  %v2475_v52 = vld [vmem:[%s4640_s2 + $0x200] sm:$0xff] }
  0x3d   : > { %3008 = vmatprep.subr.bf16.mxu1 %v3007_v38  ;;  %v303_v28 = vmul.f32 %v3311_v30, %v266_v16  ;;  %400 = vst [vmem:[#allocation2 + $0x61] sm:$0xff] %v3405_v21  ;;  %v3423_v33 = vmax.f32 %v337_v23, 0.0  ;;  %v304_v34 = vmul.f32 %v3311_v30, %v267_v29  ;;  %v305_v35 = vmul.f32 %v3311_v30, %v268_v32  ;;  %v2476_v53 = vld [vmem:[%s4640_s2 + $0x208] sm:$0xff]  ;;  %v522_v61 = vld [vmem:[%s4640_s2] sm:$0xff]  ;;  %v2477_v3 = vld [vmem:[%s4640_s2 + $0x210] sm:$0xff] }
  0x3e   : > { %2957 = vmatpush1.bf16.msra.mxu0 %v2956_v43  ;;  %401 = vst [vmem:[#allocation2 + $0x69] sm:$0xff] %v3407_v22  ;;  %v2965_v36 = vpack.c.bf16 %v2474_v19, %v2473_v18  ;;  %v339_v39 = vadd.f32 %v3316_v31, %v302_v27  ;;  %v3019_v41 = vpack.c.bf16 %v2506_v25, %v2505_v20  ;;  %v272_v59 = vld [vmem:[%s3239_s21 + $0x88] sm:$0xff]  ;;  %v2478_v5 = vld [vmem:[%s4640_s2 + $0x218] sm:$0xff]  ;;  %v3484_v8 = vld [vmem:[%s4640_s2 + $0x10] sm:$0xff] }
  0x3f   : > { %2958 = vmatprep.subr.bf16.mxu0 %v3202_v4  ;;  %v340_v40 = vadd.f32 %v3316_v31, %v303_v28  ;;  %402 = vst [vmem:[#allocation2 + $0x79] sm:$0xff] %v3423_v33  ;;  %v341_v42 = vadd.f32 %v3316_v31, %v304_v34  ;;  %v342_v43 = vadd.f32 %v3316_v31, %v305_v35  ;;  %v523_v62 = vld [vmem:[%s4640_s2 + $0x8] sm:$0xff]  ;;  %v273_v11 = vld [vmem:[%s3239_s21 + $0x90] sm:$0xff]  ;;  %v274_v14 = vld [vmem:[%s3239_s21 + $0x98] sm:$0xff] }
  0x40   : > { %3010 = vmatpush3.bf16.msra.mxu1 %v3007_v38  ;;  %v634_v37 = vld [vmem:[#allocation2 + $0x1a] sm:$0xff]  ;;  %v3427_v38 = vmax.f32 %v338_v26, 0.0  ;;  %v3437_v46 = vmax.f32 %v339_v39, 0.0  ;;  %v306_v48 = vmul.f32 %v3311_v30, %v269_v44  ;;  %v307_v49 = vmul.f32 %v3311_v30, %v270_v45  ;;  %v635_v15 = vld [vmem:[#allocation2 + $0x22] sm:$0xff] }
  0x41   : > { %3012 = vmatprep.subr.bf16.mxu1 %v3011_v58  ;;  %2735 = vmatprep.mubr.f32.mxu1 %v634_v37  ;;  %v3439_v47 = vmax.f32 %v340_v40, 0.0  ;;  %v3450_v54 = vmax.f32 %v341_v42, 0.0  ;;  %v3452_v55 = vmax.f32 %v342_v43, 0.0  ;;  %v309_v0 = vmul.f32 %v3311_v30, %v272_v59  ;;  %v275_v20 = vld [vmem:[%s3239_s21 + $0xa0] sm:$0xff]  ;;  %v636_v23 = vld [vmem:[#allocation2 + $0x32] sm:$0xff]  ;;  %v276_v26 = vld [vmem:[%s3239_s21 + $0xa8] sm:$0xff] }
  0x42   : > { %2960 = vmatpush1.bf16.msra.mxu0 %v2959_v63  ;;  %403 = vst [vmem:[#allocation2 + $0x81] sm:$0xff] %v3427_v38  ;;  %404 = vst [vmem:[#allocation2 + $0x91] sm:$0xff] %v3437_v46  ;;  %v343_v56 = vadd.f32 %v3316_v31, %v306_v48  ;;  %v344_v57 = vadd.f32 %v3316_v31, %v307_v49  ;;  %v2968_v2 = vpack.c.bf16 %v2476_v53, %v2475_v52  ;;  %v2480_v37 = vld [vmem:[%s4640_s2 + $0x228] sm:$0xff]  ;;  %v277_v40 = vld [vmem:[%s3239_s21 + $0xb0] sm:$0xff] }
  0x43   : > { %2961 = vmatprep.subr.bf16.mxu0 %v3202_v4  ;;  %405 = vst [vmem:[#allocation2 + $0x99] sm:$0xff] %v3439_v47  ;;  %406 = vst [vmem:[#allocation2 + $0xa9] sm:$0xff] %v3450_v54  ;;  %v346_v10 = vadd.f32 %v3316_v31, %v309_v0  ;;  %v3024_v16 = vpack.c.bf16 %v523_v62, %v522_v61  ;;  %v310_v18 = vmul.f32 %v3311_v30, %v273_v11  ;;  %v278_v45 = vld [vmem:[%s3239_s21 + $0xb8] sm:$0xff]  ;;  %v638_v49 = vld [vmem:[#allocation2 + $0x4a] sm:$0xff] }
  0x44   : > { %3014 = vmatpush3.bf16.msra.mxu1 %v3011_v58  ;;  %v271_v58 = vld [vmem:[%s3239_s21 + $0x80] sm:$0xff]  ;;  %407 = vst [vmem:[#allocation2 + $0xb1] sm:$0xff] %v3452_v55  ;;  %v3476_v6 = vmax.f32 %v343_v56, 0.0  ;;  %v3478_v7 = vmax.f32 %v344_v57, 0.0  ;;  %v311_v19 = vmul.f32 %v3311_v30, %v274_v14  ;;  %v312_v27 = vmul.f32 %v3311_v30, %v275_v20  ;;  %v527_v53 = vld [vmem:[%s4640_s2 + $0x28] sm:$0xff]  ;;  %v2481_v0 = vld [vmem:[%s4640_s2 + $0x230] sm:$0xff] }
  0x45   : > { %3016 = vmatprep.subr.bf16.mxu1 %v3015_v17  ;;  %v308_v63 = vmul.f32 %v3311_v30, %v271_v58  ;;  %v3501_v25 = vmax.f32 %v346_v10, 0.0  ;;  %v2971_v28 = vpack.c.bf16 %v2478_v5, %v2477_v3  ;;  %v347_v29 = vadd.f32 %v3316_v31, %v310_v18  ;;  %v526_v52 = vld [vmem:[%s4640_s2 + $0x20] sm:$0xff]  ;;  %v281_v14 = vld [vmem:[%s3239_s21 + $0xd0] sm:$0xff]  ;;  %v529_v18 = vld [vmem:[%s4640_s2 + $0x38] sm:$0xff] }
  0x46   : > { %2963 = vmatpush1.bf16.msra.mxu0 %v2962_v24  ;;  %408 = vst [vmem:[#allocation2 + $0xc1] sm:$0xff] %v3476_v6  ;;  %409 = vst [vmem:[#allocation2 + $0xc9] sm:$0xff] %v3478_v7  ;;  %v348_v32 = vadd.f32 %v3316_v31, %v311_v19  ;;  %v313_v34 = vmul.f32 %v3311_v30, %v276_v26  ;;  %v349_v39 = vadd.f32 %v3316_v31, %v312_v27  ;;  %v279_v62 = vld [vmem:[%s3239_s21 + $0xc0] sm:$0xff] }
  0x47   : > { %2964 = vmatprep.subr.bf16.mxu0 %v3202_v4  ;;  %v345_v9 = vadd.f32 %v3316_v31, %v308_v63  ;;  %411 = vst [vmem:[#allocation2 + $0xe1] sm:$0xff] %v3501_v25  ;;  %v3520_v42 = vmax.f32 %v347_v29, 0.0  ;;  %v314_v48 = vmul.f32 %v3311_v30, %v277_v40  ;;  %v315_v57 = vmul.f32 %v3311_v30, %v278_v45  ;;  %v280_v63 = vld [vmem:[%s3239_s21 + $0xc8] sm:$0xff]  ;;  %v283_v29 = vld [vmem:[%s3239_s21 + $0xe0] sm:$0xff] }
  0x48   : > { %3018 = vmatpush3.bf16.msra.mxu1 %v3015_v17  ;;  %v525_v17 = vld [vmem:[%s4640_s2 + $0x18] sm:$0xff]  ;;  %v3522_v43 = vmax.f32 %v348_v32, 0.0  ;;  %v350_v44 = vadd.f32 %v3316_v31, %v313_v34  ;;  %v3534_v56 = vmax.f32 %v349_v39, 0.0  ;;  %v316_v5 = vmul.f32 %v3311_v30, %v279_v62  ;;  %v2483_v32 = vld [vmem:[%s4640_s2 + $0x240] sm:$0xff]  ;;  %v2484_v34 = vld [vmem:[%s4640_s2 + $0x248] sm:$0xff] }
  0x49   : > { %3020 = vmatprep.subr.bf16.mxu1 %v3019_v41  ;;  %v3499_v24 = vmax.f32 %v345_v9, 0.0  ;;  %v3027_v35 = vpack.c.bf16 %v525_v17, %v3484_v8  ;;  %412 = vst [vmem:[#allocation2 + $0xf1] sm:$0xff] %v3520_v42  ;;  %v351_v61 = vadd.f32 %v3316_v31, %v314_v48  ;;  %v352_v3 = vadd.f32 %v3316_v31, %v315_v57  ;;  %v639_v9 = vld [vmem:[#allocation2 + $0x52] sm:$0xff]  ;;  %v284_v39 = vld [vmem:[%s3239_s21 + $0xe8] sm:$0xff]  ;;  %v530_v57 = vld [vmem:[%s4640_s2 + $0x40] sm:$0xff] }
  0x4a   : > { %2966 = vmatpush1.bf16.msra.mxu0 %v2965_v36  ;;  %v2479_v36 = vld [vmem:[%s4640_s2 + $0x220] sm:$0xff]  ;;  %413 = vst [vmem:[#allocation2 + $0xf9] sm:$0xff] %v3522_v43  ;;  %v3539_v59 = vmax.f32 %v350_v44, 0.0  ;;  %414 = vst [vmem:[#allocation2 + $0x109] sm:$0xff] %v3534_v56  ;;  %v317_v8 = vmul.f32 %v3311_v30, %v280_v63  ;;  %v3030_v10 = vpack.c.bf16 %v527_v53, %v526_v52  ;;  %v528_v17 = vld [vmem:[%s4640_s2 + $0x30] sm:$0xff] }
  0x4b   : > { %2967 = vmatprep.subr.bf16.mxu0 %v3202_v4  ;;  %410 = vst [vmem:[#allocation2 + $0xd9] sm:$0xff] %v3499_v24  ;;  %v2974_v58 = vpack.c.bf16 %v2480_v37, %v2479_v36  ;;  %v3556_v11 = vmax.f32 %v351_v61, 0.0  ;;  %v3567_v19 = vmax.f32 %v352_v3, 0.0  ;;  %v353_v20 = vadd.f32 %v3316_v31, %v316_v5  ;;  %v286_v52 = vld [vmem:[%s3239_s21 + $0xf8] sm:$0xff] }
  0x4c   : > { %3022 = vmatpush3.bf16.msra.mxu1 %v3019_v41  ;;  %v637_v41 = vld [vmem:[#allocation2 + $0x3a] sm:$0xff]  ;;  %415 = vst [vmem:[#allocation2 + $0x111] sm:$0xff] %v3539_v59  ;;  %v318_v26 = vmul.f32 %v3311_v30, %v281_v14  ;;  %v320_v40 = vmul.f32 %v3311_v30, %v283_v29  ;;  %v3033_v44 = vpack.c.bf16 %v529_v18, %v528_v17  ;;  %v644_v18 = vld [vmem:[#allocation2 + $0x92] sm:$0xff]  ;;  %v2488_v29 = vld [vmem:[%s4640_s2 + $0x268] sm:$0xff] }
  0x4d   : > { %3023 = vmatprep.subr.bf16.mxu1 %v3202_v4  ;;  %416 = vst [vmem:[#allocation2 + $0x121] sm:$0xff] %v3556_v11  ;;  %417 = vst [vmem:[#allocation2 + $0x129] sm:$0xff] %v3567_v19  ;;  %v321_v48 = vmul.f32 %v3311_v30, %v284_v39  ;;  %v642_v53 = vld [vmem:[#allocation2 + $0x7a] sm:$0xff] }
  0x4e   : > { %2969 = vmatpush1.bf16.msra.mxu0 %v2968_v2  ;;  %v2482_v2 = vld [vmem:[%s4640_s2 + $0x238] sm:$0xff]  ;;  %v355_v37 = vadd.f32 %v3316_v31, %v318_v26  ;;  %v357_v62 = vadd.f32 %v3316_v31, %v320_v40  ;;  %v534_v39 = vld [vmem:[%s4640_s2 + $0x60] sm:$0xff]  ;;  %v535_v40 = vld [vmem:[%s4640_s2 + $0x68] sm:$0xff] }
  0x4f   : > { %2736 = vmatmul.mubr.f32.vlgmr.msra.gmra.mrb[0].mxu1 %v635_v15  ;;  %2970 = vmatprep.subr.bf16.mxu0 %v3202_v4  ;;  %v282_v15 = vld [vmem:[%s3239_s21 + $0xd8] sm:$0xff]  ;;  %v2977_v27 = vpack.c.bf16 %v2482_v2, %v2481_v0  ;;  %v323_v0 = vmul.f32 %v3311_v30, %v286_v52  ;;  %v2980_v2 = vpack.c.bf16 %v2484_v34, %v2483_v32  ;;  %v554_v52 = vld [vmem:[%s4640_s2 + $0x100] sm:$0xff] }
  0x50   : > { %3025 = vmatpush1.bf16.msra.mxu1 %v3024_v16  ;;  %2738 = vmatprep.mubr.f32.mxu1 %v636_v23  ;;  %v640_v16 = vld [vmem:[#allocation2 + $0x62] sm:$0xff]  ;;  %v354_v23 = vadd.f32 %v3316_v31, %v317_v8  ;;  %v3603_v61 = vmax.f32 %v355_v37, 0.0  ;;  %v358_v5 = vadd.f32 %v3316_v31, %v321_v48  ;;  %v2485_v8 = vld [vmem:[%s4640_s2 + $0x250] sm:$0xff]  ;;  %v645_v32 = vld [vmem:[#allocation2 + $0x9a] sm:$0xff] }
  0x51   : > { %3026 = vmatprep.subr.bf16.mxu1 %v3202_v4  ;;  %v3625_v14 = vadd.f32 %v3316_v31, %v323_v0  ;;  %v646_v37 = vld [vmem:[#allocation2 + $0xaa] sm:$0xff]  ;;  %v647_v48 = vld [vmem:[#allocation2 + $0xb2] sm:$0xff] }
  0x52   : > { %2972 = vmatpush1.bf16.msra.mxu0 %v2971_v28  ;;  %v319_v28 = vmul.f32 %v3311_v30, %v282_v15  ;;  %v3585_v36 = vmax.f32 %v354_v23, 0.0  ;;  %420 = vst [vmem:[#allocation2 + $0x151] sm:$0xff] %v3603_v61  ;;  %v643_v15 = vld [vmem:[#allocation2 + $0x82] sm:$0xff]  ;;  %v3628_v17 = vmax.f32 %v358_v5, 0.0 }
  0x53   : > { %2739 = vmatmul.mubr.f32.gmra.mrb[2].mxu1 %v637_v41  ;;  %2973 = vmatprep.subr.bf16.mxu0 %v3202_v4  ;;  %v641_v41 = vld [vmem:[#allocation2 + $0x6a] sm:$0xff]  ;;  %v392_v26 = vmax.f32 %v3625_v14, 0.0 }
  0x54   : > { %3028 = vmatpush1.bf16.msra.mxu1 %v3027_v35  ;;  %2741 = vmatprep.mubr.f32.mxu1 %v638_v49  ;;  %v3583_v35 = vmax.f32 %v353_v20, 0.0  ;;  %v356_v45 = vadd.f32 %v3316_v31, %v319_v28  ;;  %v285_v49 = vld [vmem:[%s3239_s21 + $0xf0] sm:$0xff]  ;;  %419 = vst [vmem:[#allocation2 + $0x141] sm:$0xff] %v3585_v36  ;;  %423 = vst [vmem:[#allocation2 + $0x171] sm:$0xff] %v3628_v17  ;;  %v2487_v28 = vld [vmem:[%s4640_s2 + $0x260] sm:$0xff] }
  0x55   : > { %3029 = vmatprep.subr.bf16.mxu1 %v3202_v4  ;;  %v322_v63 = vmul.f32 %v3311_v30, %v285_v49  ;;  %v3619_v30 = vmax.f32 %v357_v62, 0.0  ;;  %v532_v20 = vld [vmem:[%s4640_s2 + $0x50] sm:$0xff]  ;;  %425 = vst [vmem:[#allocation2 + $0x189] sm:$0xff] %v392_v26  ;;  %v3042_v49 = vpack.c.bf16 %v535_v40, %v534_v39  ;;  %v537_v62 = vld [vmem:[%s4640_s2 + $0x78] sm:$0xff]  ;;  %v3710_v40 = vld [vmem:[#allocation2 + $0x20] sm:$0xff] }
  0x56   : > { %2975 = vmatpush1.bf16.msra.mxu0 %v2974_v58  ;;  %v531_v58 = vld [vmem:[%s4640_s2 + $0x48] sm:$0xff]  ;;  %418 = vst [vmem:[#allocation2 + $0x139] sm:$0xff] %v3583_v35  ;;  %v3608_v3 = vmax.f32 %v356_v45, 0.0  ;;  %v2490_v45 = vld [vmem:[%s4640_s2 + $0x278] sm:$0xff] }
  0x57   : > { %2742 = vmatmul.mubr.f32.gmra.mrb[4].mxu1 %v639_v9  ;;  %2976 = vmatprep.subr.bf16.mxu0 %v3202_v4  ;;  %v2486_v9 = vld [vmem:[%s4640_s2 + $0x258] sm:$0xff]  ;;  %422 = vst [vmem:[#allocation2 + $0x169] sm:$0xff] %v3619_v30  ;;  %v491_v14 = vld [vmem:[#allocation2 + $0xa] sm:$0xff] }
  0x58   : > { %3031 = vmatpush1.bf16.msra.mxu1 %v3030_v10  ;;  %2744 = vmatprep.mubr.f32.mxu1 %v640_v16  ;;  %v3622_v10 = vadd.f32 %v3316_v31, %v322_v63  ;;  %v3036_v16 = vpack.c.bf16 %v531_v58, %v530_v57  ;;  %421 = vst [vmem:[#allocation2 + $0x159] sm:$0xff] %v3608_v3  ;;  %v533_v31 = vld [vmem:[%s4640_s2 + $0x58] sm:$0xff]  ;;  %v648_v57 = vld [vmem:[#allocation2 + $0xc2] sm:$0xff]  ;;  %v536_v58 = vld [vmem:[%s4640_s2 + $0x70] sm:$0xff] }
  0x59   : > { %3032 = vmatprep.subr.bf16.mxu1 %v3202_v4  ;;  %v3039_v34 = vpack.c.bf16 %v533_v31, %v532_v20  ;;  %v3045_v5 = vpack.c.bf16 %v537_v62, %v536_v58  ;;  %v3693_v20 = vld [vmem:[#allocation2 + $0x18] sm:$0xff]  ;;  %v3727_v58 = vld [vmem:[#allocation2 + $0x30] sm:$0xff] }
  0x5a   : > { %2978 = vmatpush1.bf16.msra.mxu0 %v2977_v27  ;;  %v391_v23 = vmax.f32 %v3622_v10, 0.0  ;;  %v2983_v27 = vpack.c.bf16 %v2486_v9, %v2485_v8  ;;  %v556_v8 = vld [vmem:[%s4640_s2 + $0x110] sm:$0xff]  ;;  %v557_v9 = vld [vmem:[%s4640_s2 + $0x118] sm:$0xff] }
  0x5b   : > { %2745 = vmatmul.mubr.f32.gmra.mrb[6].mxu1 %v641_v41  ;;  %2979 = vmatprep.subr.bf16.mxu0 %v3202_v4  ;;  %v2986_v41 = vpack.c.bf16 %v2488_v29, %v2487_v28  ;;  %v3075_v31 = vpack.c.bf16 %v557_v9, %v556_v8  ;;  %v558_v29 = vld [vmem:[%s4640_s2 + $0x120] sm:$0xff]  ;;  %v541_v39 = vld [vmem:[%s4640_s2 + $0x98] sm:$0xff]  ;;  %v544_v9 = vld [vmem:[%s4640_s2 + $0xb0] sm:$0xff] }
  0x5c   : > { %3034 = vmatpush1.bf16.msra.mxu1 %v3033_v44  ;;  %2747 = vmatprep.mubr.f32.mxu1 %v642_v53  ;;  %424 = vst [vmem:[#allocation2 + $0x181] sm:$0xff] %v391_v23  ;;  %v2489_v44 = vld [vmem:[%s4640_s2 + $0x270] sm:$0xff]  ;;  %v555_v53 = vld [vmem:[%s4640_s2 + $0x108] sm:$0xff] }
  0x5d   : > { %3035 = vmatprep.subr.bf16.mxu1 %v3202_v4  ;;  %v2989_v63 = vpack.c.bf16 %v2490_v45, %v2489_v44  ;;  %v3071_v0 = vpack.c.bf16 %v555_v53, %v554_v52  ;;  %v653_v44 = vld [vmem:[#allocation2 + $0xfa] sm:$0xff]  ;;  %v654_v52 = vld [vmem:[#allocation2 + $0x10a] sm:$0xff]  ;;  %v656_v8 = vld [vmem:[#allocation2 + $0x122] sm:$0xff] }
  0x5e   : > { %2981 = vmatpush1.bf16.msra.mxu0 %v2980_v2  ;;  %v649_v2 = vld [vmem:[#allocation2 + $0xca] sm:$0xff]  ;;  %v542_v53 = vld [vmem:[%s4640_s2 + $0xa0] sm:$0xff] }
  0x5f   : > { %2748 = vmatmul.mubr.f32.gmra.mrb[8].mxu1 %v643_v15  ;;  %2982 = vmatprep.subr.bf16.mxu0 %v3202_v4  ;;  %v650_v15 = vld [vmem:[#allocation2 + $0xda] sm:$0xff]  ;;  %v2541_v10 = vld [vmem:[%s4640_s2 + $0x410] sm:$0xff] }
  0x60   : > { %3037 = vmatpush1.bf16.msra.mxu1 %v3036_v16  ;;  %2750 = vmatprep.mubr.f32.mxu1 %v644_v18  ;;  %v538_v16 = vld [vmem:[%s4640_s2 + $0x80] sm:$0xff]  ;;  %v539_v18 = vld [vmem:[%s4640_s2 + $0x88] sm:$0xff] }
  0x61   : > { %3038 = vmatprep.subr.bf16.mxu1 %v3202_v4  ;;  %v3048_v28 = vpack.c.bf16 %v539_v18, %v538_v16  ;;  %v3744_v16 = vld [vmem:[#allocation2 + $0x38] sm:$0xff] }
  0x62   : > { %2984 = vmatpush1.bf16.msra.mxu0 %v2983_v27  ;;  %v651_v27 = vld [vmem:[#allocation2 + $0xe2] sm:$0xff] }
  0x63   : > { %2751 = vmatmul.mubr.f32.gmra.mrb[10].mxu1 %v645_v32  ;;  %2985 = vmatprep.subr.bf16.mxu0 %v3202_v4  ;;  %v559_v32 = vld [vmem:[%s4640_s2 + $0x128] sm:$0xff] }
  0x64   : > { %3040 = vmatpush1.bf16.msra.mxu1 %v3039_v34  ;;  %2753 = vmatprep.mubr.f32.mxu1 %v646_v37  ;;  %v652_v34 = vld [vmem:[#allocation2 + $0xf2] sm:$0xff] }
  0x65   : > { %3041 = vmatprep.subr.bf16.mxu1 %v3202_v4  ;;  %v540_v37 = vld [vmem:[%s4640_s2 + $0x90] sm:$0xff] }
  0x66   : > { %2987 = vmatpush1.bf16.msra.mxu0 %v2986_v41  ;;  %v3079_v41 = vpack.c.bf16 %v559_v32, %v558_v29  ;;  %v3051_v45 = vpack.c.bf16 %v541_v39, %v540_v37  ;;  %v565_v29 = vld [vmem:[%s4640_s2 + $0x158] sm:$0xff]  ;;  %v547_v37 = vld [vmem:[%s4640_s2 + $0xc8] sm:$0xff] }
  0x67   : > { %2754 = vmatmul.mubr.f32.gmra.mrb[12].mxu1 %v647_v48  ;;  %2988 = vmatprep.subr.bf16.mxu0 %v3202_v4  ;;  %v560_v48 = vld [vmem:[%s4640_s2 + $0x130] sm:$0xff]  ;;  %v658_v32 = vld [vmem:[#allocation2 + $0x13a] sm:$0xff]  ;;  %v3761_v39 = vld [vmem:[#allocation2 + $0x48] sm:$0xff] }
  0x68   : > { %3043 = vmatpush1.bf16.msra.mxu1 %v3042_v49  ;;  %2756 = vmatprep.mubr.f32.mxu1 %v648_v57  ;;  %v561_v49 = vld [vmem:[%s4640_s2 + $0x138] sm:$0xff]  ;;  %v543_v57 = vld [vmem:[%s4640_s2 + $0xa8] sm:$0xff] }
  0x69   : > { %3044 = vmatprep.subr.bf16.mxu1 %v3202_v4  ;;  %v3083_v62 = vpack.c.bf16 %v561_v49, %v560_v48  ;;  %v566_v48 = vld [vmem:[%s4640_s2 + $0x160] sm:$0xff]  ;;  %v567_v49 = vld [vmem:[%s4640_s2 + $0x168] sm:$0xff] }
  0x6a   : > { %2990 = vmatpush1.bf16.msra.mxu0 %v2989_v63  ;;  %v655_v63 = vld [vmem:[#allocation2 + $0x112] sm:$0xff] }
  0x6b   : > { %2757 = vmatmul.mubr.f32.gmra.mrb[14].mxu1 %v649_v2  ;;  %3072 = vmatprep.subr.bf16.mxu0 %v3071_v0  ;;  %v562_v2 = vld [vmem:[%s4640_s2 + $0x140] sm:$0xff] }
  0x6c   : > { %3046 = vmatpush1.bf16.msra.mxu1 %v3045_v5  ;;  %2759 = vmatprep.mubr.f32.mxu1 %v650_v15  ;;  %v563_v5 = vld [vmem:[%s4640_s2 + $0x148] sm:$0xff]  ;;  %v545_v15 = vld [vmem:[%s4640_s2 + $0xb8] sm:$0xff] }
  0x6d   : > { %780 = vmatmul.mubr.f32.vlgmr.msra.gmra.mrb[0].mxu0 %v3693_v20  ;;  %3047 = vmatprep.subr.bf16.mxu1 %v3202_v4  ;;  %v3087_v18 = vpack.c.bf16 %v563_v5, %v562_v2  ;;  %v568_v5 = vld [vmem:[%s4640_s2 + $0x170] sm:$0xff] }
  0x6e   : > { %784 = vmatprep.mubr.f32.mxu0 %v3350_v51  ;;  %3074 = vmatpush3.bf16.msra.mxu0 %v3071_v0  ;;  %v3054_v0 = vpack.c.bf16 %v543_v57, %v542_v53  ;;  %v548_v53 = vld [vmem:[%s4640_s2 + $0xd0] sm:$0xff]  ;;  %v549_v57 = vld [vmem:[%s4640_s2 + $0xd8] sm:$0xff] }
  0x6f   : > { %2760 = vmatmul.mubr.f32.gmra.mrb[16].mxu1 %v651_v27  ;;  %3076 = vmatprep.subr.bf16.mxu0 %v3075_v31  ;;  %v3057_v27 = vpack.c.bf16 %v545_v15, %v544_v9  ;;  %v3063_v2 = vpack.c.bf16 %v549_v57, %v548_v53  ;;  %v3793_v9 = vld [vmem:[#allocation2 + $0x16a] sm:$0xff]  ;;  %v550_v15 = vld [vmem:[%s4640_s2 + $0xe0] sm:$0xff]  ;;  %v3829_v57 = vld [vmem:[#allocation2 + $0x78] sm:$0xff] }
  0x70   : > { %3049 = vmatpush1.bf16.msra.mxu1 %v3048_v28  ;;  %2762 = vmatprep.mubr.f32.mxu1 %v652_v34  ;;  %v564_v28 = vld [vmem:[%s4640_s2 + $0x150] sm:$0xff]  ;;  %v546_v34 = vld [vmem:[%s4640_s2 + $0xc0] sm:$0xff]  ;;  %v2508_v53 = vld [vmem:[%s4640_s2 + $0x308] sm:$0xff] }
  0x71   : > { %785 = vmatmul.mubr.f32.gmra.mrb[2].mxu0 %v3710_v40  ;;  %3050 = vmatprep.subr.bf16.mxu1 %v3202_v4 }
  0x72   : > { %789 = vmatprep.mubr.f32.mxu0 %v3363_v60  ;;  %3078 = vmatpush3.bf16.msra.mxu0 %v3075_v31  ;;  %v657_v31 = vld [vmem:[#allocation2 + $0x12a] sm:$0xff] }
  0x73   : > { %2763 = vmatmul.mubr.f32.gmra.mrb[18].mxu1 %v653_v44  ;;  %3080 = vmatprep.subr.bf16.mxu0 %v3079_v41  ;;  %v659_v44 = vld [vmem:[#allocation2 + $0x142] sm:$0xff] }
  0x74   : > { %3052 = vmatpush1.bf16.msra.mxu1 %v3051_v45  ;;  %2765 = vmatprep.mubr.f32.mxu1 %v654_v52  ;;  %v3060_v45 = vpack.c.bf16 %v547_v37, %v546_v34  ;;  %v3771_v52 = vld [vmem:[#allocation2 + $0x152] sm:$0xff] }
  0x75   : > { %790 = vmatmul.mubr.f32.gmra.mrb[4].mxu0 %v3727_v58  ;;  %3053 = vmatprep.subr.bf16.mxu1 %v3202_v4  ;;  %v552_v34 = vld [vmem:[%s4640_s2 + $0xf0] sm:$0xff]  ;;  %v553_v37 = vld [vmem:[%s4640_s2 + $0xf8] sm:$0xff] }
  0x76   : > { %794 = vmatprep.mubr.f32.mxu0 %v3371_v1  ;;  %3082 = vmatpush3.bf16.msra.mxu0 %v3079_v41  ;;  %v3091_v41 = vpack.c.bf16 %v565_v29, %v564_v28  ;;  %v3806_v28 = vld [vmem:[#allocation2 + $0x172] sm:$0xff] }
  0x77   : > { %2766 = vmatmul.mubr.f32.gmra.mrb[20].mxu1 %v655_v63  ;;  %3084 = vmatprep.subr.bf16.mxu0 %v3083_v62  ;;  %v3095_v63 = vpack.c.bf16 %v567_v49, %v566_v48  ;;  %v458_v48 = vld [vmem:[#allocation2 + $0x1] sm:$0xff] }
  0x78   : > { %3055 = vmatpush1.bf16.msra.mxu1 %v3054_v0  ;;  %2768 = vmatprep.mubr.f32.mxu1 %v656_v8  ;;  %v3783_v0 = vld [vmem:[#allocation2 + $0x15a] sm:$0xff] }
  0x79   : > { %795 = vmatmul.mubr.f32.gmra.mrb[6].mxu0 %v3744_v16  ;;  %3056 = vmatprep.subr.bf16.mxu1 %v3202_v4  ;;  %v569_v8 = vld [vmem:[%s4640_s2 + $0x178] sm:$0xff]  ;;  %v2507_v49 = vld [vmem:[%s4640_s2 + $0x300] sm:$0xff] }
  0x7a   : > { %799 = vmatprep.mubr.f32.mxu0 %v3389_v12  ;;  %3086 = vmatpush3.bf16.msra.mxu0 %v3083_v62  ;;  %v3780_v62 = vld [vmem:[#allocation2 + $0x50] sm:$0xff] }
  0x7b   : > { %2769 = vmatmul.mubr.f32.gmra.mrb[22].mxu1 %v657_v31  ;;  %3088 = vmatprep.subr.bf16.mxu0 %v3087_v18  ;;  %v3802_v31 = vld [vmem:[#allocation2 + $0x60] sm:$0xff] }
  0x7c   : > { %3058 = vmatpush1.bf16.msra.mxu1 %v3057_v27  ;;  %2771 = vmatprep.mubr.f32.mxu1 %v658_v32  ;;  %v3099_v27 = vpack.c.bf16 %v569_v8, %v568_v5  ;;  %v664_v32 = vld [vmem:[#allocation2 + $0x182] sm:$0xff]  ;;  %v3104_v8 = vpack.c.bf16 %v2508_v53, %v2507_v49  ;;  %v2513_v53 = vld [vmem:[%s4640_s2 + $0x330] sm:$0xff] }
  0x7d   : > { %800 = vmatmul.mubr.f32.gmra.mrb[8].mxu0 %v3761_v39  ;;  %3059 = vmatprep.subr.bf16.mxu1 %v3202_v4  ;;  %v426_v5 = vld [vmem:[#allocation2] sm:$0xff] }
  0x7e   : > { %804 = vmatprep.mubr.f32.mxu0 %v3391_v13  ;;  %3090 = vmatpush3.bf16.msra.mxu0 %v3087_v18  ;;  %v551_v18 = vld [vmem:[%s4640_s2 + $0xe8] sm:$0xff] }
  0x7f   : > { %2772 = vmatmul.mubr.f32.gmra.mrb[24].mxu1 %v659_v44  ;;  %3092 = vmatprep.subr.bf16.mxu0 %v3091_v41  ;;  %v3066_v29 = vpack.c.bf16 %v551_v18, %v550_v15  ;;  %v665_v44 = vld [vmem:[#allocation2 + $0x18a] sm:$0xff] }
  0x80   : > { %3061 = vmatpush1.bf16.msra.mxu1 %v3060_v45  ;;  %2774 = vmatprep.mubr.f32.mxu1 %v3771_v52  ;;  %v3069_v45 = vpack.c.bf16 %v553_v37, %v552_v34  ;;  %v459_v18 = vld [vmem:[#allocation2 + $0x9] sm:$0xff] }
  0x81   : > { %805 = vmatmul.mubr.f32.gmra.mrb[10].mxu0 %v3780_v62  ;;  %3062 = vmatprep.subr.bf16.mxu1 %v3202_v4  ;;  %v427_v34 = vld [vmem:[#allocation2 + $0x8] sm:$0xff] }
  0x82   : > { %809 = vmatprep.mubr.f32.mxu0 %v3405_v21  ;;  %3094 = vmatpush3.bf16.msra.mxu0 %v3091_v41  ;;  %v3817_v41 = vld [vmem:[#allocation2 + $0x68] sm:$0xff] }
  0x83   : > { %2775 = vmatmul.mubr.f32.gmra.mrb[26].mxu1 %v3783_v0  ;;  %3096 = vmatprep.subr.bf16.mxu0 %v3095_v63 }
  0x84   : > { %3064 = vmatpush1.bf16.msra.mxu1 %v3063_v2  ;;  %2777 = vmatprep.mubr.f32.mxu1 %v3793_v9  ;;  %v2540_v2 = vld [vmem:[%s4640_s2 + $0x408] sm:$0xff] }
  0x85   : > { %810 = vmatmul.mubr.f32.gmra.mrb[12].mxu0 %v3802_v31  ;;  %3065 = vmatprep.subr.bf16.mxu1 %v3202_v4 }
  0x86   : > { %814 = vmatprep.mubr.f32.mxu0 %v3407_v22  ;;  %3098 = vmatpush3.bf16.msra.mxu0 %v3095_v63  ;;  %v2539_v63 = vld [vmem:[%s4640_s2 + $0x400] sm:$0xff] }
  0x87   : > { %2778 = vmatmul.mubr.f32.gmra.mrb[28].mxu1 %v3806_v28  ;;  %3100 = vmatprep.subr.bf16.mxu0 %v3099_v27  ;;  %v3837_v15 = vpack.c.bf16 %v2540_v2, %v2539_v63  ;;  %v2514_v63 = vld [vmem:[%s4640_s2 + $0x338] sm:$0xff] }
  0x88   : > { %3067 = vmatpush1.bf16.msra.mxu1 %v3066_v29  ;;  %2780 = vmatprep.mubr.f32.mxu1 %v664_v32  ;;  %v2510_v29 = vld [vmem:[%s4640_s2 + $0x318] sm:$0xff]  ;;  %v3848_v32 = vld [vmem:[#allocation2 + $0x80] sm:$0xff] }
  0x89   : > { %815 = vmatmul.mubr.f32.gmra.mrb[14].mxu0 %v3817_v41  ;;  %3068 = vmatprep.subr.bf16.mxu1 %v3202_v4  ;;  %v3872_v2 = vld [vmem:[#allocation2 + $0x98] sm:$0xff] }
  0x8a   : > { %819 = vmatprep.mubr.f32.mxu0 %v3423_v33  ;;  %3102 = vmatpush3.bf16.msra.mxu0 %v3099_v27  ;;  %v2509_v27 = vld [vmem:[%s4640_s2 + $0x310] sm:$0xff] }
  0x8b   : > { %2781 = vmatmul.mubr.f32.gmra.mrb[30].mxu1 %v665_v44  ;;  %3152 = vmatprep.subr.bf16.mxu0 %v3837_v15  ;;  %v3107_v37 = vpack.c.bf16 %v2510_v29, %v2509_v27  ;;  %v2511_v44 = vld [vmem:[%s4640_s2 + $0x320] sm:$0xff]  ;;  %v2518_v27 = vld [vmem:[%s4640_s2 + $0x358] sm:$0xff]  ;;  %v3898_v29 = vld [vmem:[#allocation2 + $0xb0] sm:$0xff] }
  0x8c   : > { %3070 = vmatpush1.bf16.msra.mxu1 %v3069_v45  ;;  %1229 = vmatprep.mubr.f32.mxu1 %v458_v48  ;;  %v2512_v45 = vld [vmem:[%s4640_s2 + $0x328] sm:$0xff]  ;;  %v3860_v48 = vld [vmem:[#allocation2 + $0x90] sm:$0xff] }
  0x8d   : > { %820 = vmatmul.mubr.f32.gmra.mrb[16].mxu0 %v3829_v57  ;;  %3103 = vmatprep.subr.bf16.mxu1 %v3202_v4  ;;  %v3110_v49 = vpack.c.bf16 %v2512_v45, %v2511_v44  ;;  %v2522_v44 = vld [vmem:[%s4640_s2 + $0x378] sm:$0xff]  ;;  %v3924_v45 = vld [vmem:[#allocation2 + $0xc8] sm:$0xff] }
  0x8e   : > { %824 = vmatprep.mubr.f32.mxu0 %v3427_v38 }
  0x8f   : > { %1230 = vmatmul.mubr.f32.vlgmr.msra.gmra.mrb[32].mxu1 %v426_v5  ;;  %v2515_v5 = vld [vmem:[%s4640_s2 + $0x340] sm:$0xff] }
  0x90   : > { %3105 = vmatpush1.bf16.msra.mxu1 %v3104_v8  ;;  %1234 = vmatprep.mubr.f32.mxu1 %v459_v18  ;;  %v2516_v8 = vld [vmem:[%s4640_s2 + $0x348] sm:$0xff] }
  0x91   : > { %825 = vmatmul.mubr.f32.gmra.mrb[18].mxu0 %v3848_v32  ;;  %3106 = vmatprep.subr.bf16.mxu1 %v3202_v4  ;;  %v3885_v18 = vld [vmem:[#allocation2 + $0xa8] sm:$0xff] }
  0x92   : > { %829 = vmatprep.mubr.f32.mxu0 %v3437_v46 }
  0x93   : > { %1235 = vmatmul.mubr.f32.gmra.mrb[34].mxu1 %v427_v34  ;;  %v2520_v34 = vld [vmem:[%s4640_s2 + $0x368] sm:$0xff] }
  0x94   : > { %1239 = vmatprep.mubr.f32.mxu1 %v3348_v50  ;;  %3108 = vmatpush1.bf16.msra.mxu1 %v3107_v37  ;;  %v3113_v50 = vpack.c.bf16 %v2514_v63, %v2513_v53  ;;  %v3911_v37 = vld [vmem:[#allocation2 + $0xc0] sm:$0xff]  ;;  %v2524_v53 = vld [vmem:[%s4640_s2 + $0x388] sm:$0xff]  ;;  %v3937_v63 = vld [vmem:[#allocation2 + $0xd8] sm:$0xff] }
  0x95   : > { %830 = vmatmul.mubr.f32.gmra.mrb[20].mxu0 %v3860_v48  ;;  %3109 = vmatprep.subr.bf16.mxu1 %v3202_v4 }
  0x96   : > { %834 = vmatprep.mubr.f32.mxu0 %v3439_v47 }
  0x97   : > { %1240 = vmatmul.mubr.f32.gmra.mrb[36].mxu1 %v3693_v20  ;;  %v2517_v20 = vld [vmem:[%s4640_s2 + $0x350] sm:$0xff] }
  0x98   : > { %1244 = vmatprep.mubr.f32.mxu1 %v3350_v51  ;;  %3111 = vmatpush1.bf16.msra.mxu1 %v3110_v49  ;;  %v3116_v51 = vpack.c.bf16 %v2516_v8, %v2515_v5  ;;  %v2523_v49 = vld [vmem:[%s4640_s2 + $0x380] sm:$0xff]  ;;  %v2526_v5 = vld [vmem:[%s4640_s2 + $0x398] sm:$0xff] }
  0x99   : > { %835 = vmatmul.mubr.f32.gmra.mrb[22].mxu0 %v3872_v2  ;;  %3112 = vmatprep.subr.bf16.mxu1 %v3202_v4  ;;  %v3950_v8 = vld [vmem:[#allocation2 + $0xe0] sm:$0xff] }
  0x9a   : > { %839 = vmatprep.mubr.f32.mxu0 %v3450_v54 }
  0x9b   : > { %1245 = vmatmul.mubr.f32.gmra.mrb[38].mxu1 %v3710_v40  ;;  %v2519_v40 = vld [vmem:[%s4640_s2 + $0x360] sm:$0xff] }
  0x9c   : > { %1249 = vmatprep.mubr.f32.mxu1 %v3363_v60  ;;  %3114 = vmatpush1.bf16.msra.mxu1 %v3113_v50  ;;  %v3119_v60 = vpack.c.bf16 %v2518_v27, %v2517_v20  ;;  %v2525_v50 = vld [vmem:[%s4640_s2 + $0x390] sm:$0xff]  ;;  %v2528_v20 = vld [vmem:[%s4640_s2 + $0x3a8] sm:$0xff] }
  0x9d   : > { %840 = vmatmul.mubr.f32.gmra.mrb[24].mxu0 %v3885_v18  ;;  %3115 = vmatprep.subr.bf16.mxu1 %v3202_v4  ;;  %v3963_v27 = vld [vmem:[#allocation2 + $0xf0] sm:$0xff] }
  0x9e   : > { %844 = vmatprep.mubr.f32.mxu0 %v3452_v55 }
  0x9f   : > { %1250 = vmatmul.mubr.f32.gmra.mrb[40].mxu1 %v3727_v58  ;;  %v2521_v58 = vld [vmem:[%s4640_s2 + $0x370] sm:$0xff] }
  0xa0   : > { %1254 = vmatprep.mubr.f32.mxu1 %v3371_v1  ;;  %3117 = vmatpush1.bf16.msra.mxu1 %v3116_v51  ;;  %v3122_v1 = vpack.c.bf16 %v2520_v34, %v2519_v40  ;;  %v2527_v51 = vld [vmem:[%s4640_s2 + $0x3a0] sm:$0xff]  ;;  %v2530_v40 = vld [vmem:[%s4640_s2 + $0x3b8] sm:$0xff] }
  0xa1   : > { %845 = vmatmul.mubr.f32.gmra.mrb[26].mxu0 %v3898_v29  ;;  %3118 = vmatprep.subr.bf16.mxu1 %v3202_v4  ;;  %v3976_v34 = vld [vmem:[#allocation2 + $0xf8] sm:$0xff] }
  0xa2   : > { %849 = vmatprep.mubr.f32.mxu0 %v3476_v6 }
  0xa3   : > { %1255 = vmatmul.mubr.f32.gmra.mrb[42].mxu1 %v3744_v16 }
  0xa4   : > { %1259 = vmatprep.mubr.f32.mxu1 %v3389_v12  ;;  %3120 = vmatpush1.bf16.msra.mxu1 %v3119_v60  ;;  %v3125_v12 = vpack.c.bf16 %v2522_v44, %v2521_v58  ;;  %v2529_v60 = vld [vmem:[%s4640_s2 + $0x3b0] sm:$0xff]  ;;  %v2532_v58 = vld [vmem:[%s4640_s2 + $0x3c8] sm:$0xff] }
  0xa5   : > { %850 = vmatmul.mubr.f32.gmra.mrb[28].mxu0 %v3911_v37  ;;  %3121 = vmatprep.subr.bf16.mxu1 %v3202_v4  ;;  %v3989_v44 = vld [vmem:[#allocation2 + $0x108] sm:$0xff] }
  0xa6   : > { %854 = vmatprep.mubr.f32.mxu0 %v3478_v7 }
  0xa7   : > { %1260 = vmatmul.mubr.f32.gmra.mrb[44].mxu1 %v3761_v39 }
  0xa8   : > { %1264 = vmatprep.mubr.f32.mxu1 %v3391_v13  ;;  %3123 = vmatpush1.bf16.msra.mxu1 %v3122_v1  ;;  %v3128_v13 = vpack.c.bf16 %v2524_v53, %v2523_v49  ;;  %v2531_v1 = vld [vmem:[%s4640_s2 + $0x3c0] sm:$0xff]  ;;  %v2534_v49 = vld [vmem:[%s4640_s2 + $0x3d8] sm:$0xff]  ;;  %v4002_v53 = vld [vmem:[#allocation2 + $0x110] sm:$0xff] }
  0xa9   : > { %855 = vmatmul.mubr.f32.gmra.mrb[30].mxu0 %v3924_v45  ;;  %3124 = vmatprep.subr.bf16.mxu1 %v3202_v4 }
  0xaa   : > { %859 = vmatprep.mubr.f32.mxu0 %v3499_v24 }
  0xab   : > { %1265 = vmatmul.mubr.f32.gmra.mrb[46].mxu1 %v3780_v62 }
  0xac   : > { %1269 = vmatprep.mubr.f32.mxu1 %v3405_v21  ;;  %3126 = vmatpush1.bf16.msra.mxu1 %v3125_v12  ;;  %v3131_v21 = vpack.c.bf16 %v2526_v5, %v2525_v50  ;;  %v2533_v12 = vld [vmem:[%s4640_s2 + $0x3d0] sm:$0xff]  ;;  %v2536_v50 = vld [vmem:[%s4640_s2 + $0x3e8] sm:$0xff]  ;;  %v4015_v5 = vld [vmem:[#allocation2 + $0x120] sm:$0xff] }
  0xad   : > { %860 = vmatmul.mubr.f32.gmra.mrb[32].mxu0 %v3937_v63  ;;  %3127 = vmatprep.subr.bf16.mxu1 %v3202_v4 }
  0xae   : > { %864 = vmatprep.mubr.f32.mxu0 %v3501_v25 }
  0xaf   : > { %1270 = vmatmul.mubr.f32.gmra.mrb[48].mxu1 %v3802_v31 }
  0xb0   : > { %1274 = vmatprep.mubr.f32.mxu1 %v3407_v22  ;;  %3129 = vmatpush1.bf16.msra.mxu1 %v3128_v13  ;;  %v3134_v22 = vpack.c.bf16 %v2528_v20, %v2527_v51  ;;  %v2535_v13 = vld [vmem:[%s4640_s2 + $0x3e0] sm:$0xff]  ;;  %v2538_v51 = vld [vmem:[%s4640_s2 + $0x3f8] sm:$0xff]  ;;  %v4028_v20 = vld [vmem:[#allocation2 + $0x128] sm:$0xff] }
  0xb1   : > { %865 = vmatmul.mubr.f32.gmra.mrb[34].mxu0 %v3950_v8  ;;  %3130 = vmatprep.subr.bf16.mxu1 %v3202_v4 }
  0xb2   : > { %869 = vmatprep.mubr.f32.mxu0 %v3520_v42 }
  0xb3   : > { %1275 = vmatmul.mubr.f32.gmra.mrb[50].mxu1 %v3817_v41 }
  0xb4   : > { %1279 = vmatprep.mubr.f32.mxu1 %v3423_v33  ;;  %3132 = vmatpush1.bf16.msra.mxu1 %v3131_v21  ;;  %v3137_v33 = vpack.c.bf16 %v2530_v40, %v2529_v60  ;;  %v2537_v21 = vld [vmem:[%s4640_s2 + $0x3f0] sm:$0xff]  ;;  %v2544_v60 = vld [vmem:[%s4640_s2 + $0x428] sm:$0xff] }
  0xb5   : > { %870 = vmatmul.mubr.f32.gmra.mrb[36].mxu0 %v3963_v27  ;;  %3133 = vmatprep.subr.bf16.mxu1 %v3202_v4  ;;  %v493_v40 = vld [vmem:[#allocation2 + $0x22] sm:$0xff] }
  0xb6   : > { %874 = vmatprep.mubr.f32.mxu0 %v3522_v43 }
  0xb7   : > { %1280 = vmatmul.mubr.f32.gmra.mrb[52].mxu1 %v3829_v57 }
  0xb8   : > { %1284 = vmatprep.mubr.f32.mxu1 %v3427_v38  ;;  %3135 = vmatpush1.bf16.msra.mxu1 %v3134_v22  ;;  %v3140_v38 = vpack.c.bf16 %v2532_v58, %v2531_v1  ;;  %v4035_v22 = vld [vmem:[#allocation2 + $0x138] sm:$0xff] }
  0xb9   : > { %875 = vmatmul.mubr.f32.gmra.mrb[38].mxu0 %v3976_v34  ;;  %3136 = vmatprep.subr.bf16.mxu1 %v3202_v4  ;;  %v2546_v58 = vld [vmem:[%s4640_s2 + $0x438] sm:$0xff] }
  0xba   : > { %879 = vmatprep.mubr.f32.mxu0 %v3534_v56 }
  0xbb   : > { %1285 = vmatmul.mubr.f32.gmra.mrb[54].mxu1 %v3848_v32 }
  0xbc   : > { %1289 = vmatprep.mubr.f32.mxu1 %v3437_v46  ;;  %3138 = vmatpush1.bf16.msra.mxu1 %v3137_v33  ;;  %v3143_v46 = vpack.c.bf16 %v2534_v49, %v2533_v12  ;;  %v4100_v33 = vld [vmem:[#allocation2 + $0x32] sm:$0xff]  ;;  %v2547_v12 = vld [vmem:[%s4640_s2 + $0x440] sm:$0xff]  ;;  %v2548_v49 = vld [vmem:[%s4640_s2 + $0x448] sm:$0xff] }
  0xbd   : > { %880 = vmatmul.mubr.f32.gmra.mrb[40].mxu0 %v3989_v44  ;;  %3139 = vmatprep.subr.bf16.mxu1 %v3202_v4 }
  0xbe   : > { %884 = vmatprep.mubr.f32.mxu0 %v3539_v59 }
  0xbf   : > { %1290 = vmatmul.mubr.f32.gmra.mrb[56].mxu1 %v3860_v48 }
  0xc0   : > { %1294 = vmatprep.mubr.f32.mxu1 %v3439_v47  ;;  %3141 = vmatpush1.bf16.msra.mxu1 %v3140_v38  ;;  %v3146_v47 = vpack.c.bf16 %v2536_v50, %v2535_v13  ;;  %v4113_v38 = vld [vmem:[#allocation2 + $0x4a] sm:$0xff]  ;;  %v4127_v13 = vld [vmem:[#allocation2 + $0x62] sm:$0xff] }
  0xc1   : > { %885 = vmatmul.mubr.f32.gmra.mrb[42].mxu0 %v4002_v53  ;;  %3142 = vmatprep.subr.bf16.mxu1 %v3202_v4  ;;  %v2549_v50 = vld [vmem:[%s4640_s2 + $0x450] sm:$0xff] }
  0xc2   : > { %889 = vmatprep.mubr.f32.mxu0 %v3556_v11 }
  0xc3   : > { %1295 = vmatmul.mubr.f32.gmra.mrb[58].mxu1 %v3872_v2 }
  0xc4   : > { %1299 = vmatprep.mubr.f32.mxu1 %v3450_v54  ;;  %3144 = vmatpush1.bf16.msra.mxu1 %v3143_v46  ;;  %v3149_v54 = vpack.c.bf16 %v2538_v51, %v2537_v21  ;;  %v4124_v46 = vld [vmem:[#allocation2 + $0x52] sm:$0xff]  ;;  %v4138_v21 = vld [vmem:[#allocation2 + $0x6a] sm:$0xff]  ;;  %v4141_v51 = vld [vmem:[#allocation2 + $0x7a] sm:$0xff] }
  0xc5   : > { %890 = vmatmul.mubr.f32.gmra.mrb[44].mxu0 %v4015_v5  ;;  %3145 = vmatprep.subr.bf16.mxu1 %v3202_v4 }
  0xc6   : > { %894 = vmatprep.mubr.f32.mxu0 %v3567_v19 }
  0xc7   : > { %1300 = vmatmul.mubr.f32.gmra.mrb[60].mxu1 %v3885_v18 }
  0xc8   : > { %1304 = vmatprep.mubr.f32.mxu1 %v3452_v55  ;;  %3147 = vmatpush1.bf16.msra.mxu1 %v3146_v47  ;;  %v4041_v55 = vld [vmem:[#allocation2 + $0x140] sm:$0xff]  ;;  %v2550_v47 = vld [vmem:[%s4640_s2 + $0x458] sm:$0xff] }
  0xc9   : > { %895 = vmatmul.mubr.f32.gmra.mrb[46].mxu0 %v4028_v20  ;;  %3148 = vmatprep.subr.bf16.mxu1 %v3202_v4  ;;  %v4047_v4 = vld [vmem:[#allocation2 + $0x150] sm:$0xff] }
  0xca   : > { %899 = vmatprep.mubr.f32.mxu0 %v3583_v35 }
  0xcb   : > { %1305 = vmatmul.mubr.f32.gmra.mrb[62].mxu1 %v3898_v29 }
  0xcc   : > { %1309 = vmatprep.mubr.f32.mxu1 %v3476_v6  ;;  %3150 = vmatpush1.bf16.msra.mxu1 %v3149_v54  ;;  %v4053_v6 = vld [vmem:[#allocation2 + $0x158] sm:$0xff]  ;;  %v2551_v54 = vld [vmem:[%s4640_s2 + $0x460] sm:$0xff] }
  0xcd   : > { %900 = vmatmul.mubr.f32.gmra.mrb[48].mxu0 %v4035_v22 }
  0xce   : > { %904 = vmatprep.mubr.f32.mxu0 %v3585_v36 }
  0xcf   : > { %1310 = vmatmul.mubr.f32.gmra.mrb[64].mxu1 %v3911_v37 }
  0xd0   : > { %1314 = vmatprep.mubr.f32.mxu1 %v3478_v7  ;;  %v4059_v7 = vld [vmem:[#allocation2 + $0x168] sm:$0xff] }
  0xd1   : > { %905 = vmatmul.mubr.f32.gmra.mrb[50].mxu0 %v4041_v55 }
  0xd2   : > { %909 = vmatprep.mubr.f32.mxu0 %v3603_v61 }
  0xd3   : > { %1315 = vmatmul.mubr.f32.gmra.mrb[66].mxu1 %v3924_v45 }
  0xd4   : > { %1319 = vmatprep.mubr.f32.mxu1 %v3499_v24  ;;  %v4065_v24 = vld [vmem:[#allocation2 + $0x170] sm:$0xff] }
  0xd5   : > { %910 = vmatmul.mubr.f32.gmra.mrb[52].mxu0 %v4047_v4 }
  0xd6   : > { %914 = vmatprep.mubr.f32.mxu0 %v3608_v3 }
  0xd7   : > { %1320 = vmatmul.mubr.f32.gmra.mrb[68].mxu1 %v3937_v63 }
  0xd8   : > { %1324 = vmatprep.mubr.f32.mxu1 %v3501_v25  ;;  %v4072_v25 = vld [vmem:[#allocation2 + $0x180] sm:$0xff] }
  0xd9   : > { %915 = vmatmul.mubr.f32.gmra.mrb[54].mxu0 %v4053_v6 }
  0xda   : > { %919 = vmatprep.mubr.f32.mxu0 %v3619_v30 }
  0xdb   : > { %1325 = vmatmul.mubr.f32.gmra.mrb[70].mxu1 %v3950_v8 }
  0xdc   : > { %1329 = vmatprep.mubr.f32.mxu1 %v3520_v42  ;;  %v4079_v42 = vld [vmem:[#allocation2 + $0x188] sm:$0xff] }
  0xdd   : > { %920 = vmatmul.mubr.f32.gmra.mrb[56].mxu0 %v4059_v7 }
  0xde   : > { %924 = vmatprep.mubr.f32.mxu0 %v3628_v17 }
  0xdf   : > { %1330 = vmatmul.mubr.f32.gmra.mrb[72].mxu1 %v3963_v27 }
  0xe0   : > { %1334 = vmatprep.mubr.f32.mxu1 %v3522_v43  ;;  %v490_v43 = vld [vmem:[#allocation2 + $0x2] sm:$0xff] }
  0xe1   : > { %925 = vmatmul.mubr.f32.gmra.mrb[58].mxu0 %v4065_v24 }
  0xe2   : > { %929 = vmatprep.mubr.f32.mxu0 %v391_v23  ;;  %v492_v23 = vld [vmem:[#allocation2 + $0x1a] sm:$0xff] }
  0xe3   : > { %1335 = vmatmul.mubr.f32.gmra.mrb[74].mxu1 %v3976_v34 }
  0xe4   : > { %1339 = vmatprep.mubr.f32.mxu1 %v3534_v56  ;;  %v2542_v56 = vld [vmem:[%s4640_s2 + $0x418] sm:$0xff] }
  0xe5   : > { %930 = vmatmul.mubr.f32.gmra.mrb[60].mxu0 %v4072_v25 }
  0xe6   : > { %934 = vmatprep.mubr.f32.mxu0 %v392_v26  ;;  %v3155_v26 = vpack.c.bf16 %v2542_v56, %v2541_v10  ;;  %v4152_v10 = vld [vmem:[#allocation2 + $0x82] sm:$0xff]  ;;  %v4155_v56 = vld [vmem:[#allocation2 + $0x92] sm:$0xff] }
  0xe7   : > { %1340 = vmatmul.mubr.f32.gmra.mrb[76].mxu1 %v3989_v44 }
  0xe8   : > { %1344 = vmatprep.mubr.f32.mxu1 %v3539_v59  ;;  %v2543_v59 = vld [vmem:[%s4640_s2 + $0x420] sm:$0xff] }
  0xe9   : > { %935 = vmatmul.mubr.f32.gmra.mrb[62].mxu0 %v4079_v42  ;;  %v3159_v1 = vpack.c.bf16 %v2544_v60, %v2543_v59  ;;  %v4169_v59 = vld [vmem:[#allocation2 + $0xaa] sm:$0xff]  ;;  %v4174_v60 = vld [vmem:[#allocation2 + $0xb2] sm:$0xff] }
  0xea   : > { %2815 = vmatprep.mubr.f32.mxu0 %v490_v43  ;;  %v2552_v43 = vld [vmem:[%s4640_s2 + $0x468] sm:$0xff] }
  0xeb   : > { %1345 = vmatmul.mubr.f32.gmra.mrb[78].mxu1 %v4002_v53 }
  0xec   : > { %1349 = vmatprep.mubr.f32.mxu1 %v3556_v11  ;;  %v2545_v11 = vld [vmem:[%s4640_s2 + $0x430] sm:$0xff] }
  0xed   : > { %2816 = vmatmul.mubr.f32.vlgmr.msra.gmra.mrb[64].mxu0 %v491_v14  ;;  %v2553_v14 = vld [vmem:[%s4640_s2 + $0x470] sm:$0xff] }
  0xee   : > { %2818 = vmatprep.mubr.f32.mxu0 %v492_v23  ;;  %3154 = vmatpush3.bf16.msra.mxu0 %v3837_v15  ;;  %v4110_v15 = vld [vmem:[#allocation2 + $0x3a] sm:$0xff] }
  0xef   : > { %1350 = vmatmul.mubr.f32.gmra.mrb[80].mxu1 %v4015_v5  ;;  %3156 = vmatprep.subr.bf16.mxu0 %v3155_v26  ;;  %v2554_v23 = vld [vmem:[%s4640_s2 + $0x478] sm:$0xff] }
  0xf0   : > { %1354 = vmatprep.mubr.f32.mxu1 %v3567_v19  ;;  %v3163_v19 = vpack.c.bf16 %v2546_v58, %v2545_v11  ;;  %v4185_v11 = vld [vmem:[#allocation2 + $0xda] sm:$0xff]  ;;  %v1616_v58 = vld [vmem:[#allocation2 + $0x30] sm:$0xff] }
  0xf1   : > { %2819 = vmatmul.mubr.f32.gmra.mrb[66].mxu0 %v493_v40  ;;  %v4177_v40 = vld [vmem:[#allocation2 + $0xc2] sm:$0xff] }
  0xf2   : > { %2821 = vmatprep.mubr.f32.mxu0 %v4100_v33  ;;  %3158 = vmatpush3.bf16.msra.mxu0 %v3155_v26  ;;  %v4166_v26 = vld [vmem:[#allocation2 + $0x9a] sm:$0xff] }
  0xf3   : > { %1355 = vmatmul.mubr.f32.gmra.mrb[82].mxu1 %v4028_v20  ;;  %3160 = vmatprep.subr.bf16.mxu0 %v3159_v1 }
  0xf4   : > { %1359 = vmatprep.mubr.f32.mxu1 %v3583_v35  ;;  %v3167_v35 = vpack.c.bf16 %v2548_v49, %v2547_v12  ;;  %v4191_v12 = vld [vmem:[#allocation2 + $0xf2] sm:$0xff]  ;;  %v1650_v49 = vld [vmem:[#allocation2 + $0x49] sm:$0xff] }
  0xf5   : > { %2822 = vmatmul.mubr.f32.gmra.mrb[68].mxu0 %v4110_v15 }
  0xf6   : > { %2824 = vmatprep.mubr.f32.mxu0 %v4113_v38  ;;  %3162 = vmatpush3.bf16.msra.mxu0 %v3159_v1  ;;  %v1648_v1 = vld [vmem:[#allocation2 + $0x31] sm:$0xff] }
  0xf7   : > { %1360 = vmatmul.mubr.f32.gmra.mrb[84].mxu1 %v4035_v22  ;;  %3164 = vmatprep.subr.bf16.mxu0 %v3163_v19 }
  0xf8   : > { %1364 = vmatprep.mubr.f32.mxu1 %v3585_v36  ;;  %v3171_v36 = vpack.c.bf16 %v2550_v47, %v2549_v50  ;;  %v4198_v50 = vld [vmem:[#allocation2 + $0x10a] sm:$0xff] }
  0xf9   : > { %2825 = vmatmul.mubr.f32.gmra.mrb[70].mxu0 %v4124_v46  ;;  %v1651_v47 = vld [vmem:[#allocation2 + $0x51] sm:$0xff] }
  0xfa   : > { %2827 = vmatprep.mubr.f32.mxu0 %v4127_v13  ;;  %3166 = vmatpush3.bf16.msra.mxu0 %v3163_v19  ;;  %v1649_v19 = vld [vmem:[#allocation2 + $0x39] sm:$0xff] }
  0xfb   : > { %1365 = vmatmul.mubr.f32.gmra.mrb[86].mxu1 %v4041_v55  ;;  %3168 = vmatprep.subr.bf16.mxu0 %v3167_v35 }
  0xfc   : > { %1369 = vmatprep.mubr.f32.mxu1 %v3603_v61  ;;  %v3175_v61 = vpack.c.bf16 %v2552_v43, %v2551_v54  ;;  %v4205_v54 = vld [vmem:[#allocation2 + $0x122] sm:$0xff] }
  0xfd   : > { %2828 = vmatmul.mubr.f32.gmra.mrb[72].mxu0 %v4138_v21  ;;  %v1652_v43 = vld [vmem:[#allocation2 + $0x61] sm:$0xff] }
  0xfe   : > { %2830 = vmatprep.mubr.f32.mxu0 %v4141_v51  ;;  %3170 = vmatpush3.bf16.msra.mxu0 %v3167_v35  ;;  %v4195_v35 = vld [vmem:[#allocation2 + $0xfa] sm:$0xff] }
  0xff   : > { %1370 = vmatmul.mubr.f32.gmra.mrb[88].mxu1 %v4047_v4  ;;  %3172 = vmatprep.subr.bf16.mxu0 %v3171_v36 }
 0x100   : > { %1374 = vmatprep.mubr.f32.mxu1 %v3608_v3  ;;  %v3179_v3 = vpack.c.bf16 %v2554_v23, %v2553_v14  ;;  %v1653_v14 = vld [vmem:[#allocation2 + $0x69] sm:$0xff]  ;;  %v1654_v23 = vld [vmem:[#allocation2 + $0x79] sm:$0xff] }
 0x101   : > { %2831 = vmatmul.mubr.f32.gmra.mrb[74].mxu0 %v4152_v10 }
 0x102   : > { %2833 = vmatprep.mubr.f32.mxu0 %v4155_v56  ;;  %3174 = vmatpush3.bf16.msra.mxu0 %v3171_v36  ;;  %v4202_v36 = vld [vmem:[#allocation2 + $0x112] sm:$0xff] }
 0x103   : > { %1375 = vmatmul.mubr.f32.gmra.mrb[90].mxu1 %v4053_v6  ;;  %3176 = vmatprep.subr.bf16.mxu0 %v3175_v61 }
 0x104   : > { %1379 = vmatprep.mubr.f32.mxu1 %v3619_v30  ;;  %v4182_v30 = vld [vmem:[#allocation2 + $0xca] sm:$0xff] }
 0x105   : > { %2834 = vmatmul.mubr.f32.gmra.mrb[76].mxu0 %v4166_v26 }
 0x106   : > { %2836 = vmatprep.mubr.f32.mxu0 %v4169_v59  ;;  %3178 = vmatpush3.bf16.msra.mxu0 %v3175_v61  ;;  %v4212_v61 = vld [vmem:[#allocation2 + $0x13a] sm:$0xff] }
 0x107   : > { %1380 = vmatmul.mubr.f32.gmra.mrb[92].mxu1 %v4059_v7  ;;  %3180 = vmatprep.subr.bf16.mxu0 %v3179_v3 }
 0x108   : > { %1384 = vmatprep.mubr.f32.mxu1 %v3628_v17  ;;  %v4189_v17 = vld [vmem:[#allocation2 + $0xe2] sm:$0xff] }
 0x109   : > { %2837 = vmatmul.mubr.f32.gmra.mrb[78].mxu0 %v4174_v60 }
 0x10a   : > { %2839 = vmatprep.mubr.f32.mxu0 %v4177_v40  ;;  %3182 = vmatpush3.bf16.msra.mxu0 %v3179_v3 }
 0x10b   : > { %1385 = vmatmul.mubr.f32.gmra.mrb[94].mxu1 %v4065_v24 }
 0x10c   : > { %1825 = vmatprep.mubr.f32.mxu1 %v1648_v1  ;;  %v1655_v1 = vld [vmem:[#allocation2 + $0x81] sm:$0xff] }
 0x10d   : > { %2840 = vmatmul.mubr.f32.gmra.mrb[80].mxu0 %v4182_v30 }
 0x10e   : > { %2842 = vmatprep.mubr.f32.mxu0 %v4185_v11 }
 0x10f   : > { %1826 = vmatmul.mubr.f32.vlgmr.msra.gmra.mrb[96].mxu1 %v1616_v58 }
 0x110   : > { %1830 = vmatprep.mubr.f32.mxu1 %v1649_v19  ;;  %v1656_v19 = vld [vmem:[#allocation2 + $0x91] sm:$0xff] }
 0x111   : > { %2843 = vmatmul.mubr.f32.gmra.mrb[82].mxu0 %v4189_v17 }
 0x112   : > { %2845 = vmatprep.mubr.f32.mxu0 %v4191_v12 }
 0x113   : > { %1831 = vmatmul.mubr.f32.gmra.mrb[98].mxu1 %v3744_v16  ;;  %v4209_v16 = vld [vmem:[#allocation2 + $0x12a] sm:$0xff] }
 0x114   : > { %1835 = vmatprep.mubr.f32.mxu1 %v1650_v49 }
 0x115   : > { %2846 = vmatmul.mubr.f32.gmra.mrb[84].mxu0 %v4195_v35 }
 0x116   : > { %2848 = vmatprep.mubr.f32.mxu0 %v4198_v50 }
 0x117   : > { %1836 = vmatmul.mubr.f32.gmra.mrb[100].mxu1 %v3761_v39  ;;  %v4216_v39 = vld [vmem:[#allocation2 + $0x142] sm:$0xff] }
 0x118   : > { %1840 = vmatprep.mubr.f32.mxu1 %v1651_v47 }
 0x119   : > { %2849 = vmatmul.mubr.f32.gmra.mrb[86].mxu0 %v4202_v36 }
 0x11a   : > { %2851 = vmatprep.mubr.f32.mxu0 %v4205_v54 }
 0x11b   : > { %1841 = vmatmul.mubr.f32.gmra.mrb[102].mxu1 %v3780_v62 }
 0x11c   : > { %1845 = vmatprep.mubr.f32.mxu1 %v1652_v43 }
 0x11d   : > { %2852 = vmatmul.mubr.f32.gmra.mrb[88].mxu0 %v4209_v16 }
 0x11e   : > { %2854 = vmatprep.mubr.f32.mxu0 %v4212_v61 }
 0x11f   : > { %1846 = vmatmul.mubr.f32.gmra.mrb[104].mxu1 %v3802_v31 }
 0x120   : > { %1850 = vmatprep.mubr.f32.mxu1 %v1653_v14  ;;  %v1663_v14 = vld [vmem:[#allocation2 + $0xe1] sm:$0xff] }
 0x121   : > { %2855 = vmatmul.mubr.f32.gmra.mrb[90].mxu0 %v4216_v39 }
 0x122   : > { %v4220_v3 = vpop.f32.mrb[0].mxu1  ;;  %2857 = vmatprep.mubr.f32.mxu0 %v3771_v52 }
 0x123   : > { %v1006_v62 = vpop.f32.mrb[1].mxu1  ;;  %1851 = vmatmul.mubr.f32.gmra.mrb[106].mxu1 %v3817_v41 }
 0x124   : > { %1855 = vmatprep.mubr.f32.mxu1 %v1654_v23 }
 0x125   : > { %2858 = vmatmul.mubr.f32.gmra.mrb[92].mxu0 %v3783_v0  ;;  %v1657_v0 = vld [vmem:[#allocation2 + $0x99] sm:$0xff] }
 0x126   : > { %v4225_v58 = vpop.f32.mrb[2].mxu1  ;;  %2860 = vmatprep.mubr.f32.mxu0 %v3793_v9 }
 0x127   : > { %v4228_v31 = vpop.f32.mrb[3].mxu1  ;;  %1856 = vmatmul.mubr.f32.gmra.mrb[108].mxu1 %v3829_v57 }
 0x128   : > { %1860 = vmatprep.mubr.f32.mxu1 %v1655_v1 }
 0x129   : > { %2861 = vmatmul.mubr.f32.gmra.mrb[94].mxu0 %v3806_v28  ;;  %v1658_v28 = vld [vmem:[#allocation2 + $0xa9] sm:$0xff] }
 0x12a   : > { %v4232_v52 = vpop.f32.mrb[4].mxu1  ;;  %2895 = vmatprep.mubr.f32.mxu0 %v4100_v33 }
 0x12b   : > { %v4235_v41 = vpop.f32.mrb[5].mxu1  ;;  %1861 = vmatmul.mubr.f32.gmra.mrb[110].mxu1 %v3848_v32 }
 0x12c   : > { %1865 = vmatprep.mubr.f32.mxu1 %v1656_v19  ;;  %v1665_v19 = vld [vmem:[#allocation2 + $0xf9] sm:$0xff] }
 0x12d   : > { %2896 = vmatmul.mubr.f32.vlgmr.msra.gmra.mrb[96].mxu0 %v4110_v15  ;;  %v1659_v15 = vld [vmem:[#allocation2 + $0xb1] sm:$0xff] }
 0x12e   : > { %v4239_v9 = vpop.f32.mrb[6].mxu1  ;;  %2898 = vmatprep.mubr.f32.mxu0 %v4113_v38 }
 0x12f   : > { %v4242_v57 = vpop.f32.mrb[7].mxu1  ;;  %1866 = vmatmul.mubr.f32.gmra.mrb[112].mxu1 %v3860_v48 }
 0x130   : > { %1870 = vmatprep.mubr.f32.mxu1 %v1657_v0 }
 0x131   : > { %2899 = vmatmul.mubr.f32.gmra.mrb[98].mxu0 %v4124_v46  ;;  %v1660_v46 = vld [vmem:[#allocation2 + $0xc1] sm:$0xff] }
 0x132   : > { %v4246_v33 = vpop.f32.mrb[8].mxu1  ;;  %2901 = vmatprep.mubr.f32.mxu0 %v4127_v13 }
 0x133   : > { %v4249_v32 = vpop.f32.mrb[9].mxu1  ;;  %1871 = vmatmul.mubr.f32.gmra.mrb[114].mxu1 %v3872_v2 }
 0x134   : > { %1875 = vmatprep.mubr.f32.mxu1 %v1658_v28 }
 0x135   : > { %2902 = vmatmul.mubr.f32.gmra.mrb[100].mxu0 %v4138_v21  ;;  %v1661_v21 = vld [vmem:[#allocation2 + $0xc9] sm:$0xff] }
 0x136   : > { %v4253_v38 = vpop.f32.mrb[10].mxu1  ;;  %2904 = vmatprep.mubr.f32.mxu0 %v4141_v51 }
 0x137   : > { %v4256_v48 = vpop.f32.mrb[11].mxu1  ;;  %1876 = vmatmul.mubr.f32.gmra.mrb[116].mxu1 %v3885_v18 }
 0x138   : > { %1880 = vmatprep.mubr.f32.mxu1 %v1659_v15 }
 0x139   : > { %2905 = vmatmul.mubr.f32.gmra.mrb[102].mxu0 %v4152_v10 }
 0x13a   : > { %v4260_v13 = vpop.f32.mrb[12].mxu1  ;;  %2907 = vmatprep.mubr.f32.mxu0 %v4155_v56 }
 0x13b   : > { %v4263_v2 = vpop.f32.mrb[13].mxu1  ;;  %1881 = vmatmul.mubr.f32.gmra.mrb[118].mxu1 %v3898_v29  ;;  %v1662_v29 = vld [vmem:[#allocation2 + $0xd9] sm:$0xff] }
 0x13c   : > { %1885 = vmatprep.mubr.f32.mxu1 %v1660_v46 }
 0x13d   : > { %2908 = vmatmul.mubr.f32.gmra.mrb[104].mxu0 %v4166_v26 }
 0x13e   : > { %v4267_v51 = vpop.f32.mrb[14].mxu1  ;;  %2910 = vmatprep.mubr.f32.mxu0 %v4169_v59 }
 0x13f   : > { %v4270_v18 = vpop.f32.mrb[15].mxu1  ;;  %1886 = vmatmul.mubr.f32.gmra.mrb[120].mxu1 %v3911_v37 }
 0x140   : > { %v781_v10 = vpop.f32.mrb[0].mxu0  ;;  %1890 = vmatprep.mubr.f32.mxu1 %v1661_v21 }
 0x141   : > { %v4273_v49 = vadd.f32 %v1006_v62, %v781_v10  ;;  %2911 = vmatmul.mubr.f32.gmra.mrb[106].mxu0 %v4174_v60  ;;  %v783_v56 = vpop.f32.mrb[1].mxu0  ;;  %v1664_v62 = vld [vmem:[#allocation2 + $0xf1] sm:$0xff] }
 0x142   : > { %v4276_v47 = vpop.f32.mrb[16].mxu1  ;;  %2913 = vmatprep.mubr.f32.mxu0 %v4177_v40  ;;  %v1668_v56 = vld [vmem:[#allocation2 + $0x121] sm:$0xff] }
 0x143   : > { %v4279_v26 = vpop.f32.mrb[17].mxu1  ;;  %1891 = vmatmul.mubr.f32.gmra.mrb[122].mxu1 %v3924_v45 }
 0x144   : > { %v786_v59 = vpop.f32.mrb[2].mxu0  ;;  %1895 = vmatprep.mubr.f32.mxu1 %v1662_v29 }
 0x145   : > { %v4283_v37 = vadd.f32 %v4220_v3, %v786_v59  ;;  %2914 = vmatmul.mubr.f32.gmra.mrb[108].mxu0 %v4182_v30  ;;  %v788_v43 = vpop.f32.mrb[3].mxu0 }
 0x146   : > { %v4286_v60 = vpop.f32.mrb[18].mxu1  ;;  %2916 = vmatprep.mubr.f32.mxu0 %v4185_v11 }
 0x147   : > { %v4289_v23 = vpop.f32.mrb[19].mxu1  ;;  %1896 = vmatmul.mubr.f32.gmra.mrb[124].mxu1 %v3937_v63 }
 0x148   : > { %v791_v40 = vpop.f32.mrb[4].mxu0  ;;  %1900 = vmatprep.mubr.f32.mxu1 %v1663_v14  ;;  %v1669_v14 = vld [vmem:[#allocation2 + $0x129] sm:$0xff] }
 0x149   : > { %v4293_v45 = vadd.f32 %v4228_v31, %v791_v40  ;;  %2917 = vmatmul.mubr.f32.gmra.mrb[110].mxu0 %v4189_v17  ;;  %v793_v3 = vpop.f32.mrb[5].mxu0 }
 0x14a   : > { %v4296_v30 = vpop.f32.mrb[20].mxu1  ;;  %2919 = vmatprep.mubr.f32.mxu0 %v4191_v12 }
 0x14b   : > { %v4299_v1 = vpop.f32.mrb[21].mxu1  ;;  %1901 = vmatmul.mubr.f32.gmra.mrb[126].mxu1 %v3950_v8 }
 0x14c   : > { %v796_v11 = vpop.f32.mrb[6].mxu0  ;;  %1905 = vmatprep.mubr.f32.mxu1 %v1664_v62  ;;  %v1708_v62 = vld [vmem:[#allocation2 + $0x182] sm:$0xff] }
 0x14d   : > { %v4303_v63 = vadd.f32 %v4225_v58, %v796_v11  ;;  %2920 = vmatmul.mubr.f32.gmra.mrb[112].mxu0 %v4195_v35  ;;  %v798_v31 = vpop.f32.mrb[7].mxu0  ;;  %v1666_v58 = vld [vmem:[#allocation2 + $0x109] sm:$0xff] }
 0x14e   : > { %v4306_v17 = vpop.f32.mrb[22].mxu1  ;;  %2922 = vmatprep.mubr.f32.mxu0 %v4198_v50 }
 0x14f   : > { %v4309_v0 = vpop.f32.mrb[23].mxu1  ;;  %1906 = vmatmul.mubr.f32.gmra.mrb[128].mxu1 %v3963_v27 }
 0x150   : > { %v801_v12 = vpop.f32.mrb[8].mxu0  ;;  %1910 = vmatprep.mubr.f32.mxu1 %v1665_v19 }
 0x151   : > { %v4313_v8 = vadd.f32 %v4235_v41, %v801_v12  ;;  %v803_v28 = vpop.f32.mrb[9].mxu0  ;;  %2923 = vmatmul.mubr.f32.gmra.mrb[114].mxu0 %v4202_v36  ;;  %v1667_v41 = vld [vmem:[#allocation2 + $0x111] sm:$0xff] }
 0x152   : > { %v4316_v35 = vpop.f32.mrb[24].mxu1  ;;  %2925 = vmatprep.mubr.f32.mxu0 %v4205_v54  ;;  %v1704_v54 = vld [vmem:[#allocation2 + $0x152] sm:$0xff]  ;;  %v1709_v12 = vld [vmem:[#allocation2 + $0x18a] sm:$0xff] }
 0x153   : > { %v4319_v15 = vpop.f32.mrb[25].mxu1  ;;  %1911 = vmatmul.mubr.f32.gmra.mrb[130].mxu1 %v3976_v34 }
 0x154   : > { %v806_v50 = vpop.f32.mrb[10].mxu0  ;;  %1915 = vmatprep.mubr.f32.mxu1 %v1666_v58 }
 0x155   : > { %v4323_v27 = vadd.f32 %v4232_v52, %v806_v50  ;;  %v808_v46 = vpop.f32.mrb[11].mxu0  ;;  %2926 = vmatmul.mubr.f32.gmra.mrb[116].mxu0 %v4209_v16  ;;  %v1705_v16 = vld [vmem:[#allocation2 + $0x15a] sm:$0xff] }
 0x156   : > { %v4326_v21 = vpop.f32.mrb[26].mxu1  ;;  %2928 = vmatprep.mubr.f32.mxu0 %v4212_v61  ;;  %v1706_v61 = vld [vmem:[#allocation2 + $0x16a] sm:$0xff]  ;;  %v1710_v50 = vld [vmem:[#allocation2 + $0x19a] sm:$0xff] }
 0x157   : > { %v4329_v36 = vpop.f32.mrb[27].mxu1  ;;  %1916 = vmatmul.mubr.f32.gmra.mrb[132].mxu1 %v3989_v44 }
 0x158   : > { %v811_v10 = vpop.f32.mrb[12].mxu0  ;;  %1920 = vmatprep.mubr.f32.mxu1 %v1667_v41  ;;  %v1671_v41 = vld [vmem:[#allocation2 + $0x141] sm:$0xff] }
 0x159   : > { %v4333_v34 = vadd.f32 %v4242_v57, %v811_v10  ;;  %v813_v52 = vpop.f32.mrb[13].mxu0  ;;  %2929 = vmatmul.mubr.f32.gmra.mrb[118].mxu0 %v4216_v39  ;;  %v1707_v39 = vld [vmem:[#allocation2 + $0x172] sm:$0xff]  ;;  %v1711_v10 = vld [vmem:[#allocation2 + $0x1a2] sm:$0xff] }
 0x15a   : > { %v4336_v29 = vpop.f32.mrb[28].mxu1  ;;  %2931 = vmatprep.mubr.f32.mxu0 %v1704_v54 }
 0x15b   : > { %v4338_v59 = vpop.f32.mrb[29].mxu1  ;;  %1921 = vmatmul.mubr.f32.gmra.mrb[134].mxu1 %v4002_v53 }
 0x15c   : > { %v816_v44 = vpop.f32.mrb[14].mxu0  ;;  %1925 = vmatprep.mubr.f32.mxu1 %v1668_v56 }
 0x15d   : > { %v4342_v43 = vadd.f32 %v4239_v9, %v816_v44  ;;  %v818_v57 = vpop.f32.mrb[15].mxu0  ;;  %2932 = vmatmul.mubr.f32.gmra.mrb[120].mxu0 %v1705_v16  ;;  %v1670_v9 = vld [vmem:[#allocation2 + $0x139] sm:$0xff] }
 0x15e   : > { %v4344_v40 = vpop.f32.mrb[30].mxu1  ;;  %2934 = vmatprep.mubr.f32.mxu0 %v1706_v61 }
 0x15f   : > { %v4346_v3 = vpop.f32.mrb[31].mxu1  ;;  %1926 = vmatmul.mubr.f32.gmra.mrb[136].mxu1 %v4015_v5 }
 0x160   : > { %v821_v11 = vpop.f32.mrb[16].mxu0  ;;  %1930 = vmatprep.mubr.f32.mxu1 %v1669_v14 }
 0x161   : > { %v4350_v53 = vadd.f32 %v4249_v32, %v821_v11  ;;  %v823_v31 = vpop.f32.mrb[17].mxu0  ;;  %2935 = vmatmul.mubr.f32.gmra.mrb[122].mxu0 %v1707_v39  ;;  %v1673_v39 = vld [vmem:[#allocation2 + $0x159] sm:$0xff] }
 0x162   : > { %v1231_v19 = vpop.f32.mrb[32].mxu1  ;;  %2937 = vmatprep.mubr.f32.mxu0 %v1708_v62 }
 0x163   : > { %v4353_v28 = vadd.f32 %v1231_v19, %v4273_v49  ;;  %v1233_v58 = vpop.f32.mrb[33].mxu1  ;;  %1931 = vmatmul.mubr.f32.gmra.mrb[138].mxu1 %v4028_v20 }
 0x164   : > { %v826_v5 = vpop.f32.mrb[18].mxu0  ;;  %1935 = vmatprep.mubr.f32.mxu1 %v1670_v9  ;;  %v1674_v9 = vld [vmem:[#allocation2 + $0x169] sm:$0xff] }
 0x165   : > { %v4357_v46 = vadd.f32 %v4246_v33, %v826_v5  ;;  %v828_v32 = vpop.f32.mrb[19].mxu0  ;;  %2938 = vmatmul.mubr.f32.gmra.mrb[124].mxu0 %v1709_v12  ;;  %v1672_v33 = vld [vmem:[#allocation2 + $0x151] sm:$0xff] }
 0x166   : > { %v1236_v54 = vpop.f32.mrb[34].mxu1  ;;  %2940 = vmatprep.mubr.f32.mxu0 %v1710_v50  ;;  %v1675_v50 = vld [vmem:[#allocation2 + $0x171] sm:$0xff] }
 0x167   : > { %v4360_v52 = vadd.f32 %v1236_v54, %v4283_v37  ;;  %v1238_v49 = vpop.f32.mrb[35].mxu1  ;;  %1936 = vmatmul.mubr.f32.gmra.mrb[140].mxu1 %v4035_v22  ;;  %v1676_v54 = vld [vmem:[#allocation2 + $0x181] sm:$0xff] }
 0x168   : > { %v831_v56 = vpop.f32.mrb[20].mxu0  ;;  %1940 = vmatprep.mubr.f32.mxu1 %v1671_v41 }
 0x169   : > { %v4364_v20 = vadd.f32 %v4256_v48, %v831_v56  ;;  %v833_v16 = vpop.f32.mrb[21].mxu0  ;;  %2941 = vmatmul.mubr.f32.gmra.mrb[126].mxu0 %v1711_v10 }
 0x16a   : > { %v1241_v61 = vpop.f32.mrb[36].mxu1  ;;  %v1677_v16 = vld [vmem:[#allocation2 + $0x189] sm:$0xff] }
 0x16b   : > { %v4367_v44 = vadd.f32 %v1241_v61, %v4293_v45  ;;  %v1243_v57 = vpop.f32.mrb[37].mxu1  ;;  %1941 = vmatmul.mubr.f32.gmra.mrb[142].mxu1 %v4041_v55 }
 0x16c   : > { %v836_v37 = vpop.f32.mrb[22].mxu0  ;;  %1945 = vmatprep.mubr.f32.mxu1 %v1672_v33 }
 0x16d   : > { %v4371_v14 = vadd.f32 %v4253_v38, %v836_v37  ;;  %v838_v22 = vpop.f32.mrb[23].mxu0 }
 0x16e   : > { %v1246_v62 = vpop.f32.mrb[38].mxu1 }
 0x16f   : > { %v4374_v48 = vadd.f32 %v1246_v62, %v4303_v63  ;;  %v1248_v11 = vpop.f32.mrb[39].mxu1  ;;  %1946 = vmatmul.mubr.f32.gmra.mrb[144].mxu1 %v4047_v4 }
 0x170   : > { %v841_v31 = vpop.f32.mrb[24].mxu0  ;;  %1950 = vmatprep.mubr.f32.mxu1 %v1673_v39 }
 0x171   : > { %v4378_v45 = vadd.f32 %v4263_v2, %v841_v31  ;;  %v843_v55 = vpop.f32.mrb[25].mxu0 }
 0x172   : > { %v1251_v19 = vpop.f32.mrb[40].mxu1 }
 0x173   : > { %v4381_v38 = vadd.f32 %v1251_v19, %v4313_v8  ;;  %v1253_v12 = vpop.f32.mrb[41].mxu1  ;;  %1951 = vmatmul.mubr.f32.gmra.mrb[146].mxu1 %v4053_v6 }
 0x174   : > { %v846_v58 = vpop.f32.mrb[26].mxu0  ;;  %1955 = vmatprep.mubr.f32.mxu1 %v1674_v9 }
 0x175   : > { %v4385_v63 = vadd.f32 %v4260_v13, %v846_v58  ;;  %v848_v4 = vpop.f32.mrb[27].mxu0 }
 0x176   : > { %v1256_v5 = vpop.f32.mrb[42].mxu1 }
 0x177   : > { %v4388_v2 = vadd.f32 %v1256_v5, %v4323_v27  ;;  %v1258_v32 = vpop.f32.mrb[43].mxu1  ;;  %1956 = vmatmul.mubr.f32.gmra.mrb[148].mxu1 %v4059_v7 }
 0x178   : > { %v851_v41 = vpop.f32.mrb[28].mxu0  ;;  %1960 = vmatprep.mubr.f32.mxu1 %v1675_v50 }
 0x179   : > { %v4392_v8 = vadd.f32 %v4270_v18, %v851_v41  ;;  %v853_v6 = vpop.f32.mrb[29].mxu0 }
 0x17a   : > { %v1261_v10 = vpop.f32.mrb[44].mxu1 }
 0x17b   : > { %v4395_v13 = vadd.f32 %v1261_v10, %v4333_v34  ;;  %v1263_v49 = vpop.f32.mrb[45].mxu1  ;;  %1961 = vmatmul.mubr.f32.gmra.mrb[150].mxu1 %v4065_v24  ;;  %v1678_v24 = vld [vmem:[#allocation2 + $0x199] sm:$0xff] }
 0x17c   : > { %v856_v56 = vpop.f32.mrb[30].mxu0  ;;  %1965 = vmatprep.mubr.f32.mxu1 %v1676_v54 }
 0x17d   : > { %v4399_v27 = vadd.f32 %v4267_v51, %v856_v56  ;;  %v858_v7 = vpop.f32.mrb[31].mxu0 }
 0x17e   : > { %v1266_v33 = vpop.f32.mrb[46].mxu1 }
 0x17f   : > { %v4402_v18 = vadd.f32 %v1266_v33, %v4342_v43  ;;  %v1268_v61 = vpop.f32.mrb[47].mxu1  ;;  %1966 = vmatmul.mubr.f32.gmra.mrb[152].mxu1 %v4072_v25  ;;  %v1646_v43 = vld [vmem:[#allocation2 + $0x198] sm:$0xff]  ;;  %v1679_v25 = vld [vmem:[#allocation2 + $0x1a1] sm:$0xff] }
 0x180   : > { %v861_v57 = vpop.f32.mrb[32].mxu0  ;;  %1970 = vmatprep.mubr.f32.mxu1 %v1677_v16 }
 0x181   : > { %v1087_v34 = vadd.f32 %v4279_v26, %v861_v57  ;;  %v863_v37 = vpop.f32.mrb[33].mxu0 }
 0x182   : > { %v1271_v22 = vpop.f32.mrb[48].mxu1 }
 0x183   : > { %v4407_v39 = vadd.f32 %v1271_v22, %v4350_v53  ;;  %v1273_v51 = vpop.f32.mrb[49].mxu1  ;;  %1971 = vmatmul.mubr.f32.gmra.mrb[154].mxu1 %v4079_v42  ;;  %v1647_v53 = vld [vmem:[#allocation2 + $0x1a0] sm:$0xff] }
 0x184   : > { %v866_v62 = vpop.f32.mrb[34].mxu0  ;;  %1975 = vmatprep.mubr.f32.mxu1 %v1678_v24 }
 0x185   : > { %v1092_v11 = vadd.f32 %v4276_v47, %v866_v62  ;;  %v868_v31 = vpop.f32.mrb[35].mxu0 }
 0x186   : > { %v1276_v55 = vpop.f32.mrb[50].mxu1 }
 0x187   : > { %v4412_v9 = vadd.f32 %v1276_v55, %v4357_v46  ;;  %v1278_v26 = vpop.f32.mrb[51].mxu1  ;;  %1976 = vmatmul.mubr.f32.gmra.mrb[156].mxu1 %v1646_v43 }
 0x188   : > { %v871_v19 = vpop.f32.mrb[36].mxu0  ;;  %1980 = vmatprep.mubr.f32.mxu1 %v1679_v25 }
 0x189   : > { %v1097_v12 = vadd.f32 %v4289_v23, %v871_v19  ;;  %v873_v58 = vpop.f32.mrb[37].mxu0 }
 0x18a   : > { %v1281_v42 = vpop.f32.mrb[52].mxu1 }
 0x18b   : > { %v4416_v4 = vadd.f32 %v1281_v42, %v4364_v20  ;;  %v1283_v50 = vpop.f32.mrb[53].mxu1  ;;  %1981 = vmatmul.mubr.f32.gmra.mrb[158].mxu1 %v1647_v53 }
 0x18c   : > { %v876_v47 = vpop.f32.mrb[38].mxu0 }
 0x18d   : > { %v1102_v5 = vadd.f32 %v4286_v60, %v876_v47  ;;  %v878_v32 = vpop.f32.mrb[39].mxu0 }
 0x18e   : > { %v1286_v46 = vpop.f32.mrb[54].mxu1 }
 0x18f   : > { %v4420_v41 = vadd.f32 %v1286_v46, %v4371_v14  ;;  %v1288_v6 = vpop.f32.mrb[55].mxu1 }
 0x190   : > { %v881_v54 = vpop.f32.mrb[40].mxu0 }
 0x191   : > { %v1107_v10 = vadd.f32 %v4299_v1, %v881_v54  ;;  %v883_v23 = vpop.f32.mrb[41].mxu0 }
 0x192   : > { %v1291_v49 = vpop.f32.mrb[56].mxu1 }
 0x193   : > { %v4424_v56 = vadd.f32 %v1291_v49, %v4378_v45  ;;  %v1293_v20 = vpop.f32.mrb[57].mxu1 }
 0x194   : > { %v886_v7 = vpop.f32.mrb[42].mxu0 }
 0x195   : > { %v1112_v16 = vadd.f32 %v4296_v30, %v886_v7  ;;  %v888_v33 = vpop.f32.mrb[43].mxu0 }
 0x196   : > { %v1296_v60 = vpop.f32.mrb[58].mxu1 }
 0x197   : > { %v4428_v61 = vadd.f32 %v1296_v60, %v4385_v63  ;;  %v1298_v14 = vpop.f32.mrb[59].mxu1 }
 0x198   : > { %v891_v57 = vpop.f32.mrb[44].mxu0 }
 0x199   : > { %v1117_v37 = vadd.f32 %v4309_v0, %v891_v57  ;;  %v893_v24 = vpop.f32.mrb[45].mxu0 }
 0x19a   : > { %v1301_v1 = vpop.f32.mrb[60].mxu1 }
 0x19b   : > { %v4432_v22 = vadd.f32 %v1301_v1, %v4392_v8  ;;  %v1303_v45 = vpop.f32.mrb[61].mxu1 }
 0x19c   : > { %v896_v51 = vpop.f32.mrb[46].mxu0 }
 0x19d   : > { %v1122_v62 = vadd.f32 %v4306_v17, %v896_v51  ;;  %v898_v43 = vpop.f32.mrb[47].mxu0 }
 0x19e   : > { %v1306_v30 = vpop.f32.mrb[62].mxu1 }
 0x19f   : > { %v4436_v31 = vadd.f32 %v1306_v30, %v4399_v27  ;;  %v1308_v63 = vpop.f32.mrb[63].mxu1 }
 0x1a0   : > { %v901_v25 = vpop.f32.mrb[48].mxu0 }
 0x1a1   : > { %v1127_v55 = vadd.f32 %v4319_v15, %v901_v25  ;;  %v903_v26 = vpop.f32.mrb[49].mxu0 }
 0x1a2   : > { %v1311_v0 = vpop.f32.mrb[64].mxu1 }
 0x1a3   : > { %v4439_v19 = vadd.f32 %v1311_v0, %v1087_v34  ;;  %v1313_v53 = vpop.f32.mrb[65].mxu1 }
 0x1a4   : > { %v906_v8 = vpop.f32.mrb[50].mxu0 }
 0x1a5   : > { %v1132_v58 = vadd.f32 %v4316_v35, %v906_v8  ;;  %v908_v42 = vpop.f32.mrb[51].mxu0 }
 0x1a6   : > { %v1316_v50 = vpop.f32.mrb[66].mxu1 }
 0x1a7   : > { %v4442_v17 = vadd.f32 %v1316_v50, %v1092_v11  ;;  %v1318_v47 = vpop.f32.mrb[67].mxu1 }
 0x1a8   : > { %v911_v32 = vpop.f32.mrb[52].mxu0 }
 0x1a9   : > { %v1137_v27 = vadd.f32 %v4329_v36, %v911_v32  ;;  %v913_v46 = vpop.f32.mrb[53].mxu0 }
 0x1aa   : > { %v1321_v6 = vpop.f32.mrb[68].mxu1 }
 0x1ab   : > { %v4445_v54 = vadd.f32 %v1321_v6, %v1097_v12  ;;  %v1323_v15 = vpop.f32.mrb[69].mxu1 }
 0x1ac   : > { %v916_v23 = vpop.f32.mrb[54].mxu0 }
 0x1ad   : > { %v1142_v34 = vadd.f32 %v4326_v21, %v916_v23  ;;  %v918_v49 = vpop.f32.mrb[55].mxu0 }
 0x1ae   : > { %v1326_v20 = vpop.f32.mrb[70].mxu1 }
 0x1af   : > { %v4448_v7 = vadd.f32 %v1326_v20, %v1102_v5  ;;  %v1328_v35 = vpop.f32.mrb[71].mxu1 }
 0x1b0   : > { %v921_v33 = vpop.f32.mrb[56].mxu0 }
 0x1b1   : > { %v1147_v11 = vadd.f32 %v4338_v59, %v921_v33  ;;  %v923_v60 = vpop.f32.mrb[57].mxu0 }
 0x1b2   : > { %v1331_v14 = vpop.f32.mrb[72].mxu1 }
 0x1b3   : > { %v4451_v57 = vadd.f32 %v1331_v14, %v1107_v10  ;;  %v1333_v36 = vpop.f32.mrb[73].mxu1 }
 0x1b4   : > { %v926_v24 = vpop.f32.mrb[58].mxu0 }
 0x1b5   : > { %v1152_v12 = vadd.f32 %v4336_v29, %v926_v24  ;;  %v928_v1 = vpop.f32.mrb[59].mxu0 }
 0x1b6   : > { %v1336_v45 = vpop.f32.mrb[74].mxu1 }
 0x1b7   : > { %v4454_v51 = vadd.f32 %v1336_v45, %v1112_v16  ;;  %v1338_v21 = vpop.f32.mrb[75].mxu1 }
 0x1b8   : > { %v931_v43 = vpop.f32.mrb[60].mxu0 }
 0x1b9   : > { %v1157_v5 = vadd.f32 %v4346_v3, %v931_v43  ;;  %v933_v30 = vpop.f32.mrb[61].mxu0 }
 0x1ba   : > { %v1341_v63 = vpop.f32.mrb[76].mxu1 }
 0x1bb   : > { %v4457_v25 = vadd.f32 %v1341_v63, %v1117_v37  ;;  %v1343_v59 = vpop.f32.mrb[77].mxu1 }
 0x1bc   : > { %v936_v26 = vpop.f32.mrb[62].mxu0 }
 0x1bd   : > { %v1162_v10 = vadd.f32 %v4344_v40, %v936_v26  ;;  %v938_v0 = vpop.f32.mrb[63].mxu0 }
 0x1be   : > { %v1346_v53 = vpop.f32.mrb[78].mxu1 }
 0x1bf   : > { %v4460_v8 = vadd.f32 %v1346_v53, %v1122_v62  ;;  %v1348_v29 = vpop.f32.mrb[79].mxu1 }
 0x1c0   : > { %v2817_v42 = vpop.f32.mrb[64].mxu0 }
 0x1c1   : > { %v4463_v16 = vadd.f32 %v2817_v42, %v4360_v52  ;;  %v1456_v50 = vpop.f32.mrb[65].mxu0 }
 0x1c2   : > { %v1351_v47 = vpop.f32.mrb[80].mxu1  ;;  %v4466_v3 = vadd.f32 %v1456_v50, %v4353_v28 }
 0x1c3   : > { %v4468_v37 = vadd.f32 %v1351_v47, %v1127_v55  ;;  %v1353_v32 = vpop.f32.mrb[81].mxu1 }
 0x1c4   : > { %v2820_v46 = vpop.f32.mrb[66].mxu0 }
 0x1c5   : > { %v4471_v40 = vadd.f32 %v2820_v46, %v4374_v48  ;;  %v1466_v6 = vpop.f32.mrb[67].mxu0 }
 0x1c6   : > { %v1356_v62 = vpop.f32.mrb[82].mxu1  ;;  %v4474_v15 = vadd.f32 %v1466_v6, %v4367_v44 }
 0x1c7   : > { %v4476_v23 = vadd.f32 %v1356_v62, %v1132_v58  ;;  %v1358_v52 = vpop.f32.mrb[83].mxu1 }
 0x1c8   : > { %v2823_v49 = vpop.f32.mrb[68].mxu0 }
 0x1c9   : > { %v4479_v20 = vadd.f32 %v2823_v49, %v4388_v2  ;;  %v1476_v28 = vpop.f32.mrb[69].mxu0 }
 0x1ca   : > { %v1361_v55 = vpop.f32.mrb[84].mxu1  ;;  %v4482_v35 = vadd.f32 %v1476_v28, %v4381_v38 }
 0x1cb   : > { %v4484_v33 = vadd.f32 %v1361_v55, %v1137_v27  ;;  %v1363_v48 = vpop.f32.mrb[85].mxu1 }
 0x1cc   : > { %v2826_v60 = vpop.f32.mrb[70].mxu0 }
 0x1cd   : > { %v4487_v14 = vadd.f32 %v2826_v60, %v4402_v18  ;;  %v1486_v44 = vpop.f32.mrb[71].mxu0 }
 0x1ce   : > { %v1366_v58 = vpop.f32.mrb[86].mxu1  ;;  %v4490_v36 = vadd.f32 %v1486_v44, %v4395_v13 }
 0x1cf   : > { %v1367_v24 = vadd.f32 %v1366_v58, %v1142_v34  ;;  %v1368_v2 = vpop.f32.mrb[87].mxu1 }
 0x1d0   : > { %v2829_v1 = vpop.f32.mrb[72].mxu0 }
 0x1d1   : > { %v4493_v45 = vadd.f32 %v2829_v1, %v4412_v9  ;;  %v1496_v38 = vpop.f32.mrb[73].mxu0 }
 0x1d2   : > { %v1371_v21 = vpop.f32.mrb[88].mxu1  ;;  %v4496_v27 = vadd.f32 %v1496_v38, %v4407_v39 }
 0x1d3   : > { %v1372_v43 = vadd.f32 %v1371_v21, %v1147_v11  ;;  %v1373_v30 = vpop.f32.mrb[89].mxu1 }
 0x1d4   : > { %v2832_v18 = vpop.f32.mrb[74].mxu0 }
 0x1d5   : > { %v4499_v63 = vadd.f32 %v2832_v18, %v4420_v41  ;;  %v1506_v59 = vpop.f32.mrb[75].mxu0 }
 0x1d6   : > { %v1376_v13 = vpop.f32.mrb[90].mxu1  ;;  %v4502_v34 = vadd.f32 %v1506_v59, %v4416_v4 }
 0x1d7   : > { %v1377_v26 = vadd.f32 %v1376_v13, %v1152_v12  ;;  %v1378_v0 = vpop.f32.mrb[91].mxu1 }
 0x1d8   : > { %v2835_v9 = vpop.f32.mrb[76].mxu0 }
 0x1d9   : > { %v4505_v53 = vadd.f32 %v2835_v9, %v4428_v61  ;;  %v1516_v29 = vpop.f32.mrb[77].mxu0 }
 0x1da   : > { %v1381_v39 = vpop.f32.mrb[92].mxu1  ;;  %v4508_v11 = vadd.f32 %v1516_v29, %v4424_v56 }
 0x1db   : > { %v1382_v42 = vadd.f32 %v1381_v39, %v1157_v5  ;;  %v1383_v50 = vpop.f32.mrb[93].mxu1 }
 0x1dc   : > { %v2838_v41 = vpop.f32.mrb[78].mxu0 }
 0x1dd   : > { %v4511_v47 = vadd.f32 %v2838_v41, %v4436_v31  ;;  %v1526_v32 = vpop.f32.mrb[79].mxu0 }
 0x1de   : > { %v1386_v4 = vpop.f32.mrb[94].mxu1  ;;  %v4514_v12 = vadd.f32 %v1526_v32, %v4432_v22 }
 0x1df   : > { %v1387_v46 = vadd.f32 %v1386_v4, %v1162_v10  ;;  %v1388_v6 = vpop.f32.mrb[95].mxu1 }
 0x1e0   : > { %v2841_v61 = vpop.f32.mrb[80].mxu0 }
 0x1e1   : > { %v4517_v62 = vadd.f32 %v2841_v61, %v4442_v17  ;;  %v1536_v52 = vpop.f32.mrb[81].mxu0 }
 0x1e2   : > { %v4520_v56 = vadd.f32 %v1536_v52, %v4439_v19  ;;  %v1827_v5 = vpop.f32.mrb[96].mxu1 }
 0x1e3   : > { %v1829_v49 = vpop.f32.mrb[97].mxu1 }
 0x1e4   : > { %v2844_v28 = vpop.f32.mrb[82].mxu0 }
 0x1e5   : > { %v4523_v31 = vadd.f32 %v2844_v28, %v4448_v7  ;;  %v1546_v55 = vpop.f32.mrb[83].mxu0 }
 0x1e6   : > { %v4526_v22 = vadd.f32 %v1546_v55, %v4445_v54  ;;  %v1832_v10 = vpop.f32.mrb[98].mxu1 }
 0x1e7   : > { %v1834_v48 = vpop.f32.mrb[99].mxu1 }
 0x1e8   : > { %v2847_v60 = vpop.f32.mrb[84].mxu0 }
 0x1e9   : > { %v4529_v17 = vadd.f32 %v2847_v60, %v4454_v51  ;;  %v1556_v44 = vpop.f32.mrb[85].mxu0 }
 0x1ea   : > { %v4532_v19 = vadd.f32 %v1556_v44, %v4451_v57  ;;  %v1837_v58 = vpop.f32.mrb[100].mxu1 }
 0x1eb   : > { %v1839_v2 = vpop.f32.mrb[101].mxu1 }
 0x1ec   : > { %v2850_v1 = vpop.f32.mrb[86].mxu0 }
 0x1ed   : > { %v4535_v7 = vadd.f32 %v2850_v1, %v4460_v8  ;;  %v1566_v38 = vpop.f32.mrb[87].mxu0 }
 0x1ee   : > { %v4538_v54 = vadd.f32 %v1566_v38, %v4457_v25  ;;  %v1842_v21 = vpop.f32.mrb[102].mxu1 }
 0x1ef   : > { %v1844_v30 = vpop.f32.mrb[103].mxu1 }
 0x1f0   : > { %v2853_v18 = vpop.f32.mrb[88].mxu0 }
 0x1f1   : > { %v4541_v51 = vadd.f32 %v2853_v18, %v4476_v23  ;;  %v1576_v59 = vpop.f32.mrb[89].mxu0 }
 0x1f2   : > { %v4544_v57 = vadd.f32 %v1576_v59, %v4468_v37  ;;  %v1847_v13 = vpop.f32.mrb[104].mxu1 }
 0x1f3   : > { %v1849_v0 = vpop.f32.mrb[105].mxu1 }
 0x1f4   : > { %v2856_v9 = vpop.f32.mrb[90].mxu0 }
 0x1f5   : > { %v4546_v29 = vadd.f32 %v2856_v9, %v1367_v24  ;;  %v1586_v8 = vpop.f32.mrb[91].mxu0 }
 0x1f6   : > { %v4549_v39 = vadd.f32 %v1586_v8, %v4484_v33  ;;  %v1852_v25 = vpop.f32.mrb[106].mxu1 }
 0x1f7   : > { %v1854_v50 = vpop.f32.mrb[107].mxu1 }
 0x1f8   : > { %v2859_v41 = vpop.f32.mrb[92].mxu0 }
 0x1f9   : > { %v4551_v32 = vadd.f32 %v2859_v41, %v1377_v26  ;;  %v1596_v23 = vpop.f32.mrb[93].mxu0 }
 0x1fa   : > { %v4553_v4 = vadd.f32 %v1596_v23, %v1372_v43  ;;  %v1857_v6 = vpop.f32.mrb[108].mxu1 }
 0x1fb   : > { %v1859_v37 = vpop.f32.mrb[109].mxu1 }
 0x1fc   : > { %v2862_v61 = vpop.f32.mrb[94].mxu0 }
 0x1fd   : > { %v4555_v52 = vadd.f32 %v2862_v61, %v1387_v46  ;;  %v1606_v24 = vpop.f32.mrb[95].mxu0 }
 0x1fe   : > { %v4557_v49 = vadd.f32 %v1606_v24, %v1382_v42  ;;  %v1862_v33 = vpop.f32.mrb[110].mxu1 }
 0x1ff   : > { %v1864_v28 = vpop.f32.mrb[111].mxu1 }
 0x200   : > { %v2897_v55 = vpop.f32.mrb[96].mxu0 }
 0x201   : > { %v2058_v48 = vadd.f32 %v2897_v55, %v1832_v10  ;;  %v2052_v60 = vpop.f32.mrb[97].mxu0 }
 0x202   : > { %v1867_v26 = vpop.f32.mrb[112].mxu1  ;;  %v2053_v44 = vadd.f32 %v2052_v60, %v1827_v5 }
 0x203   : > { %v2212_v43 = vadd.f32 %v2058_v48, %v4463_v16  ;;  %v1869_v2 = vpop.f32.mrb[113].mxu1 }
 0x204   : > { %v2211_v1 = vadd.f32 %v2053_v44, %v4466_v3  ;;  %v2900_v38 = vpop.f32.mrb[98].mxu0 }
 0x205   : > { %2244 = vst [vmem:[%s3244_s24 + $0x8] sm:$0xff] %v2212_v43  ;;  %v2314_v46 = vmul.f32 %v2212_v43, %v2212_v43  ;;  %v2068_v42 = vadd.f32 %v2900_v38, %v1842_v21  ;;  %v2062_v30 = vpop.f32.mrb[99].mxu0 }
 0x206   : > { %2243 = vst [vmem:[%s3244_s24] sm:$0xff] %v2211_v1  ;;  %v2276_v18 = vadd.f32 %v2212_v43, %v2211_v1  ;;  %v2313_v59 = vmul.f32 %v2211_v1, %v2211_v1  ;;  %v1872_v0 = vpop.f32.mrb[114].mxu1  ;;  %v2063_v10 = vadd.f32 %v2062_v30, %v1837_v58 }
 0x207   : > { %v2214_v9 = vadd.f32 %v2068_v42, %v4471_v40  ;;  %v1874_v5 = vpop.f32.mrb[115].mxu1 }
 0x208   : > { %v2345_v8 = vadd.f32 %v2314_v46, %v2313_v59  ;;  %v2213_v16 = vadd.f32 %v2063_v10, %v4474_v15  ;;  %v2903_v50 = vpop.f32.mrb[100].mxu0 }
 0x209   : > { %2246 = vst [vmem:[%s3244_s24 + $0x18] sm:$0xff] %v2214_v9  ;;  %v2078_v3 = vadd.f32 %v2903_v50, %v1852_v25  ;;  %v2072_v41 = vpop.f32.mrb[101].mxu0  ;;  %v2316_v28 = vmul.f32 %v2214_v9, %v2214_v9 }
 0x20a   : > { %2245 = vst [vmem:[%s3244_s24 + $0x10] sm:$0xff] %v2213_v16  ;;  %v2277_v21 = vadd.f32 %v2276_v18, %v2213_v16  ;;  %v2315_v23 = vmul.f32 %v2213_v16, %v2213_v16  ;;  %v1877_v37 = vpop.f32.mrb[116].mxu1  ;;  %v2073_v61 = vadd.f32 %v2072_v41, %v1847_v13 }
 0x20b   : > { %v2216_v24 = vadd.f32 %v2078_v3, %v4479_v20  ;;  %v1879_v58 = vpop.f32.mrb[117].mxu1 }
 0x20c   : > { %v2346_v40 = vadd.f32 %v2345_v8, %v2315_v23  ;;  %v2215_v55 = vadd.f32 %v2073_v61, %v4482_v35  ;;  %v2278_v48 = vadd.f32 %v2277_v21, %v2214_v9  ;;  %v2906_v15 = vpop.f32.mrb[102].mxu0 }
 0x20d   : > { %2248 = vst [vmem:[%s3244_s24 + $0x28] sm:$0xff] %v2216_v24  ;;  %v2088_v60 = vadd.f32 %v2906_v15, %v1862_v33  ;;  %v2082_v25 = vpop.f32.mrb[103].mxu0  ;;  %v2318_v46 = vmul.f32 %v2216_v24, %v2216_v24 }
 0x20e   : > { %2247 = vst [vmem:[%s3244_s24 + $0x20] sm:$0xff] %v2215_v55  ;;  %v2279_v44 = vadd.f32 %v2278_v48, %v2215_v55  ;;  %v2317_v43 = vmul.f32 %v2215_v55, %v2215_v55  ;;  %v2347_v2 = vadd.f32 %v2346_v40, %v2316_v28  ;;  %v1882_v1 = vpop.f32.mrb[118].mxu1  ;;  %v2083_v13 = vadd.f32 %v2082_v25, %v1857_v6 }
 0x20f   : > { %v2218_v20 = vadd.f32 %v2088_v60, %v4487_v14  ;;  %v1884_v38 = vpop.f32.mrb[119].mxu1 }
 0x210   : > { %v2348_v42 = vadd.f32 %v2347_v2, %v2317_v43  ;;  %v2217_v35 = vadd.f32 %v2083_v13, %v4490_v36  ;;  %v2280_v30 = vadd.f32 %v2279_v44, %v2216_v24  ;;  %v2909_v18 = vpop.f32.mrb[104].mxu0 }
 0x211   : > { %2250 = vst [vmem:[%s3244_s24 + $0x38] sm:$0xff] %v2218_v20  ;;  %v2098_v33 = vadd.f32 %v2909_v18, %v1872_v0  ;;  %v2092_v59 = vpop.f32.mrb[105].mxu0  ;;  %v2320_v50 = vmul.f32 %v2218_v20, %v2218_v20 }
 0x212   : > { %2249 = vst [vmem:[%s3244_s24 + $0x30] sm:$0xff] %v2217_v35  ;;  %v2281_v10 = vadd.f32 %v2280_v30, %v2217_v35  ;;  %v2319_v9 = vmul.f32 %v2217_v35, %v2217_v35  ;;  %v2349_v5 = vadd.f32 %v2348_v42, %v2318_v46  ;;  %v1887_v8 = vpop.f32.mrb[120].mxu1  ;;  %v2093_v6 = vadd.f32 %v2092_v59, %v1867_v26 }
 0x213   : > { %v2220_v14 = vadd.f32 %v2098_v33, %v4493_v45  ;;  %v1889_v16 = vpop.f32.mrb[121].mxu1 }
 0x214   : > { %v2350_v3 = vadd.f32 %v2349_v5, %v2319_v9  ;;  %v2219_v36 = vadd.f32 %v2093_v6, %v4496_v27  ;;  %v2282_v41 = vadd.f32 %v2281_v10, %v2218_v20  ;;  %v2912_v21 = vpop.f32.mrb[106].mxu0 }
 0x215   : > { %2252 = vst [vmem:[%s3244_s24 + $0x48] sm:$0xff] %v2220_v14  ;;  %v2108_v0 = vadd.f32 %v2912_v21, %v1882_v1  ;;  %v2102_v23 = vpop.f32.mrb[107].mxu0  ;;  %v2322_v55 = vmul.f32 %v2220_v14, %v2220_v14 }
 0x216   : > { %2251 = vst [vmem:[%s3244_s24 + $0x40] sm:$0xff] %v2219_v36  ;;  %v2283_v61 = vadd.f32 %v2282_v41, %v2219_v36  ;;  %v2321_v24 = vmul.f32 %v2219_v36, %v2219_v36  ;;  %v2351_v58 = vadd.f32 %v2350_v3, %v2320_v50  ;;  %v1892_v28 = vpop.f32.mrb[122].mxu1  ;;  %v2103_v26 = vadd.f32 %v2102_v23, %v1877_v37 }
 0x217   : > { %v2222_v45 = vadd.f32 %v2108_v0, %v4499_v63  ;;  %v1894_v40 = vpop.f32.mrb[123].mxu1 }
 0x218   : > { %v2352_v48 = vadd.f32 %v2351_v58, %v2321_v24  ;;  %v2221_v27 = vadd.f32 %v2103_v26, %v4502_v34  ;;  %v2284_v15 = vadd.f32 %v2283_v61, %v2220_v14  ;;  %v2915_v60 = vpop.f32.mrb[108].mxu0 }
 0x219   : > { %2254 = vst [vmem:[%s3244_s24 + $0x58] sm:$0xff] %v2222_v45  ;;  %v2118_v25 = vadd.f32 %v2915_v60, %v1892_v28  ;;  %v2112_v44 = vpop.f32.mrb[109].mxu0  ;;  %v2324_v38 = vmul.f32 %v2222_v45, %v2222_v45 }
 0x21a   : > { %2253 = vst [vmem:[%s3244_s24 + $0x50] sm:$0xff] %v2221_v27  ;;  %v2285_v43 = vadd.f32 %v2284_v15, %v2221_v27  ;;  %v2323_v2 = vmul.f32 %v2221_v27, %v2221_v27  ;;  %v2353_v1 = vadd.f32 %v2352_v48, %v2322_v55  ;;  %v1897_v13 = vpop.f32.mrb[124].mxu1  ;;  %v2113_v37 = vadd.f32 %v2112_v44, %v1887_v8 }
 0x21b   : > { %v2224_v63 = vadd.f32 %v2118_v25, %v4505_v53  ;;  %v1899_v20 = vpop.f32.mrb[125].mxu1 }
 0x21c   : > { %v2354_v46 = vadd.f32 %v2353_v1, %v2323_v2  ;;  %v2223_v34 = vadd.f32 %v2113_v37, %v4508_v11  ;;  %v2286_v42 = vadd.f32 %v2285_v43, %v2222_v45  ;;  %v2918_v35 = vpop.f32.mrb[110].mxu0 }
 0x21d   : > { %2256 = vst [vmem:[%s3244_s24 + $0x68] sm:$0xff] %v2224_v63  ;;  %v2122_v30 = vpop.f32.mrb[111].mxu0  ;;  %v2326_v53 = vmul.f32 %v2224_v63, %v2224_v63 }
 0x21e   : > { %2255 = vst [vmem:[%s3244_s24 + $0x60] sm:$0xff] %v2223_v34  ;;  %v2287_v18 = vadd.f32 %v2286_v42, %v2223_v34  ;;  %v2325_v33 = vmul.f32 %v2223_v34, %v2223_v34  ;;  %v2355_v59 = vadd.f32 %v2354_v46, %v2324_v38  ;;  %v1902_v10 = vpop.f32.mrb[126].mxu1  ;;  %v2123_v9 = vadd.f32 %v2122_v30, %v1897_v13 }
 0x21f   : > { %v2128_v5 = vadd.f32 %v2918_v35, %v1902_v10  ;;  %v1904_v8 = vpop.f32.mrb[127].mxu1 }
 0x220   : > { %v2356_v6 = vadd.f32 %v2355_v59, %v2325_v33  ;;  %v2225_v14 = vadd.f32 %v2123_v9, %v4514_v12  ;;  %v2288_v16 = vadd.f32 %v2287_v18, %v2224_v63  ;;  %v2921_v11 = vpop.f32.mrb[112].mxu0 }
 0x221   : > { %v2226_v50 = vadd.f32 %v2128_v5, %v4511_v47  ;;  %v2132_v3 = vpop.f32.mrb[113].mxu0 }
 0x222   : > { %2257 = vst [vmem:[%s3244_s24 + $0x70] sm:$0xff] %v2225_v14  ;;  %v2289_v36 = vadd.f32 %v2288_v16, %v2225_v14  ;;  %v2327_v41 = vmul.f32 %v2225_v14, %v2225_v14  ;;  %v2357_v21 = vadd.f32 %v2356_v6, %v2326_v53  ;;  %v1907_v0 = vpop.f32.mrb[128].mxu1 }
 0x223   : > { %2258 = vst [vmem:[%s3244_s24 + $0x78] sm:$0xff] %v2226_v50  ;;  %v2133_v23 = vadd.f32 %v2132_v3, %v1907_v0  ;;  %v1909_v61 = vpop.f32.mrb[129].mxu1  ;;  %v2328_v24 = vmul.f32 %v2226_v50, %v2226_v50 }
 0x224   : > { %v2358_v58 = vadd.f32 %v2357_v21, %v2327_v41  ;;  %v2290_v28 = vadd.f32 %v2289_v36, %v2226_v50  ;;  %v2924_v26 = vpop.f32.mrb[114].mxu0 }
 0x225   : > { %v2227_v12 = vadd.f32 %v2133_v23, %v4520_v56  ;;  %v2142_v45 = vpop.f32.mrb[115].mxu0 }
 0x226   : > { %v2359_v40 = vadd.f32 %v2358_v58, %v2328_v24  ;;  %v1912_v47 = vpop.f32.mrb[130].mxu1 }
 0x227   : > { %2259 = vst [vmem:[%s3244_s24 + $0x80] sm:$0xff] %v2227_v12  ;;  %v2291_v55 = vadd.f32 %v2290_v28, %v2227_v12  ;;  %v2329_v48 = vmul.f32 %v2227_v12, %v2227_v12  ;;  %v2138_v27 = vadd.f32 %v2921_v11, %v1912_v47  ;;  %v1914_v15 = vpop.f32.mrb[131].mxu1 }
 0x228   : > { %v2927_v60 = vpop.f32.mrb[116].mxu0 }
 0x229   : > { %v2360_v25 = vadd.f32 %v2359_v40, %v2329_v48  ;;  %v2228_v44 = vadd.f32 %v2138_v27, %v4517_v62  ;;  %v2152_v43 = vpop.f32.mrb[117].mxu0 }
 0x22a   : > { %v1917_v2 = vpop.f32.mrb[132].mxu1 }
 0x22b   : > { %2260 = vst [vmem:[%s3244_s24 + $0x88] sm:$0xff] %v2228_v44  ;;  %v2292_v1 = vadd.f32 %v2291_v55, %v2228_v44  ;;  %v2330_v13 = vmul.f32 %v2228_v44, %v2228_v44  ;;  %v2143_v37 = vadd.f32 %v2142_v45, %v1917_v2  ;;  %v1919_v56 = vpop.f32.mrb[133].mxu1 }
 0x22c   : > { %v2930_v63 = vpop.f32.mrb[118].mxu0 }
 0x22d   : > { %v2361_v20 = vadd.f32 %v2360_v25, %v2330_v13  ;;  %v2229_v38 = vadd.f32 %v2143_v37, %v4526_v22  ;;  %v2162_v46 = vpop.f32.mrb[119].mxu0 }
 0x22e   : > { %v1922_v34 = vpop.f32.mrb[134].mxu1 }
 0x22f   : > { %2261 = vst [vmem:[%s3244_s24 + $0x90] sm:$0xff] %v2229_v38  ;;  %v2293_v42 = vadd.f32 %v2292_v1, %v2229_v38  ;;  %v2331_v35 = vmul.f32 %v2229_v38, %v2229_v38  ;;  %v2148_v30 = vadd.f32 %v2924_v26, %v1922_v34  ;;  %v1924_v18 = vpop.f32.mrb[135].mxu1 }
 0x230   : > { %v2933_v62 = vpop.f32.mrb[120].mxu0 }
 0x231   : > { %v2362_v33 = vadd.f32 %v2361_v20, %v2331_v35  ;;  %v2230_v59 = vadd.f32 %v2148_v30, %v4523_v31  ;;  %v2172_v10 = vpop.f32.mrb[121].mxu0 }
 0x232   : > { %v1927_v9 = vpop.f32.mrb[136].mxu1 }
 0x233   : > { %2262 = vst [vmem:[%s3244_s24 + $0x98] sm:$0xff] %v2230_v59  ;;  %v2294_v5 = vadd.f32 %v2293_v42, %v2230_v59  ;;  %v2332_v8 = vmul.f32 %v2230_v59, %v2230_v59  ;;  %v2153_v53 = vadd.f32 %v2152_v43, %v1927_v9  ;;  %v1929_v6 = vpop.f32.mrb[137].mxu1 }
 0x234   : > { %v2936_v22 = vpop.f32.mrb[122].mxu0 }
 0x235   : > { %v2363_v14 = vadd.f32 %v2362_v33, %v2332_v8  ;;  %v2231_v16 = vadd.f32 %v2153_v53, %v4532_v19  ;;  %v2182_v11 = vpop.f32.mrb[123].mxu0 }
 0x236   : > { %v1932_v50 = vpop.f32.mrb[138].mxu1 }
 0x237   : > { %2263 = vst [vmem:[%s3244_s24 + $0xa0] sm:$0xff] %v2231_v16  ;;  %v2295_v3 = vadd.f32 %v2294_v5, %v2231_v16  ;;  %v2333_v36 = vmul.f32 %v2231_v16, %v2231_v16  ;;  %v2158_v41 = vadd.f32 %v2927_v60, %v1932_v50  ;;  %v1934_v21 = vpop.f32.mrb[139].mxu1 }
 0x238   : > { %v4601_v31 = vpop.f32.mrb[124].mxu0 }
 0x239   : > { %v2364_v0 = vadd.f32 %v2363_v14, %v2333_v36  ;;  %v2232_v23 = vadd.f32 %v2158_v41, %v4529_v17  ;;  %v2192_v61 = vpop.f32.mrb[125].mxu0 }
 0x23a   : > { %v1937_v24 = vpop.f32.mrb[140].mxu1 }
 0x23b   : > { %2264 = vst [vmem:[%s3244_s24 + $0xa8] sm:$0xff] %v2232_v23  ;;  %v2296_v58 = vadd.f32 %v2295_v3, %v2232_v23  ;;  %v2334_v28 = vmul.f32 %v2232_v23, %v2232_v23  ;;  %v2163_v19 = vadd.f32 %v2162_v46, %v1937_v24  ;;  %v1939_v26 = vpop.f32.mrb[141].mxu1 }
 0x23c   : > { %v4605_v12 = vpop.f32.mrb[126].mxu0 }
 0x23d   : > { %v2365_v45 = vadd.f32 %v2364_v0, %v2334_v28  ;;  %v2233_v40 = vadd.f32 %v2163_v19, %v4538_v54  ;;  %v2202_v47 = vpop.f32.mrb[127].mxu0 }
 0x23e   : > { %v1942_v55 = vpop.f32.mrb[142].mxu1 }
 0x23f   : > { %2265 = vst [vmem:[%s3244_s24 + $0xb0] sm:$0xff] %v2233_v40  ;;  %v2297_v48 = vadd.f32 %v2296_v58, %v2233_v40  ;;  %v2335_v27 = vmul.f32 %v2233_v40, %v2233_v40  ;;  %v2168_v17 = vadd.f32 %v2930_v63, %v1942_v55  ;;  %v1944_v15 = vpop.f32.mrb[143].mxu1 }
 0x241   : > { %v2366_v60 = vadd.f32 %v2365_v45, %v2335_v27  ;;  %v2234_v25 = vadd.f32 %v2168_v17, %v4535_v7 }
 0x242   : > { %v1947_v44 = vpop.f32.mrb[144].mxu1 }
 0x243   : > { %2266 = vst [vmem:[%s3244_s24 + $0xb8] sm:$0xff] %v2234_v25  ;;  %v2298_v43 = vadd.f32 %v2297_v48, %v2234_v25  ;;  %v2336_v2 = vmul.f32 %v2234_v25, %v2234_v25  ;;  %v2173_v1 = vadd.f32 %v2172_v10, %v1947_v44  ;;  %v1949_v13 = vpop.f32.mrb[145].mxu1 }
 0x245   : > { %v2367_v37 = vadd.f32 %v2366_v60, %v2336_v2  ;;  %v2235_v54 = vadd.f32 %v2173_v1, %v4544_v57 }
 0x246   : > { %v1952_v56 = vpop.f32.mrb[146].mxu1 }
 0x247   : > { %2267 = vst [vmem:[%s3244_s24 + $0xc0] sm:$0xff] %v2235_v54  ;;  %v2299_v20 = vadd.f32 %v2298_v43, %v2235_v54  ;;  %v2337_v38 = vmul.f32 %v2235_v54, %v2235_v54  ;;  %v2178_v63 = vadd.f32 %v2933_v62, %v1952_v56  ;;  %v1954_v46 = vpop.f32.mrb[147].mxu1 }
 0x249   : > { %v2368_v34 = vadd.f32 %v2367_v37, %v2337_v38  ;;  %v2236_v7 = vadd.f32 %v2178_v63, %v4541_v51 }
 0x24a   : > { %v1957_v42 = vpop.f32.mrb[148].mxu1 }
 0x24b   : > { %2268 = vst [vmem:[%s3244_s24 + $0xc8] sm:$0xff] %v2236_v7  ;;  %v2300_v35 = vadd.f32 %v2299_v20, %v2236_v7  ;;  %v2338_v30 = vmul.f32 %v2236_v7, %v2236_v7  ;;  %v2183_v18 = vadd.f32 %v2182_v11, %v1957_v42  ;;  %v1959_v33 = vpop.f32.mrb[149].mxu1 }
 0x24d   : > { %v2369_v59 = vadd.f32 %v2368_v34, %v2338_v30  ;;  %v2237_v57 = vadd.f32 %v2183_v18, %v4549_v39 }
 0x24e   : > { %v1962_v10 = vpop.f32.mrb[150].mxu1 }
 0x24f   : > { %2269 = vst [vmem:[%s3244_s24 + $0xd0] sm:$0xff] %v2237_v57  ;;  %v2301_v9 = vadd.f32 %v2300_v35, %v2237_v57  ;;  %v2339_v5 = vmul.f32 %v2237_v57, %v2237_v57  ;;  %v2188_v62 = vadd.f32 %v2936_v22, %v1962_v10  ;;  %v1964_v8 = vpop.f32.mrb[151].mxu1 }
 0x251   : > { %v2370_v53 = vadd.f32 %v2369_v59, %v2339_v5  ;;  %v2238_v51 = vadd.f32 %v2188_v62, %v4546_v29 }
 0x252   : > { %v1967_v6 = vpop.f32.mrb[152].mxu1 }
 0x253   : > { %2270 = vst [vmem:[%s3244_s24 + $0xd8] sm:$0xff] %v2238_v51  ;;  %v2302_v14 = vadd.f32 %v2301_v9, %v2238_v51  ;;  %v2340_v16 = vmul.f32 %v2238_v51, %v2238_v51  ;;  %v2193_v11 = vadd.f32 %v2192_v61, %v1967_v6  ;;  %v1969_v50 = vpop.f32.mrb[153].mxu1 }
 0x255   : > { %v2371_v3 = vadd.f32 %v2370_v53, %v2340_v16  ;;  %v2239_v39 = vadd.f32 %v2193_v11, %v4553_v4 }
 0x256   : > { %v1972_v36 = vpop.f32.mrb[154].mxu1 }
 0x257   : > { %2271 = vst [vmem:[%s3244_s24 + $0xe0] sm:$0xff] %v2239_v39  ;;  %v2303_v41 = vadd.f32 %v2302_v14, %v2239_v39  ;;  %v2341_v21 = vmul.f32 %v2239_v39, %v2239_v39  ;;  %v2198_v22 = vadd.f32 %v4601_v31, %v1972_v36  ;;  %v1974_v0 = vpop.f32.mrb[155].mxu1 }
 0x259   : > { %v2372_v23 = vadd.f32 %v2371_v3, %v2341_v21  ;;  %v2240_v29 = vadd.f32 %v2198_v22, %v4551_v32 }
 0x25a   : > { %v1977_v24 = vpop.f32.mrb[156].mxu1 }
 0x25b   : > { %2272 = vst [vmem:[%s3244_s24 + $0xe8] sm:$0xff] %v2240_v29  ;;  %v2304_v58 = vadd.f32 %v2303_v41, %v2240_v29  ;;  %v2342_v61 = vmul.f32 %v2240_v29, %v2240_v29  ;;  %v2203_v28 = vadd.f32 %v2202_v47, %v1977_v24  ;;  %v1979_v19 = vpop.f32.mrb[157].mxu1 }
 0x25d   : > { %v2373_v26 = vadd.f32 %v2372_v23, %v2342_v61  ;;  %v2241_v4 = vadd.f32 %v2203_v28, %v4557_v49 }
 0x25e   : > { %v1982_v45 = vpop.f32.mrb[158].mxu1 }
 0x25f   : > { %2273 = vst [vmem:[%s3244_s24 + $0xf0] sm:$0xff] %v2241_v4  ;;  %v2305_v40 = vadd.f32 %v2304_v58, %v2241_v4  ;;  %v2343_v55 = vmul.f32 %v2241_v4, %v2241_v4  ;;  %v2208_v31 = vadd.f32 %v4605_v12, %v1982_v45  ;;  %v1984_v48 = vpop.f32.mrb[159].mxu1  ;;  %v2275_v12 = vld [vmem:[%s4642_s4] sm:$0x3] }
 0x261   : > { %v2374_v27 = vadd.f32 %v2373_v26, %v2343_v55  ;;  %v2242_v32 = vadd.f32 %v2208_v31, %v4555_v52 }
 0x263   : > { %2274 = vst [vmem:[%s3244_s24 + $0xf8] sm:$0xff] %v2242_v32  ;;  %v2306_v17 = vadd.f32 %v2305_v40, %v2242_v32  ;;  %v2344_v15 = vmul.f32 %v2242_v32, %v2242_v32 }
 0x265   : > { %v2307_v60 = vrot.slane %v2306_v17, 4  ;;  %v2375_v25 = vadd.f32 %v2374_v27, %v2344_v15 }
 0x267   : > { %v2308_v47 = vadd.f32 %v2307_v60, %v2306_v17  ;;  %v2376_v44 = vrot.slane %v2375_v25, 4 }
 0x269   : > { %v2309_v43 = vrot.slane %v2308_v47, 2  ;;  %v2377_v2 = vadd.f32 %v2376_v44, %v2375_v25 }
 0x26b   : > { %v2310_v49 = vadd.f32 %v2309_v43, %v2308_v47  ;;  %v2378_v1 = vrot.slane %v2377_v2, 2 }
 0x26d   : > { %v2311_v13 = vrot.slane %v2310_v49, 1  ;;  %v2379_v37 = vadd.f32 %v2378_v1, %v2377_v2 }
 0x26f   : > { %v2380_v54 = vrot.slane %v2379_v37, 1  ;;  %v2312_v52 = vadd.f32 %v2311_v13, %v2310_v49 }
 0x271   : > { %v2381_v56 = vadd.f32 %v2380_v54, %v2379_v37 }
 0x273   : > { %v2383_v20 = vsel %vm2382_vm0, %v2312_v52, %v2381_v56 }
 0x274   : > { %v2384_v38 = vadd.f32 %v2383_v20, %v2275_v12 }
 0x276   : > { %2385 = vst [vmem:[%s4642_s4] sm:$0x3] %v2384_v38 }
 0x277 PF: > { %s15_s15 = sadd.s32 1, %s3199_s15  }
 0x278   : > { %p12_p5 = scmp.ge.s32.totalorder %s15_s15, 4  }
 0x27a   :  { %14 = sbr.rel (!%p12_p5) target bundleno = 1 (0x1), region = 78 }

</bundles_post_ra>
